<compile_context>
chip_gen: v7x
topology: tpu7x:2x2x1
jax: 0.10.0
libtpu: 0.0.40
codegen_flags: <defaults>
</compile_context>

<pallas_src>
import functools

import jax
import jax.numpy as jnp
from jax.experimental import pallas as pl
from jax.experimental.pallas import tpu as pltpu

EPS = 1e-5
LANE = 128  # TPU lane width: channel dims are padded to a multiple of this.


def _round_up(x, m):
    return ((x + m - 1) // m) * m


# ----------------------------------------------------------------------------
# Fused BasicBlock kernel (one image per grid step, everything VMEM-resident)
# ----------------------------------------------------------------------------
def _make_basic_block_kernel(*, H2, W2, Ho, Wo, s, Cp, Cop, P1, P2,
                             equal_in_out):
    """Build the fused kernel for static geometry.

    Layout: activations are flat (rows, C) planes whose row index encodes the
    zero-halo padded spatial position (row = rr*(W2+2) + cc).  With that row
    stride, every 3x3 tap is one contiguous slab `pl.ds(r0*(W2+2)+c0, Ho*(W2+2))`
    and the matmul output is "over-wide" (Ho*(Wo+2) rows); the extra columns
    land exactly on the halo columns of the next stage and are masked to zero
    (out1) or dropped (final output).  Stride-2 is handled by a wrapper-side
    phase split (space-to-depth), so all slabs are unit-stride.
    """
    Wp = W2 + 2          # padded row width of a phase plane (== Wo + 2)
    L = Ho * Wp          # over-wide matmul M dimension

    def tap(k):          # 3x3 kernel, pad = 1, stride s, phase-split layout
        q = k - 1
        a = q % s                       # phase along this axis
        return a, 1 + (q - a) // s      # (phase, start row/col in padded plane)

    def kernel(x_ref, m1_ref, m2_ref, s1_ref, b1_ref, w1_ref,
               s2_ref, b2_ref, w2_ref, *rest):
        if equal_in_out:
            o_ref, out0_ref, out1_ref, acc_ref = rest
            ws_ref = None
        else:
            ws_ref, o_ref, out0_ref, out1_ref, acc_ref = rest

        # ---- bn1 + relu (interior mask keeps the conv halo exactly zero) ---
        s1 = s1_ref[...]            # (1, Cp)  folded BN scale (f32)
        b1 = b1_ref[...]            # (1, Cp)  folded BN bias  (f32)
        m1 = m1_ref[...]            # (P1, 1)  1.0 on interior rows, else 0.0
        for p in range(s * s):
            xp = x_ref[0, p]                                   # (P1, Cp) bf16
            o0 = jnp.maximum(xp * s1 + b1, 0.0) * m1           # f32
            out0_ref[p] = o0.astype(jnp.bfloat16)              # single cast

        # ---- conv1 (3x3, stride s): 9 flat-slab tap matmuls ----------------
        first = True
        for kh in range(3):
            a, r0 = tap(kh)
            for kw in range(3):
                b, c0 = tap(kw)
                slab = out0_ref[a * s + b, pl.ds(r0 * Wp + c0, L), :]
                prod = jnp.dot(slab, w1_ref[kh, kw],
                               preferred_element_type=jnp.float32)
                if first:
                    acc_ref[...] = prod      # first tap assigns (no zero fill)
                    first = False
                else:
                    acc_ref[...] += prod

        # ---- bn2 + relu (dropout p=0.3 is identity in eval mode) -----------
        out1 = jnp.maximum(acc_ref[...] * s2_ref[...] + b2_ref[...], 0.0)
        out1 = out1 * m2_ref[...]    # zero the over-wide cols -> conv2 halo
        # Two tiny strip stores cover the halo rows not touched below.
        out1_ref[pl.ds(0, Wo + 3), :] = jnp.zeros((Wo + 3, Cop), jnp.bfloat16)
        tail = (Ho + 1) * Wp + 1
        out1_ref[pl.ds(tail, P2 - tail), :] = jnp.zeros((P2 - tail, Cop),
                                                        jnp.bfloat16)
        out1_ref[pl.ds(Wo + 3, L), :] = out1.astype(jnp.bfloat16)

        # ---- conv2 (3x3, stride 1): 9 flat-slab tap matmuls ----------------
        first = True
        for kh in range(3):
            for kw in range(3):
                slab = out1_ref[pl.ds(kh * Wp + kw, L), :]
                prod = jnp.dot(slab, w2_ref[kh, kw],
                               preferred_element_type=jnp.float32)
                if first:
                    acc_ref[...] = prod
                    first = False
                else:
                    acc_ref[...] += prod

        # ---- shortcut + residual add (fused epilogue) -----------------------
        if equal_in_out:
            # identity shortcut: original x (stride == 1, Cin == Cout)
            sc = x_ref[0, 0, pl.ds(W2 + 3, L), :]
            acc_ref[...] += sc.astype(jnp.float32)
        else:
            # 1x1 stride-s conv of out0: phase (0, 0) interior slab.
            sc_in = out0_ref[0, pl.ds(W2 + 3, L), :]
            acc_ref[...] += jnp.dot(sc_in, ws_ref[...],
                                    preferred_element_type=jnp.float32)

        # ---- drop the over-wide garbage columns and store -------------------
        for i in range(Ho):
            o_ref[0, i] = acc_ref[pl.ds(i * Wp, Wo), :].astype(o_ref.dtype)

    return kernel


# ----------------------------------------------------------------------------
# Plain-JAX glue: BN folding, weight layout, channel padding, phase split
# ----------------------------------------------------------------------------
def _fold_bn(gamma, beta, mean, var, cpad):
    scale = gamma / jnp.sqrt(var + EPS)
    bias = beta - mean * scale
    scale = jnp.pad(scale, (0, cpad - scale.shape[0]))
    bias = jnp.pad(bias, (0, cpad - bias.shape[0]))
    return (scale.reshape(1, cpad).astype(jnp.float32),
            bias.reshape(1, cpad).astype(jnp.float32))


def _conv_w_to_kkio(w_oihw, cin_pad, cout_pad):
    """PyTorch OIHW -> (kh, kw, Cin_pad, Cout_pad) in bf16 (zero padded)."""
    o, i, _, _ = w_oihw.shape
    w = jnp.transpose(w_oihw, (2, 3, 1, 0))                      # (kh,kw,i,o)
    w = jnp.pad(w, ((0, 0), (0, 0), (0, cin_pad - i), (0, cout_pad - o)))
    return w.astype(jnp.bfloat16)


def _shortcut_w(w_oi11, cin_pad, cout_pad):
    o, i = w_oi11.shape[:2]
    w = jnp.transpose(w_oi11[:, :, 0, 0], (1, 0))                # (i, o)
    w = jnp.pad(w, ((0, cin_pad - i), (0, cout_pad - o)))
    return w.astype(jnp.bfloat16)


# ----------------------------------------------------------------------------
# BasicBlock forward (single fused Pallas kernel)
# ----------------------------------------------------------------------------
@functools.partial(jax.jit, static_argnames=("stride", "equal_in_out"))
def basic_block_forward(x_nhwc, params, *, stride, equal_in_out):
    N, H, W, Cin = x_nhwc.shape
    Cout = params["w_conv1"].shape[0]

    if equal_in_out and (stride != 1 or Cin != Cout):
        raise ValueError("equal_in_out path requires stride == 1 and Cin == Cout")
    if H % stride or W % stride:
        raise ValueError("H and W must be divisible by stride")

    s = stride
    Cp = max(_round_up(Cin, LANE), LANE)     # padded in-channels  (lane dense)
    Cop = max(_round_up(Cout, LANE), LANE)   # padded out-channels (lane dense)
    H2, W2 = H // s, W // s
    Ho = (H + 2 - 3) // s + 1
    Wo = (W + 2 - 3) // s + 1
    assert Ho == H2 and Wo == W2             # holds for k=3, pad=1, H % s == 0

    Wp = W2 + 2
    # Flat padded plane sizes (+2 rows of over-read slack for corner taps),
    # rounded up to 8 sublanes.
    P1 = _round_up((H2 + 2) * Wp + 2, 8)
    P2 = _round_up((Ho + 2) * (Wo + 2) + 2, 8)
    L = Ho * Wp

    f32, bf16 = jnp.float32, jnp.bfloat16

    # BN params folded to (scale, bias), padded channels get (0, 0).
    s1, b1 = _fold_bn(params["bn1_gamma"], params["bn1_beta"],
                      params["bn1_mean"], params["bn1_var"], Cp)
    s2, b2 = _fold_bn(params["bn2_gamma"], params["bn2_beta"],
                      params["bn2_mean"], params["bn2_var"], Cop)

    w1 = _conv_w_to_kkio(params["w_conv1"], Cp, Cop)    # (3,3,Cp ,Cop) bf16
    w2 = _conv_w_to_kkio(params["w_conv2"], Cop, Cop)   # (3,3,Cop,Cop) bf16

    # Interior masks (tiny, loaded once per grid step).
    r1 = jnp.arange(P1)
    ii, jj = r1 // Wp, r1 % Wp
    m1 = (((ii >= 1) & (ii <= H2) & (jj >= 1) & (jj <= W2))
          .astype(f32).reshape(P1, 1))
    r2 = jnp.arange(L)
    m2 = ((r2 % Wp) < Wo).astype(f32).reshape(L, 1)

    # x: pad channels to 128 lanes, phase-split (space-to-depth by s), add the
    # per-phase zero halo, flatten rows, pad to P1 rows, cast to bf16.
    xc = jnp.pad(x_nhwc, ((0, 0), (0, 0), (0, 0), (0, Cp - Cin)))
    xph = (xc.reshape(N, H2, s, W2, s, Cp)
             .transpose(0, 2, 4, 1, 3, 5)
             .reshape(N, s * s, H2, W2, Cp))
    xpad = jnp.pad(xph, ((0, 0), (0, 0), (1, 1), (1, 1), (0, 0)))
    xflat = xpad.reshape(N, s * s, (H2 + 2) * Wp, Cp)
    xflat = jnp.pad(xflat, ((0, 0), (0, 0), (0, P1 - (H2 + 2) * Wp), (0, 0)))
    xflat = xflat.astype(bf16)

    inputs = [xflat, m1, m2, s1, b1, w1, s2, b2, w2]
    in_specs = [
        pl.BlockSpec((1, s * s, P1, Cp), lambda n: (n, 0, 0, 0)),
        pl.BlockSpec((P1, 1), lambda n: (0, 0)),
        pl.BlockSpec((L, 1), lambda n: (0, 0)),
        pl.BlockSpec((1, Cp), lambda n: (0, 0)),
        pl.BlockSpec((1, Cp), lambda n: (0, 0)),
        pl.BlockSpec((3, 3, Cp, Cop), lambda n: (0, 0, 0, 0)),
        pl.BlockSpec((1, Cop), lambda n: (0, 0)),
        pl.BlockSpec((1, Cop), lambda n: (0, 0)),
        pl.BlockSpec((3, 3, Cop, Cop), lambda n: (0, 0, 0, 0)),
    ]
    if not equal_in_out:
        ws = _shortcut_w(params["w_shortcut"], Cp, Cop)   # (Cp, Cop) bf16
        inputs.append(ws)
        in_specs.append(pl.BlockSpec((Cp, Cop), lambda n: (0, 0)))

    kernel = _make_basic_block_kernel(H2=H2, W2=W2, Ho=Ho, Wo=Wo, s=s,
                                      Cp=Cp, Cop=Cop, P1=P1, P2=P2,
                                      equal_in_out=equal_in_out)

    y_pad = pl.pallas_call(
        kernel,
        out_shape=jax.ShapeDtypeStruct((N, Ho, Wo, Cop), f32),
        grid=(N,),
        in_specs=in_specs,
        out_specs=pl.BlockSpec((1, Ho, Wo, Cop), lambda n: (n, 0, 0, 0)),
        scratch_shapes=[
            pltpu.VMEM((s * s, P1, Cp), bf16),   # out0: flat halo'd phase planes
            pltpu.VMEM((P2, Cop), bf16),         # out1: flat halo'd plane
            pltpu.VMEM((L, Cop), f32),           # over-wide MXU accumulator
        ],
        compiler_params=pltpu.CompilerParams(
            dimension_semantics=("parallel",),
            vmem_limit_bytes=32 * 1024 * 1024),
    )(*inputs)

    return y_pad[..., :Cout]


# ----------------------------------------------------------------------------
# Pure-JAX (XLA) reference for correctness check
# ----------------------------------------------------------------------------
def _conv_ref(x_nhwc, w_oihw, stride, pad):
    w_hwio = jnp.transpose(w_oihw, (2, 3, 1, 0))
    return jax.lax.conv_general_dilated(
        x_nhwc, w_hwio, (stride, stride), [(pad, pad), (pad, pad)],
        dimension_numbers=("NHWC", "HWIO", "NHWC"))


def reference_forward(x_nhwc, params, *, stride, equal_in_out):
    def bn(x, g, b, m, v):
        return (x - m) / jnp.sqrt(v + EPS) * g + b

    out0 = jax.nn.relu(bn(x_nhwc, params["bn1_gamma"], params["bn1_beta"],
                          params["bn1_mean"], params["bn1_var"]))
    x_sc = x_nhwc if equal_in_out else out0
    out = _conv_ref(out0, params["w_conv1"], stride, 1)
    out = jax.nn.relu(bn(out, params["bn2_gamma"], params["bn2_beta"],
                         params["bn2_mean"], params["bn2_var"]))
    out = _conv_ref(out, params["w_conv2"], 1, 1)
    sc = x_sc if equal_in_out else _conv_ref(x_sc, params["w_shortcut"], stride, 0)
    return sc + out


# ----------------------------------------------------------------------------
# Main
# ----------------------------------------------------------------------------
def _make_params(key, cin, cout):
    ks = jax.random.split(key, 11)
    return {
        "bn1_gamma": 1.0 + 0.1 * jax.random.normal(ks[0], (cin,), jnp.float32),
        "bn1_beta": 0.1 * jax.random.normal(ks[1], (cin,), jnp.float32),
        "bn1_mean": 0.05 * jax.random.normal(ks[2], (cin,), jnp.float32),
        "bn1_var": 1.0 + 0.1 * jax.random.uniform(ks[3], (cin,), jnp.float32),
        "w_conv1": jax.random.normal(ks[4], (cout, cin, 3, 3), jnp.float32)
        * (2.0 / (cin * 9)) ** 0.5,
        "bn2_gamma": 1.0 + 0.1 * jax.random.normal(ks[5], (cout,), jnp.float32),
        "bn2_beta": 0.1 * jax.random.normal(ks[6], (cout,), jnp.float32),
        "bn2_mean": 0.05 * jax.random.normal(ks[7], (cout,), jnp.float32),
        "bn2_var": 1.0 + 0.1 * jax.random.uniform(ks[8], (cout,), jnp.float32),
        "w_conv2": jax.random.normal(ks[9], (cout, cout, 3, 3), jnp.float32)
        * (2.0 / (cout * 9)) ** 0.5,
        "w_shortcut": jax.random.normal(ks[10], (cout, cin, 1, 1), jnp.float32)
        * (2.0 / cin) ** 0.5,
    }


if __name__ == "__main__":
    key = jax.random.PRNGKey(0)
    N, H, W = 2, 16, 16

    # (Cin, Cout, stride): projection-shortcut block and identity block.
    configs = [(4, 8, 2), (8, 8, 1)]
    for cfg_idx, (Cin, Cout, stride) in enumerate(configs):
        equal_in_out = (Cin == Cout)
        pkey = jax.random.fold_in(key, cfg_idx)
        params = _make_params(pkey, Cin, Cout)

        # Input in PyTorch NCHW, transposed to NHWC at the boundary.
        x_nchw = jax.random.normal(jax.random.fold_in(pkey, 7),
                                   (N, Cin, H, W), jnp.float32)
        x_nhwc = jnp.transpose(x_nchw, (0, 2, 3, 1))

        y = basic_block_forward(x_nhwc, params, stride=stride,
                                equal_in_out=equal_in_out)
        y = jax.block_until_ready(y)

        y_ref = reference_forward(x_nhwc, params, stride=stride,
                                  equal_in_out=equal_in_out)
        y_ref = jax.block_until_ready(y_ref)

        assert y.shape == (N, H // stride, W // stride, Cout), y.shape
        # bf16 MXU inputs with f32 accumulation -> relaxed tolerance vs f32 ref.
        if not jnp.allclose(y, y_ref, atol=5e-2, rtol=5e-2):
            err = float(jnp.max(jnp.abs(y - y_ref)))
            raise AssertionError(
                f"config {(Cin, Cout, stride)}: Pallas BasicBlock does not "
                f"match XLA reference (max err {err})")

    print("KERNEL_OK")
</pallas_src>

<mosaic_0001>
module attributes {stable_mosaic.version = 11 : i64} {
  func.func @kernel(%arg0: i32, %arg1: memref<1x4x104x128xbf16, #tpu.memory_space<vmem>>, %arg2: memref<104x1xf32, #tpu.memory_space<vmem>>, %arg3: memref<80x1xf32, #tpu.memory_space<vmem>>, %arg4: memref<1x128xf32, #tpu.memory_space<vmem>>, %arg5: memref<1x128xf32, #tpu.memory_space<vmem>>, %arg6: memref<3x3x128x128xbf16, #tpu.memory_space<vmem>>, %arg7: memref<1x128xf32, #tpu.memory_space<vmem>>, %arg8: memref<1x128xf32, #tpu.memory_space<vmem>>, %arg9: memref<3x3x128x128xbf16, #tpu.memory_space<vmem>>, %arg10: memref<128x128xbf16, #tpu.memory_space<vmem>>, %arg11: memref<1x8x8x128xf32, #tpu.memory_space<vmem>>, %arg12: memref<4x104x128xbf16, #tpu.memory_space<vmem>>, %arg13: memref<104x128xbf16, #tpu.memory_space<vmem>>, %arg14: memref<80x128xf32, #tpu.memory_space<vmem>>) attributes {dimension_semantics = [#tpu.dimension_semantics<parallel>], iteration_bounds = array<i64: 2>, scalar_prefetch = 0 : i64, scratch_operands = 3 : i64, tpu.core_type = #tpu.core_type<tc>, window_params = [{transform_indices = @transform_0, window_bounds = array<i64: 1, 4, 104, 128>}, {pipeline_mode = #tpu.pipeline_mode<synchronous>, transform_indices = @transform_1, window_bounds = array<i64: 104, 1>}, {pipeline_mode = #tpu.pipeline_mode<synchronous>, transform_indices = @transform_2, window_bounds = array<i64: 80, 1>}, {pipeline_mode = #tpu.pipeline_mode<synchronous>, transform_indices = @transform_3, window_bounds = array<i64: 1, 128>}, {pipeline_mode = #tpu.pipeline_mode<synchronous>, transform_indices = @transform_4, window_bounds = array<i64: 1, 128>}, {pipeline_mode = #tpu.pipeline_mode<synchronous>, transform_indices = @transform_5, window_bounds = array<i64: 3, 3, 128, 128>}, {pipeline_mode = #tpu.pipeline_mode<synchronous>, transform_indices = @transform_6, window_bounds = array<i64: 1, 128>}, {pipeline_mode = #tpu.pipeline_mode<synchronous>, transform_indices = @transform_7, window_bounds = array<i64: 1, 128>}, {pipeline_mode = #tpu.pipeline_mode<synchronous>, transform_indices = @transform_8, window_bounds = array<i64: 3, 3, 128, 128>}, {pipeline_mode = #tpu.pipeline_mode<synchronous>, transform_indices = @transform_9, window_bounds = array<i64: 128, 128>}, {transform_indices = @transform_10, window_bounds = array<i64: 1, 8, 8, 128>}]} {
    %c0 = arith.constant 0 : index
    %c0_0 = arith.constant 0 : index
    %0 = vector.load %arg4[%c0, %c0_0] : memref<1x128xf32, #tpu.memory_space<vmem>>, vector<1x128xf32>
    %c0_1 = arith.constant 0 : index
    %c0_2 = arith.constant 0 : index
    %1 = vector.load %arg5[%c0_1, %c0_2] : memref<1x128xf32, #tpu.memory_space<vmem>>, vector<1x128xf32>
    %c0_3 = arith.constant 0 : index
    %c0_4 = arith.constant 0 : index
    %2 = vector.load %arg2[%c0_3, %c0_4] : memref<104x1xf32, #tpu.memory_space<vmem>>, vector<104x1xf32>
    %c0_5 = arith.constant 0 : index
    %c0_6 = arith.constant 0 : index
    %c0_7 = arith.constant 0 : index
    %c0_8 = arith.constant 0 : index
    %3 = vector.load %arg1[%c0_5, %c0_6, %c0_7, %c0_8] : memref<1x4x104x128xbf16, #tpu.memory_space<vmem>>, vector<1x1x104x128xbf16>
    %4 = vector.shape_cast %3 : vector<1x1x104x128xbf16> to vector<104x128xbf16>
    %5 = arith.extf %4 : vector<104x128xbf16> to vector<104x128xf32>
    %6 = vector.broadcast %0 : vector<1x128xf32> to vector<104x128xf32>
    %7 = arith.mulf %5, %6 : vector<104x128xf32>
    %8 = vector.broadcast %1 : vector<1x128xf32> to vector<104x128xf32>
    %9 = arith.addf %7, %8 : vector<104x128xf32>
    %cst = arith.constant 0.000000e+00 : f32
    %10 = vector.broadcast %cst : f32 to vector<104x128xf32>
    %11 = arith.maximumf %9, %10 : vector<104x128xf32>
    %12 = vector.broadcast %2 : vector<104x1xf32> to vector<104x128xf32>
    %13 = arith.mulf %11, %12 : vector<104x128xf32>
    %14 = arith.truncf %13 : vector<104x128xf32> to vector<104x128xbf16>
    %c0_9 = arith.constant 0 : index
    %c0_10 = arith.constant 0 : index
    %c0_11 = arith.constant 0 : index
    %15 = vector.load %arg12[%c0_9, %c0_10, %c0_11] : memref<4x104x128xbf16, #tpu.memory_space<vmem>>, vector<1x104x128xbf16>
    %16 = vector.shape_cast %15 : vector<1x104x128xbf16> to vector<104x128xbf16>
    %17 = vector.shape_cast %14 : vector<104x128xbf16> to vector<1x104x128xbf16>
    tpu.vector_store %arg12[%c0_9, %c0_10, %c0_11], %17 {strides = array<i32>} : memref<4x104x128xbf16, #tpu.memory_space<vmem>>, vector<1x104x128xbf16>,
    %c0_12 = arith.constant 0 : index
    %c1 = arith.constant 1 : index
    %c0_13 = arith.constant 0 : index
    %c0_14 = arith.constant 0 : index
    %18 = vector.load %arg1[%c0_12, %c1, %c0_13, %c0_14] : memref<1x4x104x128xbf16, #tpu.memory_space<vmem>>, vector<1x1x104x128xbf16>
    %19 = vector.shape_cast %18 : vector<1x1x104x128xbf16> to vector<104x128xbf16>
    %20 = arith.extf %19 : vector<104x128xbf16> to vector<104x128xf32>
    %21 = vector.broadcast %0 : vector<1x128xf32> to vector<104x128xf32>
    %22 = arith.mulf %20, %21 : vector<104x128xf32>
    %23 = vector.broadcast %1 : vector<1x128xf32> to vector<104x128xf32>
    %24 = arith.addf %22, %23 : vector<104x128xf32>
    %cst_15 = arith.constant 0.000000e+00 : f32
    %25 = vector.broadcast %cst_15 : f32 to vector<104x128xf32>
    %26 = arith.maximumf %24, %25 : vector<104x128xf32>
    %27 = vector.broadcast %2 : vector<104x1xf32> to vector<104x128xf32>
    %28 = arith.mulf %26, %27 : vector<104x128xf32>
    %29 = arith.truncf %28 : vector<104x128xf32> to vector<104x128xbf16>
    %c1_16 = arith.constant 1 : index
    %c0_17 = arith.constant 0 : index
    %c0_18 = arith.constant 0 : index
    %30 = vector.load %arg12[%c1_16, %c0_17, %c0_18] : memref<4x104x128xbf16, #tpu.memory_space<vmem>>, vector<1x104x128xbf16>
    %31 = vector.shape_cast %30 : vector<1x104x128xbf16> to vector<104x128xbf16>
    %32 = vector.shape_cast %29 : vector<104x128xbf16> to vector<1x104x128xbf16>
    tpu.vector_store %arg12[%c1_16, %c0_17, %c0_18], %32 {strides = array<i32>} : memref<4x104x128xbf16, #tpu.memory_space<vmem>>, vector<1x104x128xbf16>,
    %c0_19 = arith.constant 0 : index
    %c2 = arith.constant 2 : index
    %c0_20 = arith.constant 0 : index
    %c0_21 = arith.constant 0 : index
    %33 = vector.load %arg1[%c0_19, %c2, %c0_20, %c0_21] : memref<1x4x104x128xbf16, #tpu.memory_space<vmem>>, vector<1x1x104x128xbf16>
    %34 = vector.shape_cast %33 : vector<1x1x104x128xbf16> to vector<104x128xbf16>
    %35 = arith.extf %34 : vector<104x128xbf16> to vector<104x128xf32>
    %36 = vector.broadcast %0 : vector<1x128xf32> to vector<104x128xf32>
    %37 = arith.mulf %35, %36 : vector<104x128xf32>
    %38 = vector.broadcast %1 : vector<1x128xf32> to vector<104x128xf32>
    %39 = arith.addf %37, %38 : vector<104x128xf32>
    %cst_22 = arith.constant 0.000000e+00 : f32
    %40 = vector.broadcast %cst_22 : f32 to vector<104x128xf32>
    %41 = arith.maximumf %39, %40 : vector<104x128xf32>
    %42 = vector.broadcast %2 : vector<104x1xf32> to vector<104x128xf32>
    %43 = arith.mulf %41, %42 : vector<104x128xf32>
    %44 = arith.truncf %43 : vector<104x128xf32> to vector<104x128xbf16>
    %c2_23 = arith.constant 2 : index
    %c0_24 = arith.constant 0 : index
    %c0_25 = arith.constant 0 : index
    %45 = vector.load %arg12[%c2_23, %c0_24, %c0_25] : memref<4x104x128xbf16, #tpu.memory_space<vmem>>, vector<1x104x128xbf16>
    %46 = vector.shape_cast %45 : vector<1x104x128xbf16> to vector<104x128xbf16>
    %47 = vector.shape_cast %44 : vector<104x128xbf16> to vector<1x104x128xbf16>
    tpu.vector_store %arg12[%c2_23, %c0_24, %c0_25], %47 {strides = array<i32>} : memref<4x104x128xbf16, #tpu.memory_space<vmem>>, vector<1x104x128xbf16>,
    %c0_26 = arith.constant 0 : index
    %c3 = arith.constant 3 : index
    %c0_27 = arith.constant 0 : index
    %c0_28 = arith.constant 0 : index
    %48 = vector.load %arg1[%c0_26, %c3, %c0_27, %c0_28] : memref<1x4x104x128xbf16, #tpu.memory_space<vmem>>, vector<1x1x104x128xbf16>
    %49 = vector.shape_cast %48 : vector<1x1x104x128xbf16> to vector<104x128xbf16>
    %50 = arith.extf %49 : vector<104x128xbf16> to vector<104x128xf32>
    %51 = vector.broadcast %0 : vector<1x128xf32> to vector<104x128xf32>
    %52 = arith.mulf %50, %51 : vector<104x128xf32>
    %53 = vector.broadcast %1 : vector<1x128xf32> to vector<104x128xf32>
    %54 = arith.addf %52, %53 : vector<104x128xf32>
    %cst_29 = arith.constant 0.000000e+00 : f32
    %55 = vector.broadcast %cst_29 : f32 to vector<104x128xf32>
    %56 = arith.maximumf %54, %55 : vector<104x128xf32>
    %57 = vector.broadcast %2 : vector<104x1xf32> to vector<104x128xf32>
    %58 = arith.mulf %56, %57 : vector<104x128xf32>
    %59 = arith.truncf %58 : vector<104x128xf32> to vector<104x128xbf16>
    %c3_30 = arith.constant 3 : index
    %c0_31 = arith.constant 0 : index
    %c0_32 = arith.constant 0 : index
    %60 = vector.load %arg12[%c3_30, %c0_31, %c0_32] : memref<4x104x128xbf16, #tpu.memory_space<vmem>>, vector<1x104x128xbf16>
    %61 = vector.shape_cast %60 : vector<1x104x128xbf16> to vector<104x128xbf16>
    %62 = vector.shape_cast %59 : vector<104x128xbf16> to vector<1x104x128xbf16>
    tpu.vector_store %arg12[%c3_30, %c0_31, %c0_32], %62 {strides = array<i32>} : memref<4x104x128xbf16, #tpu.memory_space<vmem>>, vector<1x104x128xbf16>,
    %c3_33 = arith.constant 3 : index
    %c0_34 = arith.constant 0 : index
    %c0_35 = arith.constant 0 : index
    %63 = vector.load %arg12[%c3_33, %c0_34, %c0_35] : memref<4x104x128xbf16, #tpu.memory_space<vmem>>, vector<1x80x128xbf16>
    %64 = vector.shape_cast %63 : vector<1x80x128xbf16> to vector<80x128xbf16>
    %c0_36 = arith.constant 0 : index
    %c0_37 = arith.constant 0 : index
    %c0_38 = arith.constant 0 : index
    %c0_39 = arith.constant 0 : index
    %65 = vector.load %arg6[%c0_36, %c0_37, %c0_38, %c0_39] : memref<3x3x128x128xbf16, #tpu.memory_space<vmem>>, vector<1x1x128x128xbf16>
    %66 = vector.shape_cast %65 : vector<1x1x128x128xbf16> to vector<128x128xbf16>
    %cst_40 = arith.constant dense<0.000000e+00> : vector<80x128xf32>
    %67 = tpu.matmul %64, %66, %cst_40 {dimension_numbers = #tpu.dot_dimension_numbers<[1], [0], [0], [1], [0, 0, 1, 1], [], []>} : vector<80x128xbf16>, vector<128x128xbf16>, vector<80x128xf32> -> vector<80x128xf32>
    %c0_41 = arith.constant 0 : index
    %c0_42 = arith.constant 0 : index
    %68 = vector.load %arg14[%c0_41, %c0_42] : memref<80x128xf32, #tpu.memory_space<vmem>>, vector<80x128xf32>
    tpu.vector_store %arg14[%c0_41, %c0_42], %67 {strides = array<i32>} : memref<80x128xf32, #tpu.memory_space<vmem>>, vector<80x128xf32>,
    %c2_43 = arith.constant 2 : index
    %c1_44 = arith.constant 1 : index
    %c0_45 = arith.constant 0 : index
    %69 = vector.load %arg12[%c2_43, %c1_44, %c0_45] : memref<4x104x128xbf16, #tpu.memory_space<vmem>>, vector<1x80x128xbf16>
    %70 = vector.shape_cast %69 : vector<1x80x128xbf16> to vector<80x128xbf16>
    %c0_46 = arith.constant 0 : index
    %c1_47 = arith.constant 1 : index
    %c0_48 = arith.constant 0 : index
    %c0_49 = arith.constant 0 : index
    %71 = vector.load %arg6[%c0_46, %c1_47, %c0_48, %c0_49] : memref<3x3x128x128xbf16, #tpu.memory_space<vmem>>, vector<1x1x128x128xbf16>
    %72 = vector.shape_cast %71 : vector<1x1x128x128xbf16> to vector<128x128xbf16>
    %cst_50 = arith.constant dense<0.000000e+00> : vector<80x128xf32>
    %73 = tpu.matmul %70, %72, %cst_50 {dimension_numbers = #tpu.dot_dimension_numbers<[1], [0], [0], [1], [0, 0, 1, 1], [], []>} : vector<80x128xbf16>, vector<128x128xbf16>, vector<80x128xf32> -> vector<80x128xf32>
    %c0_51 = arith.constant 0 : index
    %c0_52 = arith.constant 0 : index
    %74 = vector.load %arg14[%c0_51, %c0_52] : memref<80x128xf32, #tpu.memory_space<vmem>>, vector<80x128xf32>
    %75 = arith.addf %74, %73 : vector<80x128xf32>
    %c0_53 = arith.constant 0 : index
    %c0_54 = arith.constant 0 : index
    %76 = vector.load %arg14[%c0_53, %c0_54] : memref<80x128xf32, #tpu.memory_space<vmem>>, vector<80x128xf32>
    tpu.vector_store %arg14[%c0_53, %c0_54], %75 {strides = array<i32>} : memref<80x128xf32, #tpu.memory_space<vmem>>, vector<80x128xf32>,
    %c3_55 = arith.constant 3 : index
    %c1_56 = arith.constant 1 : index
    %c0_57 = arith.constant 0 : index
    %77 = vector.load %arg12[%c3_55, %c1_56, %c0_57] : memref<4x104x128xbf16, #tpu.memory_space<vmem>>, vector<1x80x128xbf16>
    %78 = vector.shape_cast %77 : vector<1x80x128xbf16> to vector<80x128xbf16>
    %c0_58 = arith.constant 0 : index
    %c2_59 = arith.constant 2 : index
    %c0_60 = arith.constant 0 : index
    %c0_61 = arith.constant 0 : index
    %79 = vector.load %arg6[%c0_58, %c2_59, %c0_60, %c0_61] : memref<3x3x128x128xbf16, #tpu.memory_space<vmem>>, vector<1x1x128x128xbf16>
    %80 = vector.shape_cast %79 : vector<1x1x128x128xbf16> to vector<128x128xbf16>
    %cst_62 = arith.constant dense<0.000000e+00> : vector<80x128xf32>
    %81 = tpu.matmul %78, %80, %cst_62 {dimension_numbers = #tpu.dot_dimension_numbers<[1], [0], [0], [1], [0, 0, 1, 1], [], []>} : vector<80x128xbf16>, vector<128x128xbf16>, vector<80x128xf32> -> vector<80x128xf32>
    %c0_63 = arith.constant 0 : index
    %c0_64 = arith.constant 0 : index
    %82 = vector.load %arg14[%c0_63, %c0_64] : memref<80x128xf32, #tpu.memory_space<vmem>>, vector<80x128xf32>
    %83 = arith.addf %82, %81 : vector<80x128xf32>
    %c0_65 = arith.constant 0 : index
    %c0_66 = arith.constant 0 : index
    %84 = vector.load %arg14[%c0_65, %c0_66] : memref<80x128xf32, #tpu.memory_space<vmem>>, vector<80x128xf32>
    tpu.vector_store %arg14[%c0_65, %c0_66], %83 {strides = array<i32>} : memref<80x128xf32, #tpu.memory_space<vmem>>, vector<80x128xf32>,
    %c1_67 = arith.constant 1 : index
    %c10 = arith.constant 10 : index
    %c0_68 = arith.constant 0 : index
    %85 = vector.load %arg12[%c1_67, %c10, %c0_68] : memref<4x104x128xbf16, #tpu.memory_space<vmem>>, vector<1x80x128xbf16>
    %86 = vector.shape_cast %85 : vector<1x80x128xbf16> to vector<80x128xbf16>
    %c1_69 = arith.constant 1 : index
    %c0_70 = arith.constant 0 : index
    %c0_71 = arith.constant 0 : index
    %c0_72 = arith.constant 0 : index
    %87 = vector.load %arg6[%c1_69, %c0_70, %c0_71, %c0_72] : memref<3x3x128x128xbf16, #tpu.memory_space<vmem>>, vector<1x1x128x128xbf16>
    %88 = vector.shape_cast %87 : vector<1x1x128x128xbf16> to vector<128x128xbf16>
    %cst_73 = arith.constant dense<0.000000e+00> : vector<80x128xf32>
    %89 = tpu.matmul %86, %88, %cst_73 {dimension_numbers = #tpu.dot_dimension_numbers<[1], [0], [0], [1], [0, 0, 1, 1], [], []>} : vector<80x128xbf16>, vector<128x128xbf16>, vector<80x128xf32> -> vector<80x128xf32>
    %c0_74 = arith.constant 0 : index
    %c0_75 = arith.constant 0 : index
    %90 = vector.load %arg14[%c0_74, %c0_75] : memref<80x128xf32, #tpu.memory_space<vmem>>, vector<80x128xf32>
    %91 = arith.addf %90, %89 : vector<80x128xf32>
    %c0_76 = arith.constant 0 : index
    %c0_77 = arith.constant 0 : index
    %92 = vector.load %arg14[%c0_76, %c0_77] : memref<80x128xf32, #tpu.memory_space<vmem>>, vector<80x128xf32>
    tpu.vector_store %arg14[%c0_76, %c0_77], %91 {strides = array<i32>} : memref<80x128xf32, #tpu.memory_space<vmem>>, vector<80x128xf32>,
    %c0_78 = arith.constant 0 : index
    %c11 = arith.constant 11 : index
    %c0_79 = arith.constant 0 : index
    %93 = vector.load %arg12[%c0_78, %c11, %c0_79] : memref<4x104x128xbf16, #tpu.memory_space<vmem>>, vector<1x80x128xbf16>
    %94 = vector.shape_cast %93 : vector<1x80x128xbf16> to vector<80x128xbf16>
    %c1_80 = arith.constant 1 : index
    %c1_81 = arith.constant 1 : index
    %c0_82 = arith.constant 0 : index
    %c0_83 = arith.constant 0 : index
    %95 = vector.load %arg6[%c1_80, %c1_81, %c0_82, %c0_83] : memref<3x3x128x128xbf16, #tpu.memory_space<vmem>>, vector<1x1x128x128xbf16>
    %96 = vector.shape_cast %95 : vector<1x1x128x128xbf16> to vector<128x128xbf16>
    %cst_84 = arith.constant dense<0.000000e+00> : vector<80x128xf32>
    %97 = tpu.matmul %94, %96, %cst_84 {dimension_numbers = #tpu.dot_dimension_numbers<[1], [0], [0], [1], [0, 0, 1, 1], [], []>} : vector<80x128xbf16>, vector<128x128xbf16>, vector<80x128xf32> -> vector<80x128xf32>
    %c0_85 = arith.constant 0 : index
    %c0_86 = arith.constant 0 : index
    %98 = vector.load %arg14[%c0_85, %c0_86] : memref<80x128xf32, #tpu.memory_space<vmem>>, vector<80x128xf32>
    %99 = arith.addf %98, %97 : vector<80x128xf32>
    %c0_87 = arith.constant 0 : index
    %c0_88 = arith.constant 0 : index
    %100 = vector.load %arg14[%c0_87, %c0_88] : memref<80x128xf32, #tpu.memory_space<vmem>>, vector<80x128xf32>
    tpu.vector_store %arg14[%c0_87, %c0_88], %99 {strides = array<i32>} : memref<80x128xf32, #tpu.memory_space<vmem>>, vector<80x128xf32>,
    %c1_89 = arith.constant 1 : index
    %c11_90 = arith.constant 11 : index
    %c0_91 = arith.constant 0 : index
    %101 = vector.load %arg12[%c1_89, %c11_90, %c0_91] : memref<4x104x128xbf16, #tpu.memory_space<vmem>>, vector<1x80x128xbf16>
    %102 = vector.shape_cast %101 : vector<1x80x128xbf16> to vector<80x128xbf16>
    %c1_92 = arith.constant 1 : index
    %c2_93 = arith.constant 2 : index
    %c0_94 = arith.constant 0 : index
    %c0_95 = arith.constant 0 : index
    %103 = vector.load %arg6[%c1_92, %c2_93, %c0_94, %c0_95] : memref<3x3x128x128xbf16, #tpu.memory_space<vmem>>, vector<1x1x128x128xbf16>
    %104 = vector.shape_cast %103 : vector<1x1x128x128xbf16> to vector<128x128xbf16>
    %cst_96 = arith.constant dense<0.000000e+00> : vector<80x128xf32>
    %105 = tpu.matmul %102, %104, %cst_96 {dimension_numbers = #tpu.dot_dimension_numbers<[1], [0], [0], [1], [0, 0, 1, 1], [], []>} : vector<80x128xbf16>, vector<128x128xbf16>, vector<80x128xf32> -> vector<80x128xf32>
    %c0_97 = arith.constant 0 : index
    %c0_98 = arith.constant 0 : index
    %106 = vector.load %arg14[%c0_97, %c0_98] : memref<80x128xf32, #tpu.memory_space<vmem>>, vector<80x128xf32>
    %107 = arith.addf %106, %105 : vector<80x128xf32>
    %c0_99 = arith.constant 0 : index
    %c0_100 = arith.constant 0 : index
    %108 = vector.load %arg14[%c0_99, %c0_100] : memref<80x128xf32, #tpu.memory_space<vmem>>, vector<80x128xf32>
    tpu.vector_store %arg14[%c0_99, %c0_100], %107 {strides = array<i32>} : memref<80x128xf32, #tpu.memory_space<vmem>>, vector<80x128xf32>,
    %c3_101 = arith.constant 3 : index
    %c10_102 = arith.constant 10 : index
    %c0_103 = arith.constant 0 : index
    %109 = vector.load %arg12[%c3_101, %c10_102, %c0_103] : memref<4x104x128xbf16, #tpu.memory_space<vmem>>, vector<1x80x128xbf16>
    %110 = vector.shape_cast %109 : vector<1x80x128xbf16> to vector<80x128xbf16>
    %c2_104 = arith.constant 2 : index
    %c0_105 = arith.constant 0 : index
    %c0_106 = arith.constant 0 : index
    %c0_107 = arith.constant 0 : index
    %111 = vector.load %arg6[%c2_104, %c0_105, %c0_106, %c0_107] : memref<3x3x128x128xbf16, #tpu.memory_space<vmem>>, vector<1x1x128x128xbf16>
    %112 = vector.shape_cast %111 : vector<1x1x128x128xbf16> to vector<128x128xbf16>
    %cst_108 = arith.constant dense<0.000000e+00> : vector<80x128xf32>
    %113 = tpu.matmul %110, %112, %cst_108 {dimension_numbers = #tpu.dot_dimension_numbers<[1], [0], [0], [1], [0, 0, 1, 1], [], []>} : vector<80x128xbf16>, vector<128x128xbf16>, vector<80x128xf32> -> vector<80x128xf32>
    %c0_109 = arith.constant 0 : index
    %c0_110 = arith.constant 0 : index
    %114 = vector.load %arg14[%c0_109, %c0_110] : memref<80x128xf32, #tpu.memory_space<vmem>>, vector<80x128xf32>
    %115 = arith.addf %114, %113 : vector<80x128xf32>
    %c0_111 = arith.constant 0 : index
    %c0_112 = arith.constant 0 : index
    %116 = vector.load %arg14[%c0_111, %c0_112] : memref<80x128xf32, #tpu.memory_space<vmem>>, vector<80x128xf32>
    tpu.vector_store %arg14[%c0_111, %c0_112], %115 {strides = array<i32>} : memref<80x128xf32, #tpu.memory_space<vmem>>, vector<80x128xf32>,
    %c2_113 = arith.constant 2 : index
    %c11_114 = arith.constant 11 : index
    %c0_115 = arith.constant 0 : index
    %117 = vector.load %arg12[%c2_113, %c11_114, %c0_115] : memref<4x104x128xbf16, #tpu.memory_space<vmem>>, vector<1x80x128xbf16>
    %118 = vector.shape_cast %117 : vector<1x80x128xbf16> to vector<80x128xbf16>
    %c2_116 = arith.constant 2 : index
    %c1_117 = arith.constant 1 : index
    %c0_118 = arith.constant 0 : index
    %c0_119 = arith.constant 0 : index
    %119 = vector.load %arg6[%c2_116, %c1_117, %c0_118, %c0_119] : memref<3x3x128x128xbf16, #tpu.memory_space<vmem>>, vector<1x1x128x128xbf16>
    %120 = vector.shape_cast %119 : vector<1x1x128x128xbf16> to vector<128x128xbf16>
    %cst_120 = arith.constant dense<0.000000e+00> : vector<80x128xf32>
    %121 = tpu.matmul %118, %120, %cst_120 {dimension_numbers = #tpu.dot_dimension_numbers<[1], [0], [0], [1], [0, 0, 1, 1], [], []>} : vector<80x128xbf16>, vector<128x128xbf16>, vector<80x128xf32> -> vector<80x128xf32>
    %c0_121 = arith.constant 0 : index
    %c0_122 = arith.constant 0 : index
    %122 = vector.load %arg14[%c0_121, %c0_122] : memref<80x128xf32, #tpu.memory_space<vmem>>, vector<80x128xf32>
    %123 = arith.addf %122, %121 : vector<80x128xf32>
    %c0_123 = arith.constant 0 : index
    %c0_124 = arith.constant 0 : index
    %124 = vector.load %arg14[%c0_123, %c0_124] : memref<80x128xf32, #tpu.memory_space<vmem>>, vector<80x128xf32>
    tpu.vector_store %arg14[%c0_123, %c0_124], %123 {strides = array<i32>} : memref<80x128xf32, #tpu.memory_space<vmem>>, vector<80x128xf32>,
    %c3_125 = arith.constant 3 : index
    %c11_126 = arith.constant 11 : index
    %c0_127 = arith.constant 0 : index
    %125 = vector.load %arg12[%c3_125, %c11_126, %c0_127] : memref<4x104x128xbf16, #tpu.memory_space<vmem>>, vector<1x80x128xbf16>
    %126 = vector.shape_cast %125 : vector<1x80x128xbf16> to vector<80x128xbf16>
    %c2_128 = arith.constant 2 : index
    %c2_129 = arith.constant 2 : index
    %c0_130 = arith.constant 0 : index
    %c0_131 = arith.constant 0 : index
    %127 = vector.load %arg6[%c2_128, %c2_129, %c0_130, %c0_131] : memref<3x3x128x128xbf16, #tpu.memory_space<vmem>>, vector<1x1x128x128xbf16>
    %128 = vector.shape_cast %127 : vector<1x1x128x128xbf16> to vector<128x128xbf16>
    %cst_132 = arith.constant dense<0.000000e+00> : vector<80x128xf32>
    %129 = tpu.matmul %126, %128, %cst_132 {dimension_numbers = #tpu.dot_dimension_numbers<[1], [0], [0], [1], [0, 0, 1, 1], [], []>} : vector<80x128xbf16>, vector<128x128xbf16>, vector<80x128xf32> -> vector<80x128xf32>
    %c0_133 = arith.constant 0 : index
    %c0_134 = arith.constant 0 : index
    %130 = vector.load %arg14[%c0_133, %c0_134] : memref<80x128xf32, #tpu.memory_space<vmem>>, vector<80x128xf32>
    %131 = arith.addf %130, %129 : vector<80x128xf32>
    %c0_135 = arith.constant 0 : index
    %c0_136 = arith.constant 0 : index
    %132 = vector.load %arg14[%c0_135, %c0_136] : memref<80x128xf32, #tpu.memory_space<vmem>>, vector<80x128xf32>
    tpu.vector_store %arg14[%c0_135, %c0_136], %131 {strides = array<i32>} : memref<80x128xf32, #tpu.memory_space<vmem>>, vector<80x128xf32>,
    %c0_137 = arith.constant 0 : index
    %c0_138 = arith.constant 0 : index
    %133 = vector.load %arg14[%c0_137, %c0_138] : memref<80x128xf32, #tpu.memory_space<vmem>>, vector<80x128xf32>
    %c0_139 = arith.constant 0 : index
    %c0_140 = arith.constant 0 : index
    %134 = vector.load %arg7[%c0_139, %c0_140] : memref<1x128xf32, #tpu.memory_space<vmem>>, vector<1x128xf32>
    %135 = vector.broadcast %134 : vector<1x128xf32> to vector<80x128xf32>
    %136 = arith.mulf %133, %135 : vector<80x128xf32>
    %c0_141 = arith.constant 0 : index
    %c0_142 = arith.constant 0 : index
    %137 = vector.load %arg8[%c0_141, %c0_142] : memref<1x128xf32, #tpu.memory_space<vmem>>, vector<1x128xf32>
    %138 = vector.broadcast %137 : vector<1x128xf32> to vector<80x128xf32>
    %139 = arith.addf %136, %138 : vector<80x128xf32>
    %cst_143 = arith.constant 0.000000e+00 : f32
    %140 = vector.broadcast %cst_143 : f32 to vector<80x128xf32>
    %141 = arith.maximumf %139, %140 : vector<80x128xf32>
    %c0_144 = arith.constant 0 : index
    %c0_145 = arith.constant 0 : index
    %142 = vector.load %arg3[%c0_144, %c0_145] : memref<80x1xf32, #tpu.memory_space<vmem>>, vector<80x1xf32>
    %143 = vector.broadcast %142 : vector<80x1xf32> to vector<80x128xf32>
    %144 = arith.mulf %141, %143 : vector<80x128xf32>
    %cst_146 = arith.constant 0.000000e+00 : bf16
    %145 = vector.broadcast %cst_146 : bf16 to vector<11x128xbf16>
    %c0_147 = arith.constant 0 : index
    %c0_148 = arith.constant 0 : index
    %146 = vector.load %arg13[%c0_147, %c0_148] : memref<104x128xbf16, #tpu.memory_space<vmem>>, vector<11x128xbf16>
    tpu.vector_store %arg13[%c0_147, %c0_148], %145 {strides = array<i32>} : memref<104x128xbf16, #tpu.memory_space<vmem>>, vector<11x128xbf16>,
    %cst_149 = arith.constant 0.000000e+00 : bf16
    %147 = vector.broadcast %cst_149 : bf16 to vector<13x128xbf16>
    %c91 = arith.constant 91 : index
    %c0_150 = arith.constant 0 : index
    %148 = vector.load %arg13[%c91, %c0_150] : memref<104x128xbf16, #tpu.memory_space<vmem>>, vector<13x128xbf16>
    tpu.vector_store %arg13[%c91, %c0_150], %147 {strides = array<i32>} : memref<104x128xbf16, #tpu.memory_space<vmem>>, vector<13x128xbf16>,
    %149 = arith.truncf %144 : vector<80x128xf32> to vector<80x128xbf16>
    %c11_151 = arith.constant 11 : index
    %c0_152 = arith.constant 0 : index
    %150 = vector.load %arg13[%c11_151, %c0_152] : memref<104x128xbf16, #tpu.memory_space<vmem>>, vector<80x128xbf16>
    tpu.vector_store %arg13[%c11_151, %c0_152], %149 {strides = array<i32>} : memref<104x128xbf16, #tpu.memory_space<vmem>>, vector<80x128xbf16>,
    %c0_153 = arith.constant 0 : index
    %c0_154 = arith.constant 0 : index
    %151 = vector.load %arg13[%c0_153, %c0_154] : memref<104x128xbf16, #tpu.memory_space<vmem>>, vector<80x128xbf16>
    %c0_155 = arith.constant 0 : index
    %c0_156 = arith.constant 0 : index
    %c0_157 = arith.constant 0 : index
    %c0_158 = arith.constant 0 : index
    %152 = vector.load %arg9[%c0_155, %c0_156, %c0_157, %c0_158] : memref<3x3x128x128xbf16, #tpu.memory_space<vmem>>, vector<1x1x128x128xbf16>
    %153 = vector.shape_cast %152 : vector<1x1x128x128xbf16> to vector<128x128xbf16>
    %cst_159 = arith.constant dense<0.000000e+00> : vector<80x128xf32>
    %154 = tpu.matmul %151, %153, %cst_159 {dimension_numbers = #tpu.dot_dimension_numbers<[1], [0], [0], [1], [0, 0, 1, 1], [], []>} : vector<80x128xbf16>, vector<128x128xbf16>, vector<80x128xf32> -> vector<80x128xf32>
    %c0_160 = arith.constant 0 : index
    %c0_161 = arith.constant 0 : index
    %155 = vector.load %arg14[%c0_160, %c0_161] : memref<80x128xf32, #tpu.memory_space<vmem>>, vector<80x128xf32>
    tpu.vector_store %arg14[%c0_160, %c0_161], %154 {strides = array<i32>} : memref<80x128xf32, #tpu.memory_space<vmem>>, vector<80x128xf32>,
    %c1_162 = arith.constant 1 : index
    %c0_163 = arith.constant 0 : index
    %156 = vector.load %arg13[%c1_162, %c0_163] : memref<104x128xbf16, #tpu.memory_space<vmem>>, vector<80x128xbf16>
    %c0_164 = arith.constant 0 : index
    %c1_165 = arith.constant 1 : index
    %c0_166 = arith.constant 0 : index
    %c0_167 = arith.constant 0 : index
    %157 = vector.load %arg9[%c0_164, %c1_165, %c0_166, %c0_167] : memref<3x3x128x128xbf16, #tpu.memory_space<vmem>>, vector<1x1x128x128xbf16>
    %158 = vector.shape_cast %157 : vector<1x1x128x128xbf16> to vector<128x128xbf16>
    %cst_168 = arith.constant dense<0.000000e+00> : vector<80x128xf32>
    %159 = tpu.matmul %156, %158, %cst_168 {dimension_numbers = #tpu.dot_dimension_numbers<[1], [0], [0], [1], [0, 0, 1, 1], [], []>} : vector<80x128xbf16>, vector<128x128xbf16>, vector<80x128xf32> -> vector<80x128xf32>
    %c0_169 = arith.constant 0 : index
    %c0_170 = arith.constant 0 : index
    %160 = vector.load %arg14[%c0_169, %c0_170] : memref<80x128xf32, #tpu.memory_space<vmem>>, vector<80x128xf32>
    %161 = arith.addf %160, %159 : vector<80x128xf32>
    %c0_171 = arith.constant 0 : index
    %c0_172 = arith.constant 0 : index
    %162 = vector.load %arg14[%c0_171, %c0_172] : memref<80x128xf32, #tpu.memory_space<vmem>>, vector<80x128xf32>
    tpu.vector_store %arg14[%c0_171, %c0_172], %161 {strides = array<i32>} : memref<80x128xf32, #tpu.memory_space<vmem>>, vector<80x128xf32>,
    %c2_173 = arith.constant 2 : index
    %c0_174 = arith.constant 0 : index
    %163 = vector.load %arg13[%c2_173, %c0_174] : memref<104x128xbf16, #tpu.memory_space<vmem>>, vector<80x128xbf16>
    %c0_175 = arith.constant 0 : index
    %c2_176 = arith.constant 2 : index
    %c0_177 = arith.constant 0 : index
    %c0_178 = arith.constant 0 : index
    %164 = vector.load %arg9[%c0_175, %c2_176, %c0_177, %c0_178] : memref<3x3x128x128xbf16, #tpu.memory_space<vmem>>, vector<1x1x128x128xbf16>
    %165 = vector.shape_cast %164 : vector<1x1x128x128xbf16> to vector<128x128xbf16>
    %cst_179 = arith.constant dense<0.000000e+00> : vector<80x128xf32>
    %166 = tpu.matmul %163, %165, %cst_179 {dimension_numbers = #tpu.dot_dimension_numbers<[1], [0], [0], [1], [0, 0, 1, 1], [], []>} : vector<80x128xbf16>, vector<128x128xbf16>, vector<80x128xf32> -> vector<80x128xf32>
    %c0_180 = arith.constant 0 : index
    %c0_181 = arith.constant 0 : index
    %167 = vector.load %arg14[%c0_180, %c0_181] : memref<80x128xf32, #tpu.memory_space<vmem>>, vector<80x128xf32>
    %168 = arith.addf %167, %166 : vector<80x128xf32>
    %c0_182 = arith.constant 0 : index
    %c0_183 = arith.constant 0 : index
    %169 = vector.load %arg14[%c0_182, %c0_183] : memref<80x128xf32, #tpu.memory_space<vmem>>, vector<80x128xf32>
    tpu.vector_store %arg14[%c0_182, %c0_183], %168 {strides = array<i32>} : memref<80x128xf32, #tpu.memory_space<vmem>>, vector<80x128xf32>,
    %c10_184 = arith.constant 10 : index
    %c0_185 = arith.constant 0 : index
    %170 = vector.load %arg13[%c10_184, %c0_185] : memref<104x128xbf16, #tpu.memory_space<vmem>>, vector<80x128xbf16>
    %c1_186 = arith.constant 1 : index
    %c0_187 = arith.constant 0 : index
    %c0_188 = arith.constant 0 : index
    %c0_189 = arith.constant 0 : index
    %171 = vector.load %arg9[%c1_186, %c0_187, %c0_188, %c0_189] : memref<3x3x128x128xbf16, #tpu.memory_space<vmem>>, vector<1x1x128x128xbf16>
    %172 = vector.shape_cast %171 : vector<1x1x128x128xbf16> to vector<128x128xbf16>
    %cst_190 = arith.constant dense<0.000000e+00> : vector<80x128xf32>
    %173 = tpu.matmul %170, %172, %cst_190 {dimension_numbers = #tpu.dot_dimension_numbers<[1], [0], [0], [1], [0, 0, 1, 1], [], []>} : vector<80x128xbf16>, vector<128x128xbf16>, vector<80x128xf32> -> vector<80x128xf32>
    %c0_191 = arith.constant 0 : index
    %c0_192 = arith.constant 0 : index
    %174 = vector.load %arg14[%c0_191, %c0_192] : memref<80x128xf32, #tpu.memory_space<vmem>>, vector<80x128xf32>
    %175 = arith.addf %174, %173 : vector<80x128xf32>
    %c0_193 = arith.constant 0 : index
    %c0_194 = arith.constant 0 : index
    %176 = vector.load %arg14[%c0_193, %c0_194] : memref<80x128xf32, #tpu.memory_space<vmem>>, vector<80x128xf32>
    tpu.vector_store %arg14[%c0_193, %c0_194], %175 {strides = array<i32>} : memref<80x128xf32, #tpu.memory_space<vmem>>, vector<80x128xf32>,
    %c11_195 = arith.constant 11 : index
    %c0_196 = arith.constant 0 : index
    %177 = vector.load %arg13[%c11_195, %c0_196] : memref<104x128xbf16, #tpu.memory_space<vmem>>, vector<80x128xbf16>
    %c1_197 = arith.constant 1 : index
    %c1_198 = arith.constant 1 : index
    %c0_199 = arith.constant 0 : index
    %c0_200 = arith.constant 0 : index
    %178 = vector.load %arg9[%c1_197, %c1_198, %c0_199, %c0_200] : memref<3x3x128x128xbf16, #tpu.memory_space<vmem>>, vector<1x1x128x128xbf16>
    %179 = vector.shape_cast %178 : vector<1x1x128x128xbf16> to vector<128x128xbf16>
    %cst_201 = arith.constant dense<0.000000e+00> : vector<80x128xf32>
    %180 = tpu.matmul %177, %179, %cst_201 {dimension_numbers = #tpu.dot_dimension_numbers<[1], [0], [0], [1], [0, 0, 1, 1], [], []>} : vector<80x128xbf16>, vector<128x128xbf16>, vector<80x128xf32> -> vector<80x128xf32>
    %c0_202 = arith.constant 0 : index
    %c0_203 = arith.constant 0 : index
    %181 = vector.load %arg14[%c0_202, %c0_203] : memref<80x128xf32, #tpu.memory_space<vmem>>, vector<80x128xf32>
    %182 = arith.addf %181, %180 : vector<80x128xf32>
    %c0_204 = arith.constant 0 : index
    %c0_205 = arith.constant 0 : index
    %183 = vector.load %arg14[%c0_204, %c0_205] : memref<80x128xf32, #tpu.memory_space<vmem>>, vector<80x128xf32>
    tpu.vector_store %arg14[%c0_204, %c0_205], %182 {strides = array<i32>} : memref<80x128xf32, #tpu.memory_space<vmem>>, vector<80x128xf32>,
    %c12 = arith.constant 12 : index
    %c0_206 = arith.constant 0 : index
    %184 = vector.load %arg13[%c12, %c0_206] : memref<104x128xbf16, #tpu.memory_space<vmem>>, vector<80x128xbf16>
    %c1_207 = arith.constant 1 : index
    %c2_208 = arith.constant 2 : index
    %c0_209 = arith.constant 0 : index
    %c0_210 = arith.constant 0 : index
    %185 = vector.load %arg9[%c1_207, %c2_208, %c0_209, %c0_210] : memref<3x3x128x128xbf16, #tpu.memory_space<vmem>>, vector<1x1x128x128xbf16>
    %186 = vector.shape_cast %185 : vector<1x1x128x128xbf16> to vector<128x128xbf16>
    %cst_211 = arith.constant dense<0.000000e+00> : vector<80x128xf32>
    %187 = tpu.matmul %184, %186, %cst_211 {dimension_numbers = #tpu.dot_dimension_numbers<[1], [0], [0], [1], [0, 0, 1, 1], [], []>} : vector<80x128xbf16>, vector<128x128xbf16>, vector<80x128xf32> -> vector<80x128xf32>
    %c0_212 = arith.constant 0 : index
    %c0_213 = arith.constant 0 : index
    %188 = vector.load %arg14[%c0_212, %c0_213] : memref<80x128xf32, #tpu.memory_space<vmem>>, vector<80x128xf32>
    %189 = arith.addf %188, %187 : vector<80x128xf32>
    %c0_214 = arith.constant 0 : index
    %c0_215 = arith.constant 0 : index
    %190 = vector.load %arg14[%c0_214, %c0_215] : memref<80x128xf32, #tpu.memory_space<vmem>>, vector<80x128xf32>
    tpu.vector_store %arg14[%c0_214, %c0_215], %189 {strides = array<i32>} : memref<80x128xf32, #tpu.memory_space<vmem>>, vector<80x128xf32>,
    %c20 = arith.constant 20 : index
    %c0_216 = arith.constant 0 : index
    %191 = vector.load %arg13[%c20, %c0_216] : memref<104x128xbf16, #tpu.memory_space<vmem>>, vector<80x128xbf16>
    %c2_217 = arith.constant 2 : index
    %c0_218 = arith.constant 0 : index
    %c0_219 = arith.constant 0 : index
    %c0_220 = arith.constant 0 : index
    %192 = vector.load %arg9[%c2_217, %c0_218, %c0_219, %c0_220] : memref<3x3x128x128xbf16, #tpu.memory_space<vmem>>, vector<1x1x128x128xbf16>
    %193 = vector.shape_cast %192 : vector<1x1x128x128xbf16> to vector<128x128xbf16>
    %cst_221 = arith.constant dense<0.000000e+00> : vector<80x128xf32>
    %194 = tpu.matmul %191, %193, %cst_221 {dimension_numbers = #tpu.dot_dimension_numbers<[1], [0], [0], [1], [0, 0, 1, 1], [], []>} : vector<80x128xbf16>, vector<128x128xbf16>, vector<80x128xf32> -> vector<80x128xf32>
    %c0_222 = arith.constant 0 : index
    %c0_223 = arith.constant 0 : index
    %195 = vector.load %arg14[%c0_222, %c0_223] : memref<80x128xf32, #tpu.memory_space<vmem>>, vector<80x128xf32>
    %196 = arith.addf %195, %194 : vector<80x128xf32>
    %c0_224 = arith.constant 0 : index
    %c0_225 = arith.constant 0 : index
    %197 = vector.load %arg14[%c0_224, %c0_225] : memref<80x128xf32, #tpu.memory_space<vmem>>, vector<80x128xf32>
    tpu.vector_store %arg14[%c0_224, %c0_225], %196 {strides = array<i32>} : memref<80x128xf32, #tpu.memory_space<vmem>>, vector<80x128xf32>,
    %c21 = arith.constant 21 : index
    %c0_226 = arith.constant 0 : index
    %198 = vector.load %arg13[%c21, %c0_226] : memref<104x128xbf16, #tpu.memory_space<vmem>>, vector<80x128xbf16>
    %c2_227 = arith.constant 2 : index
    %c1_228 = arith.constant 1 : index
    %c0_229 = arith.constant 0 : index
    %c0_230 = arith.constant 0 : index
    %199 = vector.load %arg9[%c2_227, %c1_228, %c0_229, %c0_230] : memref<3x3x128x128xbf16, #tpu.memory_space<vmem>>, vector<1x1x128x128xbf16>
    %200 = vector.shape_cast %199 : vector<1x1x128x128xbf16> to vector<128x128xbf16>
    %cst_231 = arith.constant dense<0.000000e+00> : vector<80x128xf32>
    %201 = tpu.matmul %198, %200, %cst_231 {dimension_numbers = #tpu.dot_dimension_numbers<[1], [0], [0], [1], [0, 0, 1, 1], [], []>} : vector<80x128xbf16>, vector<128x128xbf16>, vector<80x128xf32> -> vector<80x128xf32>
    %c0_232 = arith.constant 0 : index
    %c0_233 = arith.constant 0 : index
    %202 = vector.load %arg14[%c0_232, %c0_233] : memref<80x128xf32, #tpu.memory_space<vmem>>, vector<80x128xf32>
    %203 = arith.addf %202, %201 : vector<80x128xf32>
    %c0_234 = arith.constant 0 : index
    %c0_235 = arith.constant 0 : index
    %204 = vector.load %arg14[%c0_234, %c0_235] : memref<80x128xf32, #tpu.memory_space<vmem>>, vector<80x128xf32>
    tpu.vector_store %arg14[%c0_234, %c0_235], %203 {strides = array<i32>} : memref<80x128xf32, #tpu.memory_space<vmem>>, vector<80x128xf32>,
    %c22 = arith.constant 22 : index
    %c0_236 = arith.constant 0 : index
    %205 = vector.load %arg13[%c22, %c0_236] : memref<104x128xbf16, #tpu.memory_space<vmem>>, vector<80x128xbf16>
    %c2_237 = arith.constant 2 : index
    %c2_238 = arith.constant 2 : index
    %c0_239 = arith.constant 0 : index
    %c0_240 = arith.constant 0 : index
    %206 = vector.load %arg9[%c2_237, %c2_238, %c0_239, %c0_240] : memref<3x3x128x128xbf16, #tpu.memory_space<vmem>>, vector<1x1x128x128xbf16>
    %207 = vector.shape_cast %206 : vector<1x1x128x128xbf16> to vector<128x128xbf16>
    %cst_241 = arith.constant dense<0.000000e+00> : vector<80x128xf32>
    %208 = tpu.matmul %205, %207, %cst_241 {dimension_numbers = #tpu.dot_dimension_numbers<[1], [0], [0], [1], [0, 0, 1, 1], [], []>} : vector<80x128xbf16>, vector<128x128xbf16>, vector<80x128xf32> -> vector<80x128xf32>
    %c0_242 = arith.constant 0 : index
    %c0_243 = arith.constant 0 : index
    %209 = vector.load %arg14[%c0_242, %c0_243] : memref<80x128xf32, #tpu.memory_space<vmem>>, vector<80x128xf32>
    %210 = arith.addf %209, %208 : vector<80x128xf32>
    %c0_244 = arith.constant 0 : index
    %c0_245 = arith.constant 0 : index
    %211 = vector.load %arg14[%c0_244, %c0_245] : memref<80x128xf32, #tpu.memory_space<vmem>>, vector<80x128xf32>
    tpu.vector_store %arg14[%c0_244, %c0_245], %210 {strides = array<i32>} : memref<80x128xf32, #tpu.memory_space<vmem>>, vector<80x128xf32>,
    %c0_246 = arith.constant 0 : index
    %c11_247 = arith.constant 11 : index
    %c0_248 = arith.constant 0 : index
    %212 = vector.load %arg12[%c0_246, %c11_247, %c0_248] : memref<4x104x128xbf16, #tpu.memory_space<vmem>>, vector<1x80x128xbf16>
    %213 = vector.shape_cast %212 : vector<1x80x128xbf16> to vector<80x128xbf16>
    %c0_249 = arith.constant 0 : index
    %c0_250 = arith.constant 0 : index
    %214 = vector.load %arg14[%c0_249, %c0_250] : memref<80x128xf32, #tpu.memory_space<vmem>>, vector<80x128xf32>
    %c0_251 = arith.constant 0 : index
    %c0_252 = arith.constant 0 : index
    %215 = vector.load %arg10[%c0_251, %c0_252] : memref<128x128xbf16, #tpu.memory_space<vmem>>, vector<128x128xbf16>
    %cst_253 = arith.constant dense<0.000000e+00> : vector<80x128xf32>
    %216 = tpu.matmul %213, %215, %cst_253 {dimension_numbers = #tpu.dot_dimension_numbers<[1], [0], [0], [1], [0, 0, 1, 1], [], []>} : vector<80x128xbf16>, vector<128x128xbf16>, vector<80x128xf32> -> vector<80x128xf32>
    %217 = arith.addf %214, %216 : vector<80x128xf32>
    %c0_254 = arith.constant 0 : index
    %c0_255 = arith.constant 0 : index
    %218 = vector.load %arg14[%c0_254, %c0_255] : memref<80x128xf32, #tpu.memory_space<vmem>>, vector<80x128xf32>
    tpu.vector_store %arg14[%c0_254, %c0_255], %217 {strides = array<i32>} : memref<80x128xf32, #tpu.memory_space<vmem>>, vector<80x128xf32>,
    %c0_256 = arith.constant 0 : index
    %c0_257 = arith.constant 0 : index
    %219 = vector.load %arg14[%c0_256, %c0_257] : memref<80x128xf32, #tpu.memory_space<vmem>>, vector<8x128xf32>
    %c0_258 = arith.constant 0 : index
    %c0_259 = arith.constant 0 : index
    %c0_260 = arith.constant 0 : index
    %c0_261 = arith.constant 0 : index
    %220 = vector.load %arg11[%c0_258, %c0_259, %c0_260, %c0_261] : memref<1x8x8x128xf32, #tpu.memory_space<vmem>>, vector<1x1x8x128xf32>
    %221 = vector.shape_cast %220 : vector<1x1x8x128xf32> to vector<8x128xf32>
    %222 = vector.shape_cast %219 : vector<8x128xf32> to vector<1x1x8x128xf32>
    tpu.vector_store %arg11[%c0_258, %c0_259, %c0_260, %c0_261], %222 {strides = array<i32>} : memref<1x8x8x128xf32, #tpu.memory_space<vmem>>, vector<1x1x8x128xf32>,
    %c10_262 = arith.constant 10 : index
    %c0_263 = arith.constant 0 : index
    %223 = vector.load %arg14[%c10_262, %c0_263] : memref<80x128xf32, #tpu.memory_space<vmem>>, vector<8x128xf32>
    %c0_264 = arith.constant 0 : index
    %c1_265 = arith.constant 1 : index
    %c0_266 = arith.constant 0 : index
    %c0_267 = arith.constant 0 : index
    %224 = vector.load %arg11[%c0_264, %c1_265, %c0_266, %c0_267] : memref<1x8x8x128xf32, #tpu.memory_space<vmem>>, vector<1x1x8x128xf32>
    %225 = vector.shape_cast %224 : vector<1x1x8x128xf32> to vector<8x128xf32>
    %226 = vector.shape_cast %223 : vector<8x128xf32> to vector<1x1x8x128xf32>
    tpu.vector_store %arg11[%c0_264, %c1_265, %c0_266, %c0_267], %226 {strides = array<i32>} : memref<1x8x8x128xf32, #tpu.memory_space<vmem>>, vector<1x1x8x128xf32>,
    %c20_268 = arith.constant 20 : index
    %c0_269 = arith.constant 0 : index
    %227 = vector.load %arg14[%c20_268, %c0_269] : memref<80x128xf32, #tpu.memory_space<vmem>>, vector<8x128xf32>
    %c0_270 = arith.constant 0 : index
    %c2_271 = arith.constant 2 : index
    %c0_272 = arith.constant 0 : index
    %c0_273 = arith.constant 0 : index
    %228 = vector.load %arg11[%c0_270, %c2_271, %c0_272, %c0_273] : memref<1x8x8x128xf32, #tpu.memory_space<vmem>>, vector<1x1x8x128xf32>
    %229 = vector.shape_cast %228 : vector<1x1x8x128xf32> to vector<8x128xf32>
    %230 = vector.shape_cast %227 : vector<8x128xf32> to vector<1x1x8x128xf32>
    tpu.vector_store %arg11[%c0_270, %c2_271, %c0_272, %c0_273], %230 {strides = array<i32>} : memref<1x8x8x128xf32, #tpu.memory_space<vmem>>, vector<1x1x8x128xf32>,
    %c30 = arith.constant 30 : index
    %c0_274 = arith.constant 0 : index
    %231 = vector.load %arg14[%c30, %c0_274] : memref<80x128xf32, #tpu.memory_space<vmem>>, vector<8x128xf32>
    %c0_275 = arith.constant 0 : index
    %c3_276 = arith.constant 3 : index
    %c0_277 = arith.constant 0 : index
    %c0_278 = arith.constant 0 : index
    %232 = vector.load %arg11[%c0_275, %c3_276, %c0_277, %c0_278] : memref<1x8x8x128xf32, #tpu.memory_space<vmem>>, vector<1x1x8x128xf32>
    %233 = vector.shape_cast %232 : vector<1x1x8x128xf32> to vector<8x128xf32>
    %234 = vector.shape_cast %231 : vector<8x128xf32> to vector<1x1x8x128xf32>
    tpu.vector_store %arg11[%c0_275, %c3_276, %c0_277, %c0_278], %234 {strides = array<i32>} : memref<1x8x8x128xf32, #tpu.memory_space<vmem>>, vector<1x1x8x128xf32>,
    %c40 = arith.constant 40 : index
    %c0_279 = arith.constant 0 : index
    %235 = vector.load %arg14[%c40, %c0_279] : memref<80x128xf32, #tpu.memory_space<vmem>>, vector<8x128xf32>
    %c0_280 = arith.constant 0 : index
    %c4 = arith.constant 4 : index
    %c0_281 = arith.constant 0 : index
    %c0_282 = arith.constant 0 : index
    %236 = vector.load %arg11[%c0_280, %c4, %c0_281, %c0_282] : memref<1x8x8x128xf32, #tpu.memory_space<vmem>>, vector<1x1x8x128xf32>
    %237 = vector.shape_cast %236 : vector<1x1x8x128xf32> to vector<8x128xf32>
    %238 = vector.shape_cast %235 : vector<8x128xf32> to vector<1x1x8x128xf32>
    tpu.vector_store %arg11[%c0_280, %c4, %c0_281, %c0_282], %238 {strides = array<i32>} : memref<1x8x8x128xf32, #tpu.memory_space<vmem>>, vector<1x1x8x128xf32>,
    %c50 = arith.constant 50 : index
    %c0_283 = arith.constant 0 : index
    %239 = vector.load %arg14[%c50, %c0_283] : memref<80x128xf32, #tpu.memory_space<vmem>>, vector<8x128xf32>
    %c0_284 = arith.constant 0 : index
    %c5 = arith.constant 5 : index
    %c0_285 = arith.constant 0 : index
    %c0_286 = arith.constant 0 : index
    %240 = vector.load %arg11[%c0_284, %c5, %c0_285, %c0_286] : memref<1x8x8x128xf32, #tpu.memory_space<vmem>>, vector<1x1x8x128xf32>
    %241 = vector.shape_cast %240 : vector<1x1x8x128xf32> to vector<8x128xf32>
    %242 = vector.shape_cast %239 : vector<8x128xf32> to vector<1x1x8x128xf32>
    tpu.vector_store %arg11[%c0_284, %c5, %c0_285, %c0_286], %242 {strides = array<i32>} : memref<1x8x8x128xf32, #tpu.memory_space<vmem>>, vector<1x1x8x128xf32>,
    %c60 = arith.constant 60 : index
    %c0_287 = arith.constant 0 : index
    %243 = vector.load %arg14[%c60, %c0_287] : memref<80x128xf32, #tpu.memory_space<vmem>>, vector<8x128xf32>
    %c0_288 = arith.constant 0 : index
    %c6 = arith.constant 6 : index
    %c0_289 = arith.constant 0 : index
    %c0_290 = arith.constant 0 : index
    %244 = vector.load %arg11[%c0_288, %c6, %c0_289, %c0_290] : memref<1x8x8x128xf32, #tpu.memory_space<vmem>>, vector<1x1x8x128xf32>
    %245 = vector.shape_cast %244 : vector<1x1x8x128xf32> to vector<8x128xf32>
    %246 = vector.shape_cast %243 : vector<8x128xf32> to vector<1x1x8x128xf32>
    tpu.vector_store %arg11[%c0_288, %c6, %c0_289, %c0_290], %246 {strides = array<i32>} : memref<1x8x8x128xf32, #tpu.memory_space<vmem>>, vector<1x1x8x128xf32>,
    %c70 = arith.constant 70 : index
    %c0_291 = arith.constant 0 : index
    %247 = vector.load %arg14[%c70, %c0_291] : memref<80x128xf32, #tpu.memory_space<vmem>>, vector<8x128xf32>
    %c0_292 = arith.constant 0 : index
    %c7 = arith.constant 7 : index
    %c0_293 = arith.constant 0 : index
    %c0_294 = arith.constant 0 : index
    %248 = vector.load %arg11[%c0_292, %c7, %c0_293, %c0_294] : memref<1x8x8x128xf32, #tpu.memory_space<vmem>>, vector<1x1x8x128xf32>
    %249 = vector.shape_cast %248 : vector<1x1x8x128xf32> to vector<8x128xf32>
    %250 = vector.shape_cast %247 : vector<8x128xf32> to vector<1x1x8x128xf32>
    tpu.vector_store %arg11[%c0_292, %c7, %c0_293, %c0_294], %250 {strides = array<i32>} : memref<1x8x8x128xf32, #tpu.memory_space<vmem>>, vector<1x1x8x128xf32>,
    return
  }
  func.func @transform_0(%arg0: i32) -> (i32, i32, i32, i32) {
    %c0_i32 = arith.constant 0 : i32
    %c0_i32_0 = arith.constant 0 : i32
    %c0_i32_1 = arith.constant 0 : i32
    %c0_i32_2 = arith.constant 0 : i32
    return %arg0, %c0_i32, %c0_i32_0, %c0_i32_1 : i32, i32, i32, i32
  }
  func.func @transform_1(%arg0: i32) -> (i32, i32) {
    %c0_i32 = arith.constant 0 : i32
    %c0_i32_0 = arith.constant 0 : i32
    %c0_i32_1 = arith.constant 0 : i32
    return %c0_i32, %c0_i32_0 : i32, i32
  }
  func.func @transform_2(%arg0: i32) -> (i32, i32) {
    %c0_i32 = arith.constant 0 : i32
    %c0_i32_0 = arith.constant 0 : i32
    %c0_i32_1 = arith.constant 0 : i32
    return %c0_i32, %c0_i32_0 : i32, i32
  }
  func.func @transform_3(%arg0: i32) -> (i32, i32) {
    %c0_i32 = arith.constant 0 : i32
    %c0_i32_0 = arith.constant 0 : i32
    %c0_i32_1 = arith.constant 0 : i32
    return %c0_i32, %c0_i32_0 : i32, i32
  }
  func.func @transform_4(%arg0: i32) -> (i32, i32) {
    %c0_i32 = arith.constant 0 : i32
    %c0_i32_0 = arith.constant 0 : i32
    %c0_i32_1 = arith.constant 0 : i32
    return %c0_i32, %c0_i32_0 : i32, i32
  }
  func.func @transform_5(%arg0: i32) -> (i32, i32, i32, i32) {
    %c0_i32 = arith.constant 0 : i32
    %c0_i32_0 = arith.constant 0 : i32
    %c0_i32_1 = arith.constant 0 : i32
    %c0_i32_2 = arith.constant 0 : i32
    %c0_i32_3 = arith.constant 0 : i32
    return %c0_i32, %c0_i32_0, %c0_i32_1, %c0_i32_2 : i32, i32, i32, i32
  }
  func.func @transform_6(%arg0: i32) -> (i32, i32) {
    %c0_i32 = arith.constant 0 : i32
    %c0_i32_0 = arith.constant 0 : i32
    %c0_i32_1 = arith.constant 0 : i32
    return %c0_i32, %c0_i32_0 : i32, i32
  }
  func.func @transform_7(%arg0: i32) -> (i32, i32) {
    %c0_i32 = arith.constant 0 : i32
    %c0_i32_0 = arith.constant 0 : i32
    %c0_i32_1 = arith.constant 0 : i32
    return %c0_i32, %c0_i32_0 : i32, i32
  }
  func.func @transform_8(%arg0: i32) -> (i32, i32, i32, i32) {
    %c0_i32 = arith.constant 0 : i32
    %c0_i32_0 = arith.constant 0 : i32
    %c0_i32_1 = arith.constant 0 : i32
    %c0_i32_2 = arith.constant 0 : i32
    %c0_i32_3 = arith.constant 0 : i32
    return %c0_i32, %c0_i32_0, %c0_i32_1, %c0_i32_2 : i32, i32, i32, i32
  }
  func.func @transform_9(%arg0: i32) -> (i32, i32) {
    %c0_i32 = arith.constant 0 : i32
    %c0_i32_0 = arith.constant 0 : i32
    %c0_i32_1 = arith.constant 0 : i32
    return %c0_i32, %c0_i32_0 : i32, i32
  }
  func.func @transform_10(%arg0: i32) -> (i32, i32, i32, i32) {
    %c0_i32 = arith.constant 0 : i32
    %c0_i32_0 = arith.constant 0 : i32
    %c0_i32_1 = arith.constant 0 : i32
    %c0_i32_2 = arith.constant 0 : i32
    return %arg0, %c0_i32, %c0_i32_0, %c0_i32_1 : i32, i32, i32, i32
  }
}

</mosaic_0001>

<bundles_post_ra>
// kernel: basic_block_forward.1
= control target key start
LH: loop header
LB: loop body
LE: loop exit
PB: predicated region body
PF: predicated region fallthrough
CT: control target
= control target key end

     0   :  { %15 = vsyncpa [#allocation6], 0  ;;  %s10315_s0 = inlined_call_operand.vmem [shape: bf16[2,4,104,128], index: 0, kind: input, shape index: {}]   ;;  %s10316_s1 = inlined_call_operand.vmem [shape: f32[104,1], index: 1, kind: input, shape index: {}]   ;;  %s10317_s2 = inlined_call_operand.vmem [shape: f32[80,1], index: 2, kind: input, shape index: {}]   ;;  %s10318_s3 = inlined_call_operand.vmem [shape: f32[1,128], index: 3, kind: input, shape index: {}]   ;;  %s10319_s4 = inlined_call_operand.vmem [shape: f32[1,128], index: 4, kind: input, shape index: {}]   ;;  %s10320_s5 = inlined_call_operand.vmem [shape: bf16[3,3,128,128], index: 5, kind: input, shape index: {}]   ;;  %s10321_s6 = inlined_call_operand.vmem [shape: f32[1,128], index: 6, kind: input, shape index: {}]   ;;  %s10322_s7 = inlined_call_operand.vmem [shape: f32[1,128], index: 7, kind: input, shape index: {}]   ;;  %s10323_s8 = inlined_call_operand.vmem [shape: bf16[3,3,128,128], index: 8, kind: input, shape index: {}]   ;;  %s10324_s9 = inlined_call_operand.vmem [shape: bf16[128,128], index: 9, kind: input, shape index: {}]   ;;  %s10325_s10 = inlined_call_operand.hbm [shape: f32[2,8,8,128], index: 10, kind: output, shape index: {}]  }
   0x1   :  { %17 = vsyncpa [#allocation6 + $0x1], 0  ;;  %s8694_s13 = smov 0   ;;  %s8696_s14 = smov 0  }
   0x2   :  { %s8698_s15 = smov 0   ;;  %s8700_s16 = smov 0  }
   0x3 LB: > { %s8715_s17 = sadd.s32 4294967295, %s8631_s16   ;;  %s5990_s18 = sadd.s32 4294967294, %s8631_s16   ;;  %s8631_s16 = sphi %s8700_s16, %s10392_s16   ;;  %s8627_s15 = sphi %s8698_s15, %s10391_s15   ;;  %s8623_s14 = sphi %s8696_s14, %s10390_s14   ;;  %s8619_s13 = sphi %s8694_s13, %s10389_s13  }
   0x4   : > { %s8719_s19 = sadd.s32 1, %s8631_s16   ;;  %s245_s20 = sadd.s32 1, %s8627_s15 }
   0x5   : > { %s242_s21 = ssub.s32 %s8631_s16, %s8719_s19  ;;  %p255_p0 = scmp.ne.s32.totalorder %s8627_s15, %s8623_s14 }
   0x6   : > { %p243_p1 = scmp.eq.s32.totalorder %s242_s21, 0  ;;  %p256_p2 = scmp.eq.s32.totalorder %s8715_s17, 1 }
   0x7   : > { %p261_p3 = scmp.ne.s32.totalorder %s8623_s14, %s8619_s13  ;;  %p262_p4 = scmp.eq.s32.totalorder %s5990_s18, 1 }
   0x8   : > { %s8730_s22 = scalar_select %p243_p1, %s8627_s15, %s245_s20  }
   0x9   : > { %p8732_p5 = por %p256_p2, %p255_p0  ;;  %p8736_p6 = por %p262_p4, %p261_p3 }
   0xa   : > { %p5993_p7 = scmp.ge.s32.totalorder %s8631_s16, 1  ;;  %p315_p8 = scmp.lt.s32.totalorder %s8631_s16, 3 }
   0xc   : > { %p316_p9 = pnand %p5993_p7, %p315_p8 }
   0xe   : > { %319 = sbr.rel (%p316_p9) target bundleno = 1342 (0x53e), region = 60 }
  0x15   : > { %v363_v0 = vld [vmem:[%s10316_s1 + $0x10] sm:$0xff]  ;;  %v361_v1 = vld [vmem:[%s10316_s1] sm:$0xff]  ;;  %v8633_v2 = vmov 0   ;;  %v364_v3 = vld [vmem:[%s10316_s1 + $0x18] sm:$0xff]  ;;  %v10326_v5 = vmov 0.0   ;;  %p353_p10 = scmp.lt.s32.totalorder %s8715_s17, 1 }
  0x16   : > { %8294 = vset.pattern.permute.xlu1 %v8633_v2  ;;  %3365 = vst [vmem:[#allocation3] sm:$0xf] %v8633_v2  ;;  %3378 = vst [vmem:[#allocation3 + $0x30] sm:$0xf] %v8633_v2  ;;  %8293 = vset.pattern.permute.xlu0 %v8633_v2  ;;  %v362_v4 = vld [vmem:[%s10316_s1 + $0x8] sm:$0xff]  ;;  %v365_v7 = vld [vmem:[%s10316_s1 + $0x20] sm:$0xff] }
  0x17   : > { %463 = vperm.xlu1 %8294, %v363_v0   ;;  %453 = vperm.xlu0 %8293, %v361_v1   ;;  %v366_v6 = vld [vmem:[%s10316_s1 + $0x28] sm:$0xff]  ;;  %v8295_v8 = vld [vmem:[%s10320_s5] sm:$0xff]   ;;  %v368_v9 = vld [vmem:[%s10316_s1 + $0x38] sm:$0xff]  ;;  %s354_s21 = scalar_select %p353_p10, %s8715_s17, 1  ;;  %vm8635_vm0 = vmmov 0   ;;  %vm1789_vm2 = vcmask 1046528  }
  0x18   : > { %7204 = vmatprep.subr.bf16.mxu0 %v10326_v5  ;;  %7528 = vmatprep.subr.bf16.mxu1 %v10326_v5  ;;  %v367_v10 = vld [vmem:[%s10316_s1 + $0x30] sm:$0xff]  ;;  %v8296_v11 = vld [vmem:[%s10320_s5 + $0x8] sm:$0xff]   ;;  %v369_v13 = vld [vmem:[%s10316_s1 + $0x40] sm:$0xff]  ;;  %vm1276_vm1 = vsmask.f32 7424  ;;  %vm3366_vm4 = vcmask 1041408  }
  0x19   : > { %7205 = vmatpush3.bf16.msra.mxu0 %v8295_v8  ;;  %v370_v12 = vld [vmem:[%s10316_s1 + $0x48] sm:$0xff]  ;;  %v8297_v14 = vld [vmem:[%s10320_s5 + $0x10] sm:$0xff]   ;;  %v372_v15 = vld [vmem:[%s10316_s1 + $0x58] sm:$0xff]  ;;  %s8248_s29 = smul.u32 208, %s354_s21  ;;  %7220 = vmatprep.mubr.msk.bf16.mxu0 %vm8635_vm0, %v10326_v5  ;;  %vm2013_vm3 = vsmask.f32 6400 }
  0x1a   : > { %7206 = vmatprep.subr.bf16.mxu0 %v10326_v5  ;;  %v371_v16 = vld [vmem:[%s10316_s1 + $0x50] sm:$0xff]  ;;  %v8298_v17 = vld [vmem:[%s10320_s5 + $0x18] sm:$0xff]   ;;  %v3295_v18 = vld [vmem:[%s10317_s2] sm:$0xff]  ;;  %7544 = vmatprep.mubr.msk.bf16.mxu1 %vm8635_vm0, %v10326_v5  ;;  %vm3367_vm5 = vsmask.f32 1280  ;;  %vm3372_vm6 = vcmask 1043457  }
  0x1b   : > { %468 = vperm.xlu1 %8294, %v364_v3   ;;  %458 = vperm.xlu0 %8293, %v362_v4   ;;  %v373_v19 = vld [vmem:[%s10316_s1 + $0x60] sm:$0xff]  ;;  %v3297_v21 = vld [vmem:[%s10317_s2 + $0x10] sm:$0xff]  ;;  %v3296_v22 = vld [vmem:[%s10317_s2 + $0x8] sm:$0xff]  ;;  %s8816_s21 = scalar_lea.vmem %s10315_s0, %s8248_s29  ;;  %vm3373_vm8 = vsmask.f32 7942  ;;  %vm4746_vm12 = vcmask 1045504  }
  0x1c   : > { %v8299_v20 = vld [vmem:[%s10320_s5 + $0x20] sm:$0xff]   ;;  %v8300_v23 = vld [vmem:[%s10320_s5 + $0x28] sm:$0xff]   ;;  %v3298_v26 = vld [vmem:[%s10317_s2 + $0x18] sm:$0xff]  ;;  %vm3409_vm10 = vsmask.f32 5392  ;;  %vm5459_vm14 = vcmask 1044480  }
  0x1d   : > { %7207 = vmatpush3.bf16.msra.mxu0 %v8296_v11  ;;  %v6912_v24 = vld [vmem:[%s8816_s21 + $0x8] sm:$0xff]   ;;  %v3299_v25 = vld [vmem:[%s10317_s2 + $0x20] sm:$0xff]  ;;  %v8830_v27 = vld [vmem:[%s8816_s21 + $0x38] sm:$0xff]   ;;  %vm5193_vm13 = vsmask.f32 5376  ;;  %s350_s25 = sand.u32 1, %s8623_s14  }
  0x1e   : > { %7208 = vmatprep.subr.bf16.mxu0 %v10326_v5  ;;  %v6935_v28 = vld [vmem:[%s8816_s21 + $0x70] sm:$0xff]   ;;  %v8837_v30 = vld [vmem:[%s8816_s21 + $0xa0] sm:$0xff]   ;;  %v3300_v32 = vld [vmem:[%s10317_s2 + $0x28] sm:$0xff]  ;;  %v6702_v33 = vunpack.c.l.bf16 %v6912_v24  ;;  %v6753_v34 = vunpack.c.h.bf16 %v8830_v27  ;;  %v6703_v54 = vunpack.c.h.bf16 %v6912_v24  ;;  %s5994_s26 = sshll.u32 %s350_s25, 6  ;;  %s6695_s28 = sshll.u32 %s8715_s17, 10 }
  0x1f   : > { %478 = vperm.xlu1 %8294, %v366_v6   ;;  %473 = vperm.xlu0 %8293, %v365_v7   ;;  %v8301_v29 = vld [vmem:[%s10320_s5 + $0x30] sm:$0xff]   ;;  %v6810_v35 = vunpack.c.l.bf16 %v6935_v28  ;;  %v8848_v36 = vld [vmem:[%s8816_s21] sm:$0xff]   ;;  %v8852_v38 = vld [vmem:[%s8816_s21 + $0x68] sm:$0xff]   ;;  %v6861_v41 = vunpack.c.h.bf16 %v8837_v30  ;;  %v6811_v1 = vunpack.c.h.bf16 %v6935_v28  ;;  %s10250_s27 = scalar_lea.vmem [#allocation5], %s5994_s26  ;;  %s10274_s18 = scalar_lea.sflag [#allocation6], %s350_s25 }
  0x20   : > { %v3301_v31 = vld [vmem:[%s10317_s2 + $0x30] sm:$0xff]  ;;  %v8302_v39 = vld [vmem:[%s10320_s5 + $0x38] sm:$0xff]   ;;  %v8860_v40 = vld [vmem:[%s10318_s3] ss:$0 sm:$0xff]  ;;  %v6698_v42 = vunpack.c.l.bf16 %v8848_v36  ;;  %v6806_v49 = vunpack.c.l.bf16 %v8852_v38  ;;  %s5928_s30 = sshll.u32 %s10250_s27, 4  ;;  %s8636_s17 = smov [#allocation5]   ;;  %s10268_s30 = int_to_ptr.vmem [resolvable:$true] %s5928_s30 }
  0x21   : > { %7209 = vmatpush3.bf16.msra.mxu0 %v8297_v14  ;;  %v6011_v37 = vld [vmem:[%s8816_s21 + $0x34] ss:$104 sps:$4 sm:$0xff]   ;;  %v3303_v43 = vld [vmem:[%s10317_s2 + $0x40] sm:$0xff]  ;;  %v408_v45 = vmul.f32 %v6702_v33, %v8860_v40  ;;  %v624_v46 = vmul.f32 %v6753_v34, %v8860_v40  ;;  %v770_v47 = vmul.f32 %v6810_v35, %v8860_v40  ;;  %v916_v52 = vmul.f32 %v6861_v41, %v8860_v40  ;;  %v3304_v60 = vld [vmem:[%s10317_s2 + $0x48] sm:$0xff]  ;;  %s8569_s29 = scalar_lea.vmem %s10268_s30, 1024  ;;  %s8573_s20 = sshll.u32 %s8636_s17, 4  ;;  %s8574_s20 = int_to_ptr.vmem [resolvable:$false] %s8573_s20 }
  0x22   : > { %7210 = vmatprep.subr.bf16.mxu0 %v10326_v5  ;;  %v3302_v44 = vld [vmem:[%s10317_s2 + $0x38] sm:$0xff]  ;;  %v8875_v48 = vld [vmem:[%s8816_s21 + $0x40] sm:$0xff]   ;;  %v901_v50 = vunpack.c.h.bf16 %v6011_v37  ;;  %v406_v53 = vmul.f32 %v6698_v42, %v8860_v40  ;;  %v768_v59 = vmul.f32 %v6806_v49, %v8860_v40  ;;  %v409_v0 = vmul.f32 %v6703_v54, %v8860_v40  ;;  %v6946_v7 = vld [vmem:[%s8816_s21 + $0xa8] sm:$0xff]   ;;  %p8570_p11 = scmp.ne.s32.totalorder %s10268_s30, %s8569_s29  ;;  %s8575_s26 = scalar_lea.vmem %s8574_s20, 2048 }
  0x23   : > { %488 = vperm.xlu1 %8294, %v368_v9   ;;  %483 = vperm.xlu0 %8293, %v367_v10   ;;  %v8881_v51 = vld [vmem:[%s10319_s4] ss:$0 sm:$0xff]  ;;  %v6756_v58 = vunpack.c.l.bf16 %v8875_v48  ;;  %v6752_v9 = vunpack.c.l.bf16 %v8830_v27  ;;  %v6913_v10 = vld [vmem:[%s8816_s21 + $0x10] sm:$0xff]   ;;  %v6864_v14 = vunpack.c.l.bf16 %v6946_v7  ;;  %v8950_v33 = vld [vmem:[%s8816_s21 + $0x18] sm:$0xff]   ;;  %p8576_p0 = scmp.lt.s32.totalorder %s10268_s30, %s8574_s20  ;;  %p8577_p1 = scmp.lt.s32.totalorder %s8575_s26, %s8569_s29 }
  0x24   : > { %v8887_v55 = vadd.f32 %v8881_v51, %v408_v45  ;;  %v8890_v56 = vadd.f32 %v8881_v51, %v624_v46  ;;  %v8893_v57 = vadd.f32 %v8881_v51, %v770_v47  ;;  %v914_v61 = vmul.f32 %v8860_v40, %v901_v50  ;;  %v8960_v37 = vld [vmem:[%s8816_s21 + $0x50] sm:$0xff]   ;;  %vm9743_vm7 = vmand %vm3366_vm4, %vm3367_vm5  ;;  %p8571_p12 = pnand %p8570_p11, %p8732_p5 }
  0x25   : > { %7211 = vmatpush3.bf16.msra.mxu0 %v8298_v17  ;;  %v8902_v62 = vadd.f32 %v8881_v51, %v916_v52  ;;  %v8905_v63 = vadd.f32 %v8881_v51, %v406_v53  ;;  %v625_v6 = vmul.f32 %v6756_v58, %v8860_v40  ;;  %v8914_v8 = vadd.f32 %v8881_v51, %v768_v59  ;;  %v6936_v17 = vld [vmem:[%s8816_s21 + $0x78] sm:$0xff]   ;;  %vm9749_vm9 = vmand %vm3372_vm6, %vm3373_vm8  ;;  %p8578_p2 = por %p8577_p1, %p8576_p0 }
  0x26   : > { %7212 = vmatprep.subr.bf16.mxu0 %v10326_v5  ;;  %v440_v2 = vmax.f32 %v8887_v55, 0.0  ;;  %v796_v4 = vmax.f32 %v8893_v57, 0.0  ;;  %v8919_v11 = vadd.f32 %v8881_v51, %v914_v61  ;;  %v623_v24 = vmul.f32 %v6752_v9, %v8860_v40  ;;  %vm9775_vm11 = vmor %vm3367_vm5, %vm3409_vm10  ;;  %p8572_p13 = pneg %p8571_p12 }
  0x27   : > { %498 = vperm.xlu1 %8294, %v370_v12   ;;  %493 = vperm.xlu0 %8293, %v369_v13   ;;  %v8922_v12 = vadd.f32 %v8881_v51, %v409_v0  ;;  %v771_v13 = vmul.f32 %v6811_v1, %v8860_v40  ;;  %v6707_v27 = vunpack.c.h.bf16 %v6913_v10  ;;  %v6706_v42 = vunpack.c.l.bf16 %v6913_v10 }
  0x28   : > { %v6757_v45 = vunpack.c.h.bf16 %v8875_v48  ;;  %v6814_v46 = vunpack.c.l.bf16 %v6936_v17  ;;  %v6865_v50 = vunpack.c.h.bf16 %v6946_v7  ;;  %v6711_v52 = vunpack.c.h.bf16 %v8950_v33  ;;  %p8579_p3 = pnand %p8578_p2, %p8572_p13 }
  0x29   : > { %7213 = vmatpush3.bf16.msra.mxu0 %v8299_v20  ;;  %v8933_v20 = vadd.f32 %v8881_v51, %v625_v6  ;;  %v6764_v61 = vunpack.c.l.bf16 %v8960_v37  ;;  %v10338_v55 = vmax.f32 %v8905_v63, 0.0  ;;  %v10339_v57 = vmax.f32 %v8914_v8, 0.0 }
  0x2a   : > { %7214 = vmatprep.subr.bf16.mxu0 %v10326_v5  ;;  %v626_v7 = vmul.f32 %v6757_v45, %v8860_v40  ;;  %v772_v9 = vmul.f32 %v6814_v46, %v8860_v40 }
  0x2b   : > { %508 = vperm.xlu1 %8294, %v372_v15   ;;  %503 = vperm.xlu0 %8293, %v371_v16   ;;  %v6699_v15 = vunpack.c.h.bf16 %v8848_v36  ;;  %v8927_v16 = vld [vmem:[%s8816_s21 + $0x48] sm:$0xff]   ;;  %v6815_v36 = vunpack.c.h.bf16 %v6936_v17  ;;  %v9002_v17 = vld [vmem:[%s8816_s21 + $0xb8] sm:$0xff]  }
  0x2c   : > { %v6760_v35 = vunpack.c.l.bf16 %v8927_v16  ;;  %v6872_v46 = vunpack.c.l.bf16 %v9002_v17 }
  0x2d   : > { %7215 = vmatpush3.bf16.msra.mxu0 %v8300_v23  ;;  %v773_v48 = vmul.f32 %v6815_v36, %v8860_v40 }
  0x2e   : > { %7216 = vmatprep.subr.bf16.mxu0 %v10326_v5  ;;  %v627_v58 = vmul.f32 %v6760_v35, %v8860_v40 }
  0x2f   : > { %3307 = vperm.xlu1 %8294, %v3295_v18   ;;  %513 = vperm.xlu0 %8293, %v373_v19  }
  0x31   : > { %7217 = vmatpush3.bf16.msra.mxu0 %v8301_v29  ;;  %v8945_v29 = vadd.f32 %v8881_v51, %v771_v13  ;;  %v9112_v13 = vld [vmem:[%s8816_s21 + $0x60] sm:$0xff]  }
  0x32   : > { %7218 = vmatprep.subr.bf16.mxu0 %v10326_v5 }
  0x33   : > { %3317 = vperm.xlu1 %8294, %v3297_v21   ;;  %3312 = vperm.xlu0 %8293, %v3296_v22   ;;  %v6807_v21 = vunpack.c.h.bf16 %v8852_v38  ;;  %v8937_v22 = vld [vmem:[%s8816_s21 + $0xb0] sm:$0xff]   ;;  %v8963_v38 = vld [vmem:[%s8816_s21 + $0x80] sm:$0xff]  }
  0x34   : > { %v6868_v41 = vunpack.c.l.bf16 %v8937_v22  ;;  %v6819_v0 = vunpack.c.h.bf16 %v8963_v38 }
  0x35   : > { %7219 = vmatpush3.bf16.msra.mxu0 %v8302_v39  ;;  %v769_v34 = vmul.f32 %v6807_v21, %v8860_v40  ;;  %v8966_v39 = vadd.f32 %v8881_v51, %v623_v24 }
  0x36   : > { %7240 = vmatprep.subr.bf16.mxu0 %v10326_v5  ;;  %v919_v59 = vmul.f32 %v6868_v41, %v8860_v40  ;;  %v775_v35 = vmul.f32 %v6819_v0, %v8860_v40  ;;  %v6926_v5 = vld [vmem:[%s8816_s21 + $0x58] sm:$0xff]  }
  0x37   : > { %3327 = vperm.xlu1 %8294, %v3299_v25   ;;  %3322 = vperm.xlu0 %8293, %v3298_v26   ;;  %v940_v25 = vmax.f32 %v8919_v11, 0.0  ;;  %v6860_v26 = vunpack.c.l.bf16 %v8837_v30  ;;  %v8981_v54 = vadd.f32 %v8881_v51, %v769_v34  ;;  %v629_v34 = vmul.f32 %v6764_v61, %v8860_v40 }
  0x38   : > { %v9044_v61 = vadd.f32 %v8881_v51, %v775_v35 }
  0x3b   : > { %3337 = vperm.xlu1 %8294, %v3301_v31   ;;  %3332 = vperm.xlu0 %8293, %v3300_v32   ;;  %v917_v31 = vmul.f32 %v6864_v14, %v8860_v40  ;;  %v407_v32 = vmul.f32 %v6699_v15, %v8860_v40  ;;  %v918_v14 = vmul.f32 %v6865_v50, %v8860_v40  ;;  %v6710_v50 = vunpack.c.l.bf16 %v8950_v33 }
  0x3c   : > { %v413_v15 = vmul.f32 %v6711_v52, %v8860_v40  ;;  %v6761_v52 = vunpack.c.h.bf16 %v8927_v16  ;;  %v6869_v16 = vunpack.c.h.bf16 %v8937_v22  ;;  %v6768_v22 = vunpack.c.l.bf16 %v6926_v5 }
  0x3d   : > { %v8974_v49 = vadd.f32 %v8881_v51, %v917_v31  ;;  %v8978_v53 = vadd.f32 %v8881_v51, %v407_v32  ;;  %v9013_v31 = vadd.f32 %v8881_v51, %v919_v59  ;;  %v9081_v59 = vld [vmem:[%s8816_s21 + $0xc0] sm:$0xff]  }
  0x3e   : > { %v9032_v45 = vadd.f32 %v8881_v51, %v413_v15  ;;  %v412_v15 = vmul.f32 %v6710_v50, %v8860_v40  ;;  %v920_v50 = vmul.f32 %v6869_v16, %v8860_v40  ;;  %v631_v41 = vmul.f32 %v6768_v22, %v8860_v40 }
  0x3f   : > { %3347 = vperm.xlu1 %8294, %v3303_v43   ;;  %3342 = vperm.xlu0 %8293, %v3302_v44   ;;  %v915_v43 = vmul.f32 %v6860_v26, %v8860_v40  ;;  %v411_v44 = vmul.f32 %v6707_v27, %v8860_v40  ;;  %v9007_v26 = vadd.f32 %v8881_v51, %v627_v58  ;;  %v6765_v16 = vunpack.c.h.bf16 %v8960_v37 }
  0x40   : > { %v9010_v27 = vadd.f32 %v8881_v51, %v773_v48  ;;  %v9058_v35 = vadd.f32 %v8881_v51, %v412_v15  ;;  %v9098_v36 = vadd.f32 %v8881_v51, %v631_v41  ;;  %v6939_v41 = vld [vmem:[%s8816_s21 + $0x90] sm:$0xff]  }
  0x41   : > { %v8990_v1 = vadd.f32 %v8881_v51, %v915_v43  ;;  %v8993_v6 = vadd.f32 %v8881_v51, %v411_v44  ;;  %v9026_v43 = vadd.f32 %v8881_v51, %v772_v9  ;;  %v9029_v44 = vadd.f32 %v8881_v51, %v918_v14 }
  0x42   : > { %v921_v14 = vmul.f32 %v6872_v46, %v8860_v40  ;;  %v6818_v9 = vunpack.c.l.bf16 %v8963_v38  ;;  %v6915_v46 = vld [vmem:[%s8816_s21 + $0x20] sm:$0xff]   ;;  %v6876_v38 = vunpack.c.l.bf16 %v9081_v59  ;;  %v630_v37 = vmul.f32 %v6765_v16, %v8860_v40 }
  0x43   : > { %3352 = vperm.xlu0 %8293, %v3304_v60   ;;  %v410_v60 = vmul.f32 %v6706_v42, %v8860_v40  ;;  %v9023_v42 = vadd.f32 %v8881_v51, %v626_v7  ;;  %v6715_v7 = vunpack.c.h.bf16 %v6915_v46  ;;  %v6714_v0 = vunpack.c.l.bf16 %v6915_v46 }
  0x44   : > { %v9055_v48 = vadd.f32 %v8881_v51, %v921_v14  ;;  %v774_v14 = vmul.f32 %v6818_v9, %v8860_v40  ;;  %v6938_v9 = vld [vmem:[%s8816_s21 + $0x88] sm:$0xff]   ;;  %v923_v30 = vmul.f32 %v6876_v38, %v8860_v40  ;;  %v9124_v47 = vadd.f32 %v8881_v51, %v630_v37 }
  0x45   : > { %v9016_v32 = vadd.f32 %v8881_v51, %v410_v60  ;;  %v9041_v60 = vadd.f32 %v8881_v51, %v629_v34  ;;  %v628_v34 = vmul.f32 %v6761_v52, %v8860_v40  ;;  %v415_v52 = vmul.f32 %v6715_v7, %v8860_v40 }
  0x46   : > { %v9071_v15 = vadd.f32 %v8881_v51, %v774_v14  ;;  %v6823_v58 = vunpack.c.h.bf16 %v6938_v9  ;;  %v6822_v24 = vunpack.c.l.bf16 %v6938_v9  ;;  %v9105_v7 = vadd.f32 %v8881_v51, %v923_v30  ;;  %v9137_v30 = vld [vmem:[%s8816_s21 + $0xc8] sm:$0xff]  }
  0x47   : > { %v9068_v33 = vadd.f32 %v8881_v51, %v628_v34  ;;  %v9084_v34 = vadd.f32 %v8881_v51, %v920_v50  ;;  %v9087_v14 = vadd.f32 %v8881_v51, %v415_v52  ;;  %v6916_v50 = vld [vmem:[%s8816_s21 + $0x28] sm:$0xff]   ;;  %v414_v52 = vmul.f32 %v6714_v0, %v8860_v40  ;;  %s10266_s21 = scalar_lea.hbm %s10325_s10, %s6695_s28 }
  0x48   : > { %v777_v10 = vmul.f32 %v6823_v58, %v8860_v40  ;;  %v6873_v58 = vunpack.c.h.bf16 %v9002_v17  ;;  %v6719_v38 = vunpack.c.h.bf16 %v6916_v50  ;;  %v776_v9 = vmul.f32 %v6822_v24, %v8860_v40 }
  0x49   : > { %v9108_v22 = vadd.f32 %v8881_v51, %v414_v52  ;;  %v6772_v0 = vunpack.c.l.bf16 %v9112_v13  ;;  %v6718_v19 = vunpack.c.l.bf16 %v6916_v50  ;;  %v6826_v3 = vunpack.c.l.bf16 %v6939_v41 }
  0x4a   : > { %v9101_v46 = vadd.f32 %v8881_v51, %v777_v10  ;;  %v922_v21 = vmul.f32 %v6873_v58, %v8860_v40  ;;  %v417_v17 = vmul.f32 %v6719_v38, %v8860_v40  ;;  %v9127_v28 = vadd.f32 %v8881_v51, %v776_v9 }
  0x4b   : > { %v6827_v10 = vunpack.c.h.bf16 %v6939_v41  ;;  %v633_v37 = vmul.f32 %v6772_v0, %v8860_v40  ;;  %v6769_v58 = vunpack.c.h.bf16 %v6926_v5  ;;  %v416_v0 = vmul.f32 %v6718_v19, %v8860_v40 }
  0x4c   : > { %v9131_v16 = vadd.f32 %v8881_v51, %v922_v21  ;;  %v9134_v24 = vadd.f32 %v8881_v51, %v417_v17  ;;  %v6880_v21 = vunpack.c.l.bf16 %v9137_v30  ;;  %v778_v50 = vmul.f32 %v6826_v3, %v8860_v40 }
  0x4d   : > { %v779_v9 = vmul.f32 %v6827_v10, %v8860_v40  ;;  %v9147_v17 = vadd.f32 %v8881_v51, %v633_v37  ;;  %v632_v23 = vmul.f32 %v6769_v58, %v8860_v40  ;;  %v6877_v19 = vunpack.c.h.bf16 %v9081_v59 }
  0x4e   : > { %v925_v38 = vmul.f32 %v6880_v21, %v8860_v40  ;;  %v9168_v41 = vadd.f32 %v8881_v51, %v778_v50 }
  0x4f   : > { %10333 = vst [vmem:[#allocation8_spill] sm:$0xff] %v9147_v17  ;;  %v9150_v18 = vadd.f32 %v8881_v51, %v779_v9  ;;  %v9162_v9 = vadd.f32 %v8881_v51, %v416_v0  ;;  %v9165_v5 = vadd.f32 %v8881_v51, %v632_v23  ;;  %v924_v10 = vmul.f32 %v6877_v19, %v8860_v40 }
  0x50   : > { %v9159_v37 = vadd.f32 %v8881_v51, %v925_v38  ;;  %10335 = vst [vmem:[#allocation10_spill] sm:$0xff] %v9168_v41  ;;  %v6773_v23 = vunpack.c.h.bf16 %v9112_v13  ;;  %v6881_v38 = vunpack.c.h.bf16 %v9137_v30  ;;  %v10336_v19 = vmax.f32 %v8890_v56, 0.0 }
  0x51   : > { %v9184_v58 = vadd.f32 %v8881_v51, %v924_v10  ;;  %v10340_v51 = vmax.f32 %v8922_v12, 0.0  ;;  %v10341_v30 = vmax.f32 %v8945_v29, 0.0  ;;  %v10342_v56 = vmax.f32 %v8978_v53, 0.0 }
  0x52   : > { %10334 = vst [vmem:[#allocation9_spill] sm:$0xff] %v9159_v37  ;;  %v10337_v37 = vmax.f32 %v8902_v62, 0.0  ;;  %v634_v12 = vmul.f32 %v6773_v23, %v8860_v40 }
  0x96   : > { %v464_v0 = vpop.permute.xlu1 %463  ;;  %v454_v52 = vpop.permute.xlu0 %453 }
  0x97   : > { %v953_v50 = vmul.f32 %v940_v25, %v454_v52  ;;  %v518_v59 = vmul.f32 %v464_v0, %v440_v2  ;;  %v809_v21 = vmul.f32 %v796_v4, %v464_v0  ;;  %v663_v3 = vmul.f32 %v10336_v19, %v464_v0 }
  0x98   : > { %v955_v13 = vmul.f32 %v10337_v37, %v464_v0  ;;  %v516_v2 = vmul.f32 %v454_v52, %v10338_v55  ;;  %v807_v4 = vmul.f32 %v10339_v57, %v454_v52  ;;  %v10343_v37 = vmax.f32 %v8966_v39, 0.0 }
  0x99   : > { %v6672_v17 = vpack.c.bf16 %v953_v50, %v953_v50  ;;  %v10344_v50 = vmax.f32 %v8981_v54, 0.0  ;;  %v10345_v19 = vmax.f32 %v8990_v1, 0.0  ;;  %v10346_v39 = vmax.f32 %v8933_v20, 0.0 }
  0x9a   : > { %v469_v11 = vpop.permute.xlu1 %468  ;;  %v459_v25 = vpop.permute.xlu0 %458  ;;  %v10347_v54 = vmax.f32 %v8974_v49, 0.0  ;;  %v10348_v1 = vmax.f32 %v8993_v6, 0.0  ;;  %v10351_v20 = vmax.f32 %v9023_v42, 0.0 }
  0x9b   : > { %v519_v10 = vmul.f32 %v469_v11, %v10340_v51  ;;  %v810_v41 = vmul.f32 %v10341_v30, %v469_v11  ;;  %1020 = vst [vmem:[#allocation2 + $0x9c] sm:$0xf] %v6672_v17  ;;  %v517_v62 = vmul.f32 %v459_v25, %v10342_v56  ;;  %v662_v0 = vmul.f32 %v10343_v37, %v459_v25 }
  0x9c   : > { %v808_v63 = vmul.f32 %v10344_v50, %v459_v25  ;;  %v954_v8 = vmul.f32 %v10345_v19, %v459_v25  ;;  %v664_v56 = vmul.f32 %v10346_v39, %v469_v11  ;;  %v956_v37 = vmul.f32 %v10347_v54, %v469_v11 }
  0x9d   : > { %v6728_v52 = vpack.c.bf16 %v519_v10, %v518_v59  ;;  %v6836_v55 = vpack.c.bf16 %v810_v41, %v809_v21  ;;  %v6723_v57 = vpack.c.bf16 %v517_v62, %v516_v2  ;;  %v6777_v29 = vpack.c.bf16 %v663_v3, %v662_v0 }
  0x9e   : > { %v6831_v51 = vpack.c.bf16 %v808_v63, %v807_v4  ;;  %v6885_v17 = vpack.c.bf16 %v955_v13, %v954_v8  ;;  %v479_v30 = vpop.permute.xlu1 %478  ;;  %v474_v53 = vpop.permute.xlu0 %473  ;;  %v10349_v41 = vmax.f32 %v9010_v27, 0.0  ;;  %v10350_v21 = vmax.f32 %v9016_v32, 0.0  ;;  %v8559_v27 = vld [vmem:[%s10319_s4] ss:$0 sm:$0xff] }
  0x9f   : > { %6917 = vst [vmem:[#allocation2 + $0x8] sm:$0xff] %v6728_v52   ;;  %6940 = vst [vmem:[#allocation2 + $0x70] sm:$0xff] %v6836_v55   ;;  %v521_v59 = vmul.f32 %v479_v30, %v10348_v1  ;;  %v665_v23 = vmul.f32 %v10351_v20, %v474_v53  ;;  %v10352_v13 = vmax.f32 %v9026_v43, 0.0  ;;  %v10353_v11 = vmax.f32 %v9029_v44, 0.0  ;;  %v8560_v32 = vld [vmem:[%s10318_s3] ss:$0 sm:$0xff] }
  0xa0   : > { %v812_v40 = vmul.f32 %v10349_v41, %v479_v30  ;;  %6724 = vst [vmem:[#allocation2] sm:$0xff] %v6723_v57   ;;  %6928 = vst [vmem:[#allocation2 + $0x38] sm:$0xff] %v6777_v29   ;;  %v520_v3 = vmul.f32 %v474_v53, %v10350_v21  ;;  %v950_v25 = vmax.f32 %v9184_v58, 0.0  ;;  %v9228_v2 = vadd.f32 %v8559_v27, %v634_v12 }
  0xa1   : > { %6832 = vst [vmem:[#allocation2 + $0x68] sm:$0xff] %v6831_v51   ;;  %6951 = vst [vmem:[#allocation2 + $0xa0] sm:$0xff] %v6885_v17   ;;  %v811_v49 = vmul.f32 %v10352_v13, %v474_v53  ;;  %v957_v6 = vmul.f32 %v10353_v11, %v474_v53  ;;  %v926_v42 = vmul.f32 %v8560_v32, %v6881_v38  ;;  %v10354_v50 = vmax.f32 %v9007_v26, 0.0 }
  0xa2   : > { %v6733_v4 = vpack.c.bf16 %v521_v59, %v520_v3  ;;  %v6782_v10 = vpack.c.bf16 %v665_v23, %v664_v56  ;;  %v489_v0 = vpop.permute.xlu1 %488  ;;  %v484_v44 = vpop.permute.xlu0 %483  ;;  %v10355_v19 = vmax.f32 %v9013_v31, 0.0  ;;  %v10356_v52 = vmax.f32 %v9032_v45, 0.0 }
  0xa3   : > { %v6841_v43 = vpack.c.bf16 %v812_v40, %v811_v49  ;;  %v6890_v62 = vpack.c.bf16 %v957_v6, %v956_v37  ;;  %v666_v63 = vmul.f32 %v10354_v50, %v479_v30  ;;  %v10357_v12 = vmax.f32 %v9044_v61, 0.0 }
  0xa4   : > { %v958_v8 = vmul.f32 %v10355_v19, %v479_v30  ;;  %v523_v55 = vmul.f32 %v489_v0, %v10356_v52  ;;  %6918 = vst [vmem:[#allocation2 + $0x10] sm:$0xff] %v6733_v4   ;;  %6929 = vst [vmem:[#allocation2 + $0x40] sm:$0xff] %v6782_v10   ;;  %v10358_v38 = vmax.f32 %v9058_v35, 0.0  ;;  %v10359_v51 = vmax.f32 %v9068_v33, 0.0  ;;  %v8304_v33 = vld [vmem:[%s10320_s5 + $0x40] sm:$0xff]  }
  0xa5   : > { %v814_v57 = vmul.f32 %v10357_v12, %v489_v0  ;;  %6941 = vst [vmem:[#allocation2 + $0x78] sm:$0xff] %v6841_v43   ;;  %6952 = vst [vmem:[#allocation2 + $0xa8] sm:$0xff] %v6890_v62   ;;  %v10360_v17 = vmax.f32 %v9071_v15, 0.0  ;;  %v10361_v30 = vmax.f32 %v9084_v34, 0.0  ;;  %v660_v53 = vmax.f32 %v9228_v2, 0.0 }
  0xa6   : > { %v522_v29 = vmul.f32 %v484_v44, %v10358_v38  ;;  %v667_v26 = vmul.f32 %v10359_v51, %v484_v44  ;;  %v939_v61 = vadd.f32 %v8559_v27, %v926_v42  ;;  %v499_v1 = vpop.permute.xlu1 %498  ;;  %v494_v59 = vpop.permute.xlu0 %493  ;;  %v10362_v35 = vmax.f32 %v9041_v60, 0.0  ;;  %v10381_v51 = vld [vmem:[#allocation9_spill] sm:$0xff] }
  0xa7   : > { %v813_v31 = vmul.f32 %v10360_v17, %v484_v44  ;;  %v959_v45 = vmul.f32 %v10361_v30, %v484_v44  ;;  %v10363_v41 = vmax.f32 %v9055_v48, 0.0  ;;  %v10364_v40 = vmax.f32 %v9087_v14, 0.0 }
  0xa8   : > { %v6738_v39 = vpack.c.bf16 %v523_v55, %v522_v29  ;;  %v6787_v56 = vpack.c.bf16 %v667_v26, %v666_v63  ;;  %v668_v15 = vmul.f32 %v10362_v35, %v489_v0  ;;  %v10365_v3 = vmax.f32 %v9101_v46, 0.0  ;;  %v8303_v23 = vld [vmem:[#allocation2 + $0x9c] sm:$0xff]  }
  0xa9   : > { %v6846_v54 = vpack.c.bf16 %v814_v57, %v813_v31  ;;  %v6895_v37 = vpack.c.bf16 %v959_v45, %v958_v8  ;;  %v960_v34 = vmul.f32 %v10363_v41, %v489_v0  ;;  %v525_v21 = vmul.f32 %v499_v1, %v10364_v40  ;;  %7221 = vmatmul.mubr.bf16.vlgmr.msra.gmra.mrb[0].mxu0 %v8303_v23  ;;  %v8315_v41 = vld [vmem:[%s10320_s5 + $0x78] sm:$0xff]   ;;  %v8317_v40 = vld [vmem:[#allocation2 + $0x70] sm:$0xff]  }
  0xaa   : > { %v816_v20 = vmul.f32 %v10365_v3, %v499_v1  ;;  %6919 = vst [vmem:[#allocation2 + $0x18] sm:$0xff] %v6738_v39   ;;  %6930 = vst [vmem:[#allocation2 + $0x48] sm:$0xff] %v6787_v56   ;;  %v10366_v13 = vmax.f32 %v9108_v22, 0.0  ;;  %v10367_v60 = vmax.f32 %v9124_v47, 0.0  ;;  %v10368_v48 = vmax.f32 %v9127_v28, 0.0  ;;  %7241 = vmatpush3.bf16.msra.mxu0 %v8304_v33  ;;  %v509_v10 = vpop.permute.xlu1 %508  ;;  %v504_v43 = vpop.permute.xlu0 %503  ;;  %v8305_v47 = vld [vmem:[%s10320_s5 + $0x48] sm:$0xff]  }
  0xab   : > { %6942 = vst [vmem:[#allocation2 + $0x80] sm:$0xff] %v6846_v54   ;;  %6953 = vst [vmem:[#allocation2 + $0xb0] sm:$0xff] %v6895_v37   ;;  %v10369_v14 = vmax.f32 %v9131_v16, 0.0  ;;  %v952_v46 = vmax.f32 %v939_v61, 0.0  ;;  %v10370_v22 = vmax.f32 %v9098_v36, 0.0  ;;  %v10371_v62 = vmax.f32 %v9105_v7, 0.0 }
  0xac   : > { %v524_v49 = vmul.f32 %v494_v59, %v10366_v13  ;;  %v669_v11 = vmul.f32 %v10367_v60, %v494_v59  ;;  %v815_v6 = vmul.f32 %v10368_v48, %v494_v59  ;;  %v10372_v0 = vmax.f32 %v9134_v24, 0.0  ;;  %v10377_v7 = vld [vmem:[#allocation10_spill] sm:$0xff]  ;;  %v8308_v37 = vld [vmem:[%s10320_s5 + $0x58] sm:$0xff]   ;;  %v8313_v33 = vld [vmem:[%s10320_s5 + $0x70] sm:$0xff]  }
  0xad   : > { %v961_v27 = vmul.f32 %v10369_v14, %v494_v59  ;;  %v670_v28 = vmul.f32 %v10370_v22, %v499_v1  ;;  %v962_v16 = vmul.f32 %v10371_v62, %v499_v1  ;;  %v10373_v50 = vmax.f32 %v9150_v18, 0.0  ;;  %v10379_v18 = vld [vmem:[#allocation8_spill] sm:$0xff]  ;;  %v8306_v39 = vld [vmem:[#allocation2 + $0xa4] sm:$0xff]  }
  0xae   : > { %v6743_v2 = vpack.c.bf16 %v525_v21, %v524_v49  ;;  %v6792_v32 = vpack.c.bf16 %v669_v11, %v668_v15  ;;  %v6851_v42 = vpack.c.bf16 %v816_v20, %v815_v6  ;;  %v527_v44 = vmul.f32 %v509_v10, %v10372_v0  ;;  %v514_v61 = vpop.permute.xlu0 %513  ;;  %v8312_v59 = vld [vmem:[%s10320_s5 + $0x68] sm:$0xff]   ;;  %v8320_v49 = vld [vmem:[#allocation2 + $0x78] sm:$0xff]   ;;  %v8318_v11 = vld [vmem:[%s10320_s5 + $0x80] sm:$0xff]  }
  0xaf   : > { %v6900_v4 = vpack.c.bf16 %v961_v27, %v960_v34  ;;  %v818_v63 = vmul.f32 %v10373_v50, %v509_v10  ;;  %v10374_v19 = vmov 0.0   ;;  %v10375_v8 = vmax.f32 %v9162_v9, 0.0  ;;  %v8307_v9 = vld [vmem:[%s10320_s5 + $0x50] sm:$0xff]   ;;  %v8316_v15 = vld [vmem:[#allocation2 + $0x68] sm:$0xff]  }
  0xb0   : > { %7242 = vmatprep.subr.bf16.mxu0 %v10374_v19  ;;  %6920 = vst [vmem:[#allocation2 + $0x20] sm:$0xff] %v6743_v2   ;;  %6931 = vst [vmem:[#allocation2 + $0x50] sm:$0xff] %v6792_v32   ;;  %v10376_v36 = vmax.f32 %v9165_v5, 0.0  ;;  %v10378_v12 = vmax.f32 %v10377_v7, 0.0  ;;  %v963_v24 = vmul.f32 %v950_v25, %v504_v43  ;;  %7224 = vmatprep.mubr.msk.bf16.mxu0 %vm8635_vm0, %v10374_v19  ;;  %v10380_v38 = vmax.f32 %v10379_v18, 0.0  ;;  %v8319_v14 = vld [vmem:[%s10320_s5 + $0x88] sm:$0xff]  }
  0xb1   : > { %6943 = vst [vmem:[#allocation2 + $0x88] sm:$0xff] %v6851_v42   ;;  %6954 = vst [vmem:[#allocation2 + $0xb8] sm:$0xff] %v6900_v4   ;;  %v526_v52 = vmul.f32 %v504_v43, %v10375_v8  ;;  %v10382_v26 = vmax.f32 %v10381_v51, 0.0  ;;  %7243 = vmatpush3.bf16.msra.mxu0 %v8305_v47  ;;  %v673_v58 = vmul.f32 %v660_v53, %v514_v61  ;;  %v8310_v53 = vld [vmem:[%s10320_s5 + $0x60] sm:$0xff]   ;;  %v1280_v34 = vshll.u32 %v8316_v15, 16  ;;  %v8321_v42 = vld [vmem:[%s10320_s5 + $0x90] sm:$0xff]  }
  0xb2   : > { %v671_v55 = vmul.f32 %v10376_v36, %v504_v43  ;;  %v817_v57 = vmul.f32 %v10378_v12, %v504_v43  ;;  %v672_v29 = vmul.f32 %v10380_v38, %v509_v10  ;;  %v6905_v45 = vpack.c.bf16 %v963_v24, %v962_v16  ;;  %7244 = vmatprep.subr.bf16.mxu0 %v10374_v19  ;;  %v8309_v1 = vld [vmem:[#allocation2 + $0xac] sm:$0xff]   ;;  %v8323_v2 = vld [vmem:[#allocation2 + $0x80] sm:$0xff]   ;;  %v8322_v43 = vld [vmem:[%s10320_s5 + $0x98] sm:$0xff]  }
  0xb3   : > { %v964_v17 = vmul.f32 %v10382_v26, %v509_v10  ;;  %v6748_v5 = vpack.c.bf16 %v527_v44, %v526_v52  ;;  %v965_v25 = vmul.f32 %v952_v46, %v514_v61  ;;  %7225 = vmatmul.mubr.bf16.gmra.mrb[4].mxu0 %v8306_v39  ;;  %v1282_v3 = vrot.slane %v1280_v34, 1  ;;  %v8324_v16 = vld [vmem:[%s10320_s5 + $0xa0] sm:$0xff]   ;;  %v8326_v50 = vld [vmem:[%s10320_s5 + $0xa8] sm:$0xff]  }
  0xb4   : > { %v6797_v31 = vpack.c.bf16 %v671_v55, %v670_v28  ;;  %v6856_v30 = vpack.c.bf16 %v818_v63, %v817_v57  ;;  %6955 = vst [vmem:[#allocation2 + $0xc0] sm:$0xff] %v6905_v45   ;;  %v6802_v56 = vpack.c.bf16 %v673_v58, %v672_v29  ;;  %7228 = vmatprep.mubr.msk.bf16.mxu0 %vm8635_vm0, %v10374_v19  ;;  %v1278_v20 = vshrl.u32 %v8316_v15, 16  ;;  %v8327_v55 = vld [vmem:[%s10320_s5 + $0xb0] sm:$0xff]   ;;  %v8329_v57 = vld [vmem:[%s10320_s5 + $0xb8] sm:$0xff]   ;;  %v8331_v29 = vld [vmem:[#allocation2 + $0xa4] sm:$0xff]  }
  0xb5   : > { %6921 = vst [vmem:[#allocation2 + $0x28] sm:$0xff] %v6748_v5   ;;  %v6910_v54 = vpack.c.bf16 %v965_v25, %v964_v17  ;;  %7245 = vmatpush3.bf16.msra.mxu0 %v8307_v9  ;;  %v1285_v23 = vshll.u32 %v8317_v40, 16  ;;  %v1293_v6 = vshll.u32 %v8320_v49, 16  ;;  %v1289_v27 = vshrl.u32 %v8317_v40, 16  ;;  %v8330_v24 = vld [vmem:[#allocation2 + $0x9c] sm:$0xff]   ;;  %v8334_v45 = vld [vmem:[#allocation2 + $0xac] sm:$0xff]  }
  0xb6   : > { %6932 = vst [vmem:[#allocation2 + $0x58] sm:$0xff] %v6797_v31   ;;  %6944 = vst [vmem:[#allocation2 + $0x90] sm:$0xff] %v6856_v30   ;;  %7246 = vmatprep.subr.bf16.mxu0 %v10374_v19  ;;  %v1283_v13 = vor.u32 %v1282_v3, %v1278_v20  ;;  %v1301_v10 = vshll.u32 %v8323_v2, 16  ;;  %v1297_v47 = vshrl.u32 %v8320_v49, 16  ;;  %v1305_v63 = vshrl.u32 %v8323_v2, 16  ;;  %v8332_v58 = vld [vmem:[%s10320_s5 + $0xc0] sm:$0xff]  }
  0xb7   : > { %6933 = vst [vmem:[#allocation2 + $0x60] sm:$0xff] %v6802_v56   ;;  %6956 = vst [vmem:[#allocation2 + $0xc8] sm:$0xff] %v6910_v54   ;;  %v1287_v60 = vrot.slane %v1285_v23, 1  ;;  %v1295_v46 = vrot.slane %v1293_v6, 1  ;;  %v1536_v26 = vshll.u32 %v8330_v24, 16  ;;  %v1541_v9 = vshll.u32 %v8331_v29, 16 }
  0xb8   : > { %v8311_v35 = vld [vmem:[#allocation2 + $0xb4] sm:$0xff]   ;;  %v1303_v22 = vrot.slane %v1301_v10, 1  ;;  %v8325_v28 = vld [vmem:[#allocation2 + $0x88] sm:$0xff]   ;;  %v1534_v31 = vshrl.u32 %v8330_v24, 16  ;;  %v1549_v39 = vshll.u32 %v8334_v45, 16  ;;  %v1545_v54 = vshrl.u32 %v8331_v29, 16 }
  0xb9   : > { %7247 = vmatpush3.bf16.msra.mxu0 %v8308_v37  ;;  %v1288_v48 = vsel %vm1276_vm1, %v1283_v13, %v1287_v60  ;;  %v1291_v32 = vor.u32 %v1289_v27, %v1287_v60  ;;  %v1299_v62 = vor.u32 %v1297_v47, %v1295_v46  ;;  %v1309_v44 = vshll.u32 %v8325_v28, 16  ;;  %v8333_v56 = vld [vmem:[%s10320_s5 + $0xc8] sm:$0xff]   ;;  %v8336_v15 = vld [vmem:[%s10320_s5 + $0xd8] sm:$0xff]   ;;  %v8338_v3 = vld [vmem:[%s10320_s5 + $0xe0] sm:$0xff]  }
  0xba   : > { %7248 = vmatprep.subr.bf16.mxu0 %v10374_v19  ;;  %v1307_v36 = vor.u32 %v1305_v63, %v1303_v22  ;;  %v1313_v18 = vshrl.u32 %v8325_v28, 16  ;;  %v1538_v5 = vrot.slane %v1536_v26, 1  ;;  %v1543_v30 = vrot.slane %v1541_v9, 1  ;;  %v8340_v13 = vld [vmem:[%s10320_s5 + $0xe8] sm:$0xff]   ;;  %v8343_v2 = vld [vmem:[%s10320_s5 + $0xf8] sm:$0xff]   ;;  %v8345_v10 = vld [vmem:[#allocation2 + $0x40] sm:$0xff]  }
  0xbb   : > { %7229 = vmatmul.mubr.bf16.gmra.mrb[8].mxu0 %v8309_v1  ;;  %v8314_v21 = vld [vmem:[#allocation2 + $0xbc] sm:$0xff]   ;;  %v1296_v4 = vsel %vm1276_vm1, %v1291_v32, %v1295_v46  ;;  %v1304_v0 = vsel %vm1276_vm1, %v1299_v62, %v1303_v22  ;;  %v1311_v8 = vrot.slane %v1309_v44, 1  ;;  %v1551_v37 = vrot.slane %v1549_v39, 1  ;;  %v8342_v6 = vld [vmem:[#allocation2 + $0xc4] ss:$0 sps:$4 sm:$0x11]  }
  0xbc   : > { %7232 = vmatprep.mubr.msk.bf16.mxu0 %vm8635_vm0, %v10374_v19  ;;  %v1539_v61 = vor.u32 %v1538_v5, %v1534_v31  ;;  %v1547_v1 = vor.u32 %v1545_v54, %v1543_v30  ;;  %v8339_v40 = vld [vmem:[#allocation2 + $0xbc] sm:$0xff]   ;;  %v1573_v46 = vshll.u32 %v8342_v6, 16  ;;  %v1791_v47 = vrot.slane %v8345_v10, 1  ;;  %v8362_v39 = vld [vmem:[#allocation2 + $0x14] sm:$0xff]   ;;  %v8368_v10 = vld [vmem:[%s10320_s5 + $0x168] sm:$0xff]  }
  0xbd   : > { %7249 = vmatpush3.bf16.msra.mxu0 %v8310_v53  ;;  %v8328_v52 = vld [vmem:[#allocation2 + $0x90] ss:$0 sps:$4 sm:$0x11]   ;;  %v1312_v7 = vsel %vm1276_vm1, %v1307_v36, %v1311_v8  ;;  %v1315_v51 = vor.u32 %v1313_v18, %v1311_v8  ;;  %v8337_v53 = vld [vmem:[#allocation2 + $0xb4] sm:$0xff]   ;;  %v1565_v23 = vshll.u32 %v8339_v40, 16  ;;  %v1569_v27 = vshrl.u32 %v8339_v40, 16 }
  0xbe   : > { %7250 = vmatprep.subr.bf16.mxu0 %v10374_v19  ;;  %v1317_v12 = vshll.u32 %v8328_v52, 16  ;;  %v1544_v25 = vsel %vm1276_vm1, %v1539_v61, %v1543_v30  ;;  %v1561_v49 = vshrl.u32 %v8337_v53, 16  ;;  %v8346_v28 = vld [vmem:[%s10320_s5 + $0x100] sm:$0xff]   ;;  %v8351_v8 = vld [vmem:[#allocation2 + $0x50] sm:$0xff]   ;;  %v8350_v52 = vld [vmem:[%s10320_s5 + $0x118] sm:$0xff]  }
  0xbf   : > { %v1567_v60 = vrot.slane %v1565_v23, 1  ;;  %v1795_v36 = vrot.slane %v8351_v8, 1  ;;  %v8355_v18 = vld [vmem:[%s10320_s5 + $0x130] sm:$0xff]   ;;  %v8356_v29 = vld [vmem:[#allocation2 + $0x60] ss:$0 sps:$4 sm:$0x11]  }
  0xc0   : > { %v1319_v38 = vrot.slane %v1317_v12, 1  ;;  %v8353_v12 = vld [vmem:[#allocation2 + $0x58] sm:$0xff]   ;;  %v1799_v9 = vrot.slane %v8356_v29, 1  ;;  %v8361_v40 = vld [vmem:[%s10320_s5 + $0x148] sm:$0xff]   ;;  %v8363_v23 = vld [vmem:[%s10320_s5 + $0x150] sm:$0xff]  }
  0xc1   : > { %7251 = vmatpush3.bf16.msra.mxu0 %v8312_v59  ;;  %v8335_v59 = vld [vmem:[%s10320_s5 + $0xd0] sm:$0xff]   ;;  %v1571_v32 = vor.u32 %v1569_v27, %v1567_v60  ;;  %v1797_v24 = vrot.slane %v8353_v12, 1  ;;  %v8357_v26 = vld [vmem:[%s10320_s5 + $0x138] sm:$0xff]  }
  0xc2   : > { %7252 = vmatprep.subr.bf16.mxu0 %v10374_v19  ;;  %v1320_v17 = vsel %vm1276_vm1, %v1315_v51, %v1319_v38  ;;  %v8359_v51 = vld [vmem:[#allocation2 + $0xc] sm:$0xff]  }
  0xc3   : > { %7233 = vmatmul.mubr.bf16.gmra.mrb[12].mxu0 %v8311_v35  ;;  %v1557_v35 = vshll.u32 %v8337_v53, 16  ;;  %v1798_v38 = vsel %vm1789_vm2, %v1795_v36, %v1797_v24  ;;  %v2023_v5 = vshrl.u32 %v8359_v51, 16  ;;  %v2026_v31 = vshll.u32 %v8359_v51, 16 }
  0xc4   : > { %7236 = vmatprep.mubr.msk.bf16.mxu0 %vm8635_vm0, %v10374_v19  ;;  %v1800_v61 = vsel %vm1789_vm2, %v1797_v24, %v1799_v9  ;;  %v2032_v53 = vshrl.u32 %v8362_v39, 16 }
  0xc5   : > { %7253 = vmatpush3.bf16.msra.mxu0 %v8313_v33  ;;  %v1552_v33 = vsel %vm1276_vm1, %v1547_v1, %v1551_v37  ;;  %v1559_v34 = vrot.slane %v1557_v35, 1  ;;  %v2035_v1 = vshll.u32 %v8362_v39, 16 }
  0xc6   : > { %7254 = vmatprep.subr.bf16.mxu0 %v10374_v19 }
  0xc9   : > { %7255 = vmatpush3.bf16.msra.mxu0 %v8315_v41  ;;  %v1553_v41 = vshrl.u32 %v8334_v45, 16 }
  0xca   : > { %7276 = vmatprep.subr.bf16.mxu0 %v10374_v19 }
  0xcb   : > { %7237 = vmatmul.mubr.bf16.gmra.mrb[16].mxu0 %v8314_v21  ;;  %v1555_v21 = vor.u32 %v1553_v41, %v1551_v37  ;;  %v2037_v41 = vrot.slane %v2035_v1, 2 }
  0xcc   : > { %7256 = vmatprep.mubr.msk.bf16.mxu0 %vm8635_vm0, %v10374_v19 }
  0xcd   : > { %v1560_v20 = vsel %vm1276_vm1, %v1555_v21, %v1559_v34 }
  0xd3   : > { %7257 = vmatmul.mubr.bf16.vlgmr.msra.gmra.mrb[0].mxu0 %v1288_v48  ;;  %v8341_v48 = vld [vmem:[%s10320_s5 + $0xf0] sm:$0xff]  }
  0xd4   : > { %7277 = vmatpush3.bf16.msra.mxu0 %v8318_v11  ;;  %7260 = vmatprep.mubr.msk.bf16.mxu0 %vm8635_vm0, %v10374_v19  ;;  %v1563_v11 = vor.u32 %v1561_v49, %v1559_v34  ;;  %v8365_v34 = vld [vmem:[#allocation2 + $0x1c] sm:$0xff]  }
  0xd5   : > { %7278 = vmatprep.subr.bf16.mxu0 %v10374_v19 }
  0xd8   : > { %7279 = vmatpush3.bf16.msra.mxu0 %v8319_v14  ;;  %v1568_v14 = vsel %vm1276_vm1, %v1563_v11, %v1567_v60  ;;  %v8367_v11 = vld [vmem:[#allocation2 + $0x24] sm:$0xff]  }
  0xd9   : > { %7280 = vmatprep.subr.bf16.mxu0 %v10374_v19  ;;  %v2053_v27 = vshll.u32 %v8367_v11, 16 }
  0xdb   : > { %7261 = vmatmul.mubr.bf16.gmra.mrb[4].mxu0 %v1296_v4 }
  0xdc   : > { %7281 = vmatpush3.bf16.msra.mxu0 %v8321_v42  ;;  %7264 = vmatprep.mubr.msk.bf16.mxu0 %vm8635_vm0, %v10374_v19  ;;  %v1575_v42 = vrot.slane %v1573_v46, 1  ;;  %v8366_v46 = vld [vmem:[%s10320_s5 + $0x160] sm:$0xff]  }
  0xdd   : > { %7282 = vmatprep.subr.bf16.mxu0 %v10374_v19 }
  0xde   : > { %v1576_v4 = vsel %vm1276_vm1, %v1571_v32, %v1575_v42  ;;  %v2055_v42 = vrot.slane %v2053_v27, 2  ;;  %v8385_v27 = vld [vmem:[%s10320_s5 + $0x1b8] sm:$0xff]  }
  0xe0   : > { %7283 = vmatpush3.bf16.msra.mxu0 %v8322_v43  ;;  %v8344_v43 = vld [vmem:[#allocation2 + $0x38] sm:$0xfe]  }
  0xe1   : > { %7284 = vmatprep.subr.bf16.mxu0 %v10374_v19  ;;  %v1790_v22 = vrot.slane %v8344_v43, 1 }
  0xe3   : > { %7265 = vmatmul.mubr.bf16.gmra.mrb[8].mxu0 %v1304_v0  ;;  %v1792_v62 = vsel %vm1789_vm2, %v1790_v22, %v1791_v47  ;;  %v8347_v0 = vld [vmem:[%s10320_s5 + $0x108] sm:$0xff]  }
  0xe4   : > { %7285 = vmatpush3.bf16.msra.mxu0 %v8324_v16  ;;  %7268 = vmatprep.mubr.msk.bf16.mxu0 %vm8635_vm0, %v10374_v19  ;;  %v8348_v16 = vld [vmem:[#allocation2 + $0x48] sm:$0xff]  }
  0xe5   : > { %7286 = vmatprep.subr.bf16.mxu0 %v10374_v19  ;;  %v1793_v44 = vrot.slane %v8348_v16, 1 }
  0xe7   : > { %v1794_v63 = vsel %vm1789_vm2, %v1791_v47, %v1793_v44 }
  0xe8   : > { %7287 = vmatpush3.bf16.msra.mxu0 %v8326_v50  ;;  %v8349_v50 = vld [vmem:[%s10320_s5 + $0x110] sm:$0xff]  }
  0xe9   : > { %7288 = vmatprep.subr.bf16.mxu0 %v10374_v19 }
  0xeb   : > { %7269 = vmatmul.mubr.bf16.gmra.mrb[12].mxu0 %v1312_v7  ;;  %v1796_v7 = vsel %vm1789_vm2, %v1793_v44, %v1795_v36  ;;  %v8373_v44 = vld [vmem:[#allocation2 + $0x40] sm:$0xff]  }
  0xec   : > { %7289 = vmatpush3.bf16.msra.mxu0 %v8327_v55  ;;  %7272 = vmatprep.mubr.msk.bf16.mxu0 %vm8635_vm0, %v10374_v19  ;;  %v8352_v55 = vld [vmem:[%s10320_s5 + $0x120] sm:$0xff]   ;;  %v2291_v36 = vshll.u32 %v8373_v44, 16 }
  0xed   : > { %7290 = vmatprep.subr.bf16.mxu0 %v10374_v19 }
  0xee   : > { %v2293_v24 = vrot.slane %v2291_v36, 2  ;;  %v8395_v36 = vld [vmem:[#allocation2 + $0xc0] sm:$0xff]  }
  0xf0   : > { %7291 = vmatpush3.bf16.msra.mxu0 %v8329_v57  ;;  %v8354_v57 = vld [vmem:[%s10320_s5 + $0x128] sm:$0xff]  }
  0xf1   : > { %7312 = vmatprep.subr.bf16.mxu0 %v10374_v19 }
  0xf3   : > { %7273 = vmatmul.mubr.bf16.gmra.mrb[16].mxu0 %v1320_v17  ;;  %v8358_v17 = vld [vmem:[#allocation2 + $0x4] sm:$0xfe]  }
  0xf4   : > { %7292 = vmatprep.mubr.msk.bf16.mxu0 %vm8635_vm0, %v10374_v19  ;;  %v2015_v30 = vshrl.u32 %v8358_v17, 16  ;;  %v2018_v45 = vshll.u32 %v8358_v17, 16 }
  0xf6   : > { %v2020_v54 = vrot.slane %v2018_v45, 2 }
  0xfb   : > { %7293 = vmatmul.mubr.bf16.vlgmr.msra.gmra.mrb[0].mxu0 %v1544_v25  ;;  %v2028_v25 = vrot.slane %v2026_v31, 2 }
  0xfc   : > { %7313 = vmatpush3.bf16.msra.mxu0 %v8332_v58  ;;  %7296 = vmatprep.mubr.msk.bf16.mxu0 %vm8635_vm0, %v10374_v19  ;;  %v2025_v58 = vrot.slane %v2023_v5, 1  ;;  %v8374_v5 = vld [vmem:[%s10320_s5 + $0x180] sm:$0xff]  }
  0xfd   : > { %7314 = vmatprep.subr.bf16.mxu0 %v10374_v19 }
  0xfe   : > { %v2029_v37 = vor.u32 %v2028_v25, %v2025_v58  ;;  %v8375_v58 = vld [vmem:[%s10320_s5 + $0x188] sm:$0xff]  }
 0x100   : > { %7315 = vmatpush3.bf16.msra.mxu0 %v8333_v56  ;;  %v2017_v56 = vrot.slane %v2015_v30, 1 }
 0x101   : > { %7316 = vmatprep.subr.bf16.mxu0 %v10374_v19 }
 0x103   : > { %7297 = vmatmul.mubr.bf16.gmra.mrb[4].mxu0 %v1552_v33  ;;  %v8360_v33 = vld [vmem:[%s10320_s5 + $0x140] sm:$0xff]  }
 0x104   : > { %7317 = vmatpush3.bf16.msra.mxu0 %v8335_v59  ;;  %7300 = vmatprep.mubr.msk.bf16.mxu0 %vm8635_vm0, %v10374_v19  ;;  %v2021_v59 = vor.u32 %v2020_v54, %v2017_v56  ;;  %v8377_v54 = vld [vmem:[%s10320_s5 + $0x190] sm:$0xff]  }
 0x105   : > { %7318 = vmatprep.subr.bf16.mxu0 %v10374_v19 }
 0x106   : > { %v2030_v35 = vsel %vm2013_vm3, %v2021_v59, %v2029_v37  ;;  %v8381_v59 = vld [vmem:[#allocation2 + $0x58] sm:$0xff]  }
 0x108   : > { %7319 = vmatpush3.bf16.msra.mxu0 %v8336_v15  ;;  %v2034_v15 = vrot.slane %v2032_v53, 1 }
 0x109   : > { %7320 = vmatprep.subr.bf16.mxu0 %v10374_v19 }
 0x10a   : > { %v2038_v21 = vor.u32 %v2037_v41, %v2034_v15  ;;  %v2315_v15 = vshrl.u32 %v8381_v59, 16  ;;  %v2318_v41 = vshll.u32 %v8381_v59, 16 }
 0x10b   : > { %7301 = vmatmul.mubr.bf16.gmra.mrb[8].mxu0 %v1560_v20  ;;  %v2044_v20 = vshll.u32 %v8365_v34, 16 }
 0x10c   : > { %7321 = vmatpush3.bf16.msra.mxu0 %v8338_v3  ;;  %7304 = vmatprep.mubr.msk.bf16.mxu0 %vm8635_vm0, %v10374_v19  ;;  %v2041_v3 = vshrl.u32 %v8365_v34, 16  ;;  %v8380_v34 = vld [vmem:[%s10320_s5 + $0x1a0] sm:$0xff]  }
 0x10d   : > { %7322 = vmatprep.subr.bf16.mxu0 %v10374_v19  ;;  %v2046_v60 = vrot.slane %v2044_v20, 2  ;;  %v8384_v20 = vld [vmem:[#allocation2 + $0x60] ss:$0 sps:$4 sm:$0x33]  }
 0x10e   : > { %v2043_v49 = vrot.slane %v2041_v3, 1  ;;  %v2320_v3 = vrot.slane %v2318_v41, 2 }
 0x110   : > { %7323 = vmatpush3.bf16.msra.mxu0 %v8340_v13  ;;  %v2039_v13 = vsel %vm2013_vm3, %v2029_v37, %v2038_v21  ;;  %v2047_v6 = vor.u32 %v2046_v60, %v2043_v49  ;;  %v2324_v49 = vshrl.u32 %v8384_v20, 16  ;;  %v2327_v60 = vshll.u32 %v8384_v20, 16 }
 0x111   : > { %7324 = vmatprep.subr.bf16.mxu0 %v10374_v19 }
 0x113   : > { %7305 = vmatmul.mubr.bf16.gmra.mrb[12].mxu0 %v1568_v14  ;;  %v2050_v14 = vshrl.u32 %v8367_v11, 16  ;;  %v8383_v11 = vld [vmem:[%s10320_s5 + $0x1b0] sm:$0xff]  }
 0x114   : > { %7325 = vmatpush3.bf16.msra.mxu0 %v8341_v48  ;;  %7308 = vmatprep.mubr.msk.bf16.mxu0 %vm8635_vm0, %v10374_v19  ;;  %v8364_v48 = vld [vmem:[%s10320_s5 + $0x158] sm:$0xff]  }
 0x115   : > { %7326 = vmatprep.subr.bf16.mxu0 %v10374_v19  ;;  %v2052_v32 = vrot.slane %v2050_v14, 1  ;;  %v2329_v14 = vrot.slane %v2327_v60, 2 }
 0x117   : > { %v2056_v43 = vor.u32 %v2055_v42, %v2052_v32  ;;  %v8387_v32 = vld [vmem:[#allocation2 + $0xa8] sm:$0xff]   ;;  %v8386_v42 = vld [vmem:[#allocation2 + $0xa0] sm:$0xfe]  }
 0x118   : > { %7327 = vmatpush3.bf16.msra.mxu0 %v8343_v2  ;;  %v2048_v2 = vsel %vm2013_vm3, %v2038_v21, %v2047_v6  ;;  %v2317_v21 = vrot.slane %v2315_v15, 1  ;;  %v8403_v15 = vld [vmem:[%s10320_s5 + $0x208] sm:$0xff]  }
 0x119   : > { %7348 = vmatprep.subr.bf16.mxu0 %v10374_v19 }
 0x11b   : > { %7309 = vmatmul.mubr.bf16.gmra.mrb[16].mxu0 %v1576_v4  ;;  %v8370_v4 = vld [vmem:[#allocation2 + $0x2c] ss:$0 sps:$4 sm:$0x33]  }
 0x11c   : > { %7328 = vmatprep.mubr.msk.bf16.mxu0 %vm8635_vm0, %v10374_v19  ;;  %v2059_v47 = vshrl.u32 %v8370_v4, 16  ;;  %v2062_v22 = vshll.u32 %v8370_v4, 16  ;;  %v2545_v4 = vrot.slane %v8387_v32, 1  ;;  %v8410_v32 = vld [vmem:[%s10320_s5 + $0x228] sm:$0xff]  }
 0x11e   : > { %v2061_v16 = vrot.slane %v2059_v47, 1 }
 0x123   : > { %7329 = vmatmul.mubr.bf16.vlgmr.msra.gmra.mrb[0].mxu0 %v1792_v62  ;;  %v2057_v62 = vsel %vm2013_vm3, %v2047_v6, %v2056_v43  ;;  %v2326_v6 = vrot.slane %v2324_v49, 1  ;;  %v8406_v49 = vld [vmem:[%s10320_s5 + $0x218] sm:$0xff]  }
 0x124   : > { %7349 = vmatpush3.bf16.msra.mxu0 %v8346_v28  ;;  %7332 = vmatprep.mubr.msk.bf16.mxu0 %vm8635_vm0, %v10374_v19  ;;  %v8369_v28 = vld [vmem:[%s10320_s5 + $0x170] sm:$0xff]  }
 0x125   : > { %7350 = vmatprep.subr.bf16.mxu0 %v10374_v19 }
 0x128   : > { %7351 = vmatpush3.bf16.msra.mxu0 %v8347_v0  ;;  %v2064_v0 = vrot.slane %v2062_v22, 2  ;;  %v8390_v22 = vld [vmem:[#allocation2 + $0xb0] sm:$0xff]  }
 0x129   : > { %7352 = vmatprep.subr.bf16.mxu0 %v10374_v19 }
 0x12a   : > { %v2065_v8 = vor.u32 %v2064_v0, %v2061_v16  ;;  %v8391_v16 = vld [vmem:[%s10320_s5 + $0x1d0] sm:$0xff]  }
 0x12b   : > { %7333 = vmatmul.mubr.bf16.gmra.mrb[4].mxu0 %v1794_v63  ;;  %v8372_v63 = vld [vmem:[#allocation2 + $0x38] sm:$0xfe]  }
 0x12c   : > { %7353 = vmatpush3.bf16.msra.mxu0 %v8349_v50  ;;  %7336 = vmatprep.mubr.msk.bf16.mxu0 %vm8635_vm0, %v10374_v19  ;;  %v8371_v50 = vld [vmem:[%s10320_s5 + $0x178] sm:$0xff]   ;;  %v2066_v12 = vsel %vm2013_vm3, %v2056_v43, %v2065_v8  ;;  %v8388_v43 = vld [vmem:[%s10320_s5 + $0x1c0] sm:$0xff]  }
 0x12d   : > { %7354 = vmatprep.subr.bf16.mxu0 %v10374_v19  ;;  %v8394_v8 = vld [vmem:[%s10320_s5 + $0x1e0] sm:$0xff]  }
 0x130   : > { %7355 = vmatpush3.bf16.msra.mxu0 %v8350_v52  ;;  %v2288_v52 = vshrl.u32 %v8373_v44, 16  ;;  %v8393_v44 = vld [vmem:[#allocation2 + $0xb8] sm:$0xff]  }
 0x131   : > { %7356 = vmatprep.subr.bf16.mxu0 %v10374_v19 }
 0x133   : > { %7337 = vmatmul.mubr.bf16.gmra.mrb[8].mxu0 %v1796_v7  ;;  %v2283_v7 = vshll.u32 %v8372_v63, 16 }
 0x134   : > { %7357 = vmatpush3.bf16.msra.mxu0 %v8352_v55  ;;  %7340 = vmatprep.mubr.msk.bf16.mxu0 %vm8635_vm0, %v10374_v19  ;;  %v2280_v55 = vshrl.u32 %v8372_v63, 16  ;;  %v2549_v63 = vrot.slane %v8393_v44, 1 }
 0x135   : > { %7358 = vmatprep.subr.bf16.mxu0 %v10374_v19  ;;  %v2285_v29 = vrot.slane %v2283_v7, 2  ;;  %v2551_v7 = vrot.slane %v8395_v36, 1 }
 0x138   : > { %7359 = vmatpush3.bf16.msra.mxu0 %v8354_v57  ;;  %v2290_v57 = vrot.slane %v2288_v52, 1 }
 0x139   : > { %7360 = vmatprep.subr.bf16.mxu0 %v10374_v19 }
 0x13a   : > { %v2294_v51 = vor.u32 %v2293_v24, %v2290_v57  ;;  %v2552_v57 = vsel %vm1789_vm2, %v2549_v63, %v2551_v7  ;;  %v8398_v24 = vld [vmem:[#allocation2 + $0xc8] ss:$0 sps:$4 sm:$0x11]  }
 0x13b   : > { %7341 = vmatmul.mubr.bf16.gmra.mrb[12].mxu0 %v1798_v38  ;;  %v2282_v38 = vrot.slane %v2280_v55, 1  ;;  %v8396_v55 = vld [vmem:[%s10320_s5 + $0x1e8] sm:$0xff]  }
 0x13c   : > { %7361 = vmatpush3.bf16.msra.mxu0 %v8355_v18  ;;  %7344 = vmatprep.mubr.msk.bf16.mxu0 %vm8635_vm0, %v10374_v19  ;;  %v8376_v18 = vld [vmem:[#allocation2 + $0x48] sm:$0xff]  }
 0x13d   : > { %7362 = vmatprep.subr.bf16.mxu0 %v10374_v19  ;;  %v2300_v17 = vshll.u32 %v8376_v18, 16  ;;  %v2286_v9 = vor.u32 %v2285_v29, %v2282_v38  ;;  %v8399_v38 = vld [vmem:[%s10320_s5 + $0x1f8] sm:$0xff]   ;;  %v8400_v29 = vld [vmem:[#allocation2 + $0x6c] sm:$0xfe]  }
 0x13f   : > { %v2295_v31 = vsel %vm2013_vm3, %v2286_v9, %v2294_v51  ;;  %v2302_v45 = vrot.slane %v2300_v17, 2  ;;  %v2768_v9 = vshrl.u32 %v8400_v29, 16 }
 0x140   : > { %7363 = vmatpush3.bf16.msra.mxu0 %v8357_v26  ;;  %v2297_v26 = vshrl.u32 %v8376_v18, 16  ;;  %v8401_v18 = vld [vmem:[#allocation2 + $0x74] sm:$0xff]  }
 0x141   : > { %7384 = vmatprep.subr.bf16.mxu0 %v10374_v19  ;;  %v2779_v17 = vshll.u32 %v8401_v18, 16 }
 0x142   : > { %v2299_v30 = vrot.slane %v2297_v26, 1  ;;  %v2776_v26 = vshrl.u32 %v8401_v18, 16 }
 0x143   : > { %7345 = vmatmul.mubr.bf16.gmra.mrb[16].mxu0 %v1800_v61  ;;  %v8379_v61 = vld [vmem:[#allocation2 + $0x50] sm:$0xff]  }
 0x144   : > { %7364 = vmatprep.mubr.msk.bf16.mxu0 %vm8635_vm0, %v10374_v19  ;;  %v2303_v25 = vor.u32 %v2302_v45, %v2299_v30  ;;  %v2306_v39 = vshrl.u32 %v8379_v61, 16  ;;  %v2309_v56 = vshll.u32 %v8379_v61, 16  ;;  %v2778_v30 = vrot.slane %v2776_v26, 1  ;;  %v8404_v61 = vld [vmem:[#allocation2 + $0x7c] sm:$0xff]  }
 0x145   : > { %v2781_v45 = vrot.slane %v2779_v17, 2  ;;  %v8417_v26 = vld [vmem:[%s10324_s9] sm:$0xff]  }
 0x146   : > { %v2304_v37 = vsel %vm2013_vm3, %v2294_v51, %v2303_v25  ;;  %v2308_v53 = vrot.slane %v2306_v39, 1  ;;  %v2311_v1 = vrot.slane %v2309_v56, 2  ;;  %v2553_v51 = vrot.slane %v8398_v24, 1 }
 0x147   : > { %v2782_v39 = vor.u32 %v2781_v45, %v2778_v30  ;;  %v2785_v56 = vshrl.u32 %v8404_v61, 16  ;;  %v8418_v30 = vld [vmem:[%s10324_s9 + $0x8] sm:$0xff]  }
 0x149   : > { %v2787_v59 = vrot.slane %v2785_v56, 1 }
 0x14b   : > { %7365 = vmatmul.mubr.bf16.vlgmr.msra.gmra.mrb[0].mxu0 %v2030_v35  ;;  %v2312_v35 = vor.u32 %v2311_v1, %v2308_v53  ;;  %v8402_v53 = vld [vmem:[%s10320_s5 + $0x200] sm:$0xff]  }
 0x14c   : > { %7385 = vmatpush3.bf16.msra.mxu0 %v8360_v33  ;;  %7368 = vmatprep.mubr.msk.bf16.mxu0 %vm8635_vm0, %v10374_v19  ;;  %v8378_v33 = vld [vmem:[%s10320_s5 + $0x198] sm:$0xff]  }
 0x14d   : > { %7386 = vmatprep.subr.bf16.mxu0 %v10374_v19 }
 0x150   : > { %7387 = vmatpush3.bf16.msra.mxu0 %v8361_v40  ;;  %v2313_v40 = vsel %vm2013_vm3, %v2303_v25, %v2312_v35 }
 0x151   : > { %7388 = vmatprep.subr.bf16.mxu0 %v10374_v19 }
 0x153   : > { %7369 = vmatmul.mubr.bf16.gmra.mrb[4].mxu0 %v2039_v13  ;;  %v2321_v13 = vor.u32 %v2320_v3, %v2317_v21  ;;  %v8405_v21 = vld [vmem:[%s10320_s5 + $0x210] sm:$0xff]  }
 0x154   : > { %7389 = vmatpush3.bf16.msra.mxu0 %v8363_v23  ;;  %7372 = vmatprep.mubr.msk.bf16.mxu0 %vm8635_vm0, %v10374_v19  ;;  %v8382_v23 = vld [vmem:[%s10320_s5 + $0x1a8] sm:$0xff]  }
 0x155   : > { %7390 = vmatprep.subr.bf16.mxu0 %v10374_v19 }
 0x158   : > { %7391 = vmatpush3.bf16.msra.mxu0 %v8364_v48  ;;  %v2322_v48 = vsel %vm2013_vm3, %v2312_v35, %v2321_v13  ;;  %v8407_v35 = vld [vmem:[#allocation2 + $0x84] sm:$0xff]  }
 0x159   : > { %7392 = vmatprep.subr.bf16.mxu0 %v10374_v19 }
 0x15b   : > { %7373 = vmatmul.mubr.bf16.gmra.mrb[8].mxu0 %v2048_v2 }
 0x15c   : > { %7393 = vmatpush3.bf16.msra.mxu0 %v8366_v46  ;;  %7376 = vmatprep.mubr.msk.bf16.mxu0 %vm8635_vm0, %v10374_v19  ;;  %v2330_v46 = vor.u32 %v2329_v14, %v2326_v6  ;;  %v8408_v6 = vld [vmem:[%s10320_s5 + $0x220] sm:$0xff]  }
 0x15d   : > { %7394 = vmatprep.subr.bf16.mxu0 %v10374_v19 }
 0x15e   : > { %v2331_v2 = vsel %vm2013_vm3, %v2321_v13, %v2330_v46  ;;  %v8409_v13 = vld [vmem:[#allocation2 + $0x8c] sm:$0xff]  }
 0x160   : > { %7395 = vmatpush3.bf16.msra.mxu0 %v8368_v10  ;;  %v2544_v10 = vrot.slane %v8386_v42, 1 }
 0x161   : > { %7396 = vmatprep.subr.bf16.mxu0 %v10374_v19 }
 0x162   : > { %v2546_v47 = vsel %vm1789_vm2, %v2544_v10, %v2545_v4 }
 0x163   : > { %7377 = vmatmul.mubr.bf16.gmra.mrb[12].mxu0 %v2057_v62  ;;  %v2547_v62 = vrot.slane %v8390_v22, 1 }
 0x164   : > { %7397 = vmatpush3.bf16.msra.mxu0 %v8369_v28  ;;  %7380 = vmatprep.mubr.msk.bf16.mxu0 %vm8635_vm0, %v10374_v19  ;;  %v8389_v28 = vld [vmem:[%s10320_s5 + $0x1c8] sm:$0xff]  }
 0x165   : > { %7398 = vmatprep.subr.bf16.mxu0 %v10374_v19  ;;  %v2548_v0 = vsel %vm1789_vm2, %v2545_v4, %v2547_v62  ;;  %v2550_v52 = vsel %vm1789_vm2, %v2547_v62, %v2549_v63  ;;  %v8415_v62 = vld [vmem:[#allocation2 + $0xa8] sm:$0xff]  }
 0x166   : > { %v3044_v63 = vshll.u32 %v8415_v62, 16 }
 0x168   : > { %7399 = vmatpush3.bf16.msra.mxu0 %v8371_v50  ;;  %v8392_v50 = vld [vmem:[%s10320_s5 + $0x1d8] sm:$0xff]  }
 0x169   : > { %7420 = vmatprep.subr.bf16.mxu0 %v10374_v19 }
 0x16b   : > { %7381 = vmatmul.mubr.bf16.gmra.mrb[16].mxu0 %v2066_v12  ;;  %v8397_v12 = vld [vmem:[%s10320_s5 + $0x1f0] sm:$0xff]  }
 0x16c   : > { %7400 = vmatprep.mubr.msk.bf16.mxu0 %vm8635_vm0, %v10374_v19 }
 0x173   : > { %7401 = vmatmul.mubr.bf16.vlgmr.msra.gmra.mrb[0].mxu0 %v2295_v31  ;;  %v2554_v31 = vsel %vm1789_vm2, %v2551_v7, %v2553_v51  ;;  %v3046_v7 = vrot.slane %v3044_v63, 2 }
 0x174   : > { %7421 = vmatpush3.bf16.msra.mxu0 %v8374_v5  ;;  %7404 = vmatprep.mubr.msk.bf16.mxu0 %vm8635_vm0, %v10374_v19  ;;  %v2771_v5 = vshll.u32 %v8400_v29, 16 }
 0x175   : > { %7422 = vmatprep.subr.bf16.mxu0 %v10374_v19 }
 0x176   : > { %v2773_v25 = vrot.slane %v2771_v5, 2 }
 0x178   : > { %7423 = vmatpush3.bf16.msra.mxu0 %v8375_v58  ;;  %v2770_v58 = vrot.slane %v2768_v9, 1 }
 0x179   : > { %7424 = vmatprep.subr.bf16.mxu0 %v10374_v19 }
 0x17b   : > { %7405 = vmatmul.mubr.bf16.gmra.mrb[4].mxu0 %v2304_v37  ;;  %v2774_v37 = vor.u32 %v2773_v25, %v2770_v58  ;;  %v8420_v25 = vld [vmem:[%s10324_s9 + $0x10] sm:$0xff]  }
 0x17c   : > { %7425 = vmatpush3.bf16.msra.mxu0 %v8377_v54  ;;  %7408 = vmatprep.mubr.msk.bf16.mxu0 %vm8635_vm0, %v10374_v19  ;;  %v2788_v54 = vshll.u32 %v8404_v61, 16 }
 0x17d   : > { %7426 = vmatprep.subr.bf16.mxu0 %v10374_v19  ;;  %v2783_v1 = vsel %vm2013_vm3, %v2774_v37, %v2782_v39  ;;  %v8422_v37 = vld [vmem:[#allocation2 + $0xc0] sm:$0xff]  }
 0x180   : > { %7427 = vmatpush3.bf16.msra.mxu0 %v8378_v33  ;;  %v2790_v33 = vrot.slane %v2788_v54, 2 }
 0x181   : > { %7428 = vmatprep.subr.bf16.mxu0 %v10374_v19 }
 0x182   : > { %v2791_v41 = vor.u32 %v2790_v33, %v2787_v59  ;;  %v3068_v59 = vshrl.u32 %v8422_v37, 16  ;;  %v3071_v33 = vshll.u32 %v8422_v37, 16 }
 0x183   : > { %7409 = vmatmul.mubr.bf16.gmra.mrb[8].mxu0 %v2313_v40  ;;  %v2797_v40 = vshll.u32 %v8407_v35, 16 }
 0x184   : > { %7429 = vmatpush3.bf16.msra.mxu0 %v8380_v34  ;;  %7412 = vmatprep.mubr.msk.bf16.mxu0 %vm8635_vm0, %v10374_v19  ;;  %v2794_v34 = vshrl.u32 %v8407_v35, 16  ;;  %v2792_v3 = vsel %vm2013_vm3, %v2782_v39, %v2791_v41  ;;  %v8423_v35 = vld [vmem:[%s10324_s9 + $0x20] sm:$0xff]  }
 0x185   : > { %7430 = vmatprep.subr.bf16.mxu0 %v10374_v19 }
 0x186   : > { %v2796_v20 = vrot.slane %v2794_v34, 1  ;;  %v3073_v34 = vrot.slane %v3071_v33, 2 }
 0x188   : > { %7431 = vmatpush3.bf16.msra.mxu0 %v8382_v23  ;;  %v2799_v23 = vrot.slane %v2797_v40, 2  ;;  %v8425_v40 = vld [vmem:[#allocation2 + $0xc8] ss:$0 sps:$4 sm:$0x33]  }
 0x189   : > { %7432 = vmatprep.subr.bf16.mxu0 %v10374_v19 }
 0x18a   : > { %v2800_v60 = vor.u32 %v2799_v23, %v2796_v20  ;;  %v3077_v20 = vshrl.u32 %v8425_v40, 16  ;;  %v3080_v23 = vshll.u32 %v8425_v40, 16 }
 0x18b   : > { %7413 = vmatmul.mubr.bf16.gmra.mrb[12].mxu0 %v2322_v48  ;;  %v2806_v48 = vshll.u32 %v8409_v13, 16 }
 0x18c   : > { %7433 = vmatpush3.bf16.msra.mxu0 %v8383_v11  ;;  %7416 = vmatprep.mubr.msk.bf16.mxu0 %vm8635_vm0, %v10374_v19  ;;  %v2803_v11 = vshrl.u32 %v8409_v13, 16  ;;  %v2801_v14 = vsel %vm2013_vm3, %v2791_v41, %v2800_v60  ;;  %v3070_v41 = vrot.slane %v3068_v59, 1  ;;  %v8426_v13 = vld [vmem:[%s10324_s9 + $0x30] sm:$0xff]   ;;  %v3308_v59 = vpop.permute.xlu1 %3307 }
 0x18d   : > { %7434 = vmatprep.subr.bf16.mxu0 %v10374_v19  ;;  %v2808_v46 = vrot.slane %v2806_v48, 2  ;;  %v8429_v48 = vld [vmem:[#allocation2 + $0xc] sm:$0xff]  }
 0x190   : > { %7435 = vmatpush3.bf16.msra.mxu0 %v8385_v27  ;;  %v2805_v27 = vrot.slane %v2803_v11, 1  ;;  %v3082_v11 = vrot.slane %v3080_v23, 2 }
 0x191   : > { %7456 = vmatprep.subr.bf16.mxu0 %v10374_v19 }
 0x192   : > { %v2809_v42 = vor.u32 %v2808_v46, %v2805_v27  ;;  %v5701_v46 = vshrl.u32 %v8429_v48, 16 }
 0x193   : > { %7417 = vmatmul.mubr.bf16.gmra.mrb[16].mxu0 %v2331_v2  ;;  %v8412_v2 = vld [vmem:[#allocation2 + $0x94] ss:$0 sps:$4 sm:$0x33]  }
 0x194   : > { %7436 = vmatprep.mubr.msk.bf16.mxu0 %vm8635_vm0, %v10374_v19  ;;  %v2812_v4 = vshrl.u32 %v8412_v2, 16  ;;  %v2815_v10 = vshll.u32 %v8412_v2, 16  ;;  %v5704_v2 = vshll.u32 %v8429_v48, 16 }
 0x196   : > { %v2814_v22 = vrot.slane %v2812_v4, 1 }
 0x19b   : > { %7437 = vmatmul.mubr.bf16.vlgmr.msra.gmra.mrb[0].mxu0 %v2546_v47  ;;  %v2810_v47 = vsel %vm2013_vm3, %v2800_v60, %v2809_v42  ;;  %v3079_v60 = vrot.slane %v3077_v20, 1 }
 0x19c   : > { %7457 = vmatpush3.bf16.msra.mxu0 %v8388_v43  ;;  %7440 = vmatprep.mubr.msk.bf16.mxu0 %vm8635_vm0, %v10374_v19  ;;  %v8411_v43 = vld [vmem:[%s10320_s5 + $0x230] sm:$0xff]  }
 0x19d   : > { %7458 = vmatprep.subr.bf16.mxu0 %v10374_v19  ;;  %v3083_v27 = vor.u32 %v3082_v11, %v3079_v60 }
 0x1a0   : > { %7459 = vmatpush3.bf16.msra.mxu0 %v8389_v28  ;;  %v2817_v28 = vrot.slane %v2815_v10, 2  ;;  %v5703_v10 = vrot.slane %v5701_v46, 1 }
 0x1a1   : > { %7460 = vmatprep.subr.bf16.mxu0 %v10374_v19 }
 0x1a2   : > { %v2818_v44 = vor.u32 %v2817_v28, %v2814_v22 }
 0x1a3   : > { %7441 = vmatmul.mubr.bf16.gmra.mrb[4].mxu0 %v2548_v0  ;;  %v8414_v0 = vld [vmem:[#allocation2 + $0xa0] sm:$0xfe]  }
 0x1a4   : > { %7461 = vmatpush3.bf16.msra.mxu0 %v8391_v16  ;;  %7444 = vmatprep.mubr.msk.bf16.mxu0 %vm8635_vm0, %v10374_v19  ;;  %v8413_v16 = vld [vmem:[%s10320_s5 + $0x238] sm:$0xff]   ;;  %v2819_v36 = vsel %vm2013_vm3, %v2809_v42, %v2818_v44 }
 0x1a5   : > { %7462 = vmatprep.subr.bf16.mxu0 %v10374_v19 }
 0x1a8   : > { %7463 = vmatpush3.bf16.msra.mxu0 %v8392_v50  ;;  %v3041_v50 = vshrl.u32 %v8415_v62, 16 }
 0x1a9   : > { %7464 = vmatprep.subr.bf16.mxu0 %v10374_v19 }
 0x1ab   : > { %7445 = vmatmul.mubr.bf16.gmra.mrb[8].mxu0 %v2550_v52  ;;  %v3036_v52 = vshll.u32 %v8414_v0, 16 }
 0x1ac   : > { %7465 = vmatpush3.bf16.msra.mxu0 %v8394_v8  ;;  %7448 = vmatprep.mubr.msk.bf16.mxu0 %vm8635_vm0, %v10374_v19  ;;  %v3033_v8 = vshrl.u32 %v8414_v0, 16 }
 0x1ad   : > { %7466 = vmatprep.subr.bf16.mxu0 %v10374_v19  ;;  %v3038_v24 = vrot.slane %v3036_v52, 2 }
 0x1b0   : > { %7467 = vmatpush3.bf16.msra.mxu0 %v8396_v55  ;;  %v3043_v55 = vrot.slane %v3041_v50, 1 }
 0x1b1   : > { %7468 = vmatprep.subr.bf16.mxu0 %v10374_v19 }
 0x1b2   : > { %v3047_v18 = vor.u32 %v3046_v7, %v3043_v55  ;;  %v8431_v55 = vld [vmem:[%s10323_s8] sm:$0xff]   ;;  %v8432_v7 = vld [vmem:[%s10323_s8 + $0x8] sm:$0xff]  }
 0x1b3   : > { %7449 = vmatmul.mubr.bf16.gmra.mrb[12].mxu0 %v2552_v57  ;;  %v3035_v57 = vrot.slane %v3033_v8, 1  ;;  %7529 = vmatpush3.bf16.msra.mxu1 %v8431_v55 }
 0x1b4   : > { %7469 = vmatpush3.bf16.msra.mxu0 %v8397_v12  ;;  %7452 = vmatprep.mubr.msk.bf16.mxu0 %vm8635_vm0, %v10374_v19  ;;  %v8416_v12 = vld [vmem:[#allocation2 + $0xb0] sm:$0xff]  }
 0x1b5   : > { %7470 = vmatprep.subr.bf16.mxu0 %v10374_v19  ;;  %v3053_v29 = vshll.u32 %v8416_v12, 16  ;;  %v3039_v51 = vor.u32 %v3038_v24, %v3035_v57  ;;  %7530 = vmatprep.subr.bf16.mxu1 %v10374_v19  ;;  %v8434_v57 = vld [vmem:[%s10323_s8 + $0x18] sm:$0xff]   ;;  %v8435_v24 = vld [vmem:[%s10323_s8 + $0x20] sm:$0xff]  }
 0x1b7   : > { %v3048_v17 = vsel %vm2013_vm3, %v3039_v51, %v3047_v18  ;;  %v3055_v5 = vrot.slane %v3053_v29, 2  ;;  %7531 = vmatpush3.bf16.msra.mxu1 %v8432_v7  ;;  %v8438_v29 = vld [vmem:[%s10323_s8 + $0x38] sm:$0xff]   ;;  %v3369_v51 = vld [vmem:[#allocation3 + $0x4] sm:$0x3] }
 0x1b8   : > { %7471 = vmatpush3.bf16.msra.mxu0 %v8399_v38  ;;  %v3050_v38 = vshrl.u32 %v8416_v12, 16  ;;  %v8433_v12 = vld [vmem:[%s10323_s8 + $0x10] sm:$0xff]   ;;  %7532 = vmatprep.subr.bf16.mxu1 %v10374_v19 }
 0x1b9   : > { %7492 = vmatprep.subr.bf16.mxu0 %v10374_v19 }
 0x1ba   : > { %v3052_v9 = vrot.slane %v3050_v38, 1  ;;  %v8437_v38 = vld [vmem:[%s10323_s8 + $0x30] sm:$0xff]  }
 0x1bb   : > { %7453 = vmatmul.mubr.bf16.gmra.mrb[16].mxu0 %v2554_v31  ;;  %v8419_v31 = vld [vmem:[#allocation2 + $0xb8] sm:$0xff]   ;;  %7533 = vmatpush3.bf16.msra.mxu1 %v8433_v12 }
 0x1bc   : > { %7472 = vmatprep.mubr.msk.bf16.mxu0 %vm8635_vm0, %v10374_v19  ;;  %v3056_v45 = vor.u32 %v3055_v5, %v3052_v9  ;;  %v3059_v61 = vshrl.u32 %v8419_v31, 16  ;;  %v3062_v58 = vshll.u32 %v8419_v31, 16  ;;  %7534 = vmatprep.subr.bf16.mxu1 %v10374_v19  ;;  %v3370_v9 = vsel %vm9743_vm7, 0, %v3369_v51 }
 0x1bd   : > { %3371 = vst [vmem:[#allocation3 + $0x4] sm:$0x3] %v3370_v9 }
 0x1be   : > { %v3057_v39 = vsel %vm2013_vm3, %v3047_v18, %v3056_v45  ;;  %v3061_v56 = vrot.slane %v3059_v61, 1  ;;  %v3064_v54 = vrot.slane %v3062_v58, 2  ;;  %v8436_v18 = vld [vmem:[%s10323_s8 + $0x28] sm:$0xff]   ;;  %v9763_v61 = vld [vmem:[%s10322_s7] ss:$0 sm:$0xff] }
 0x1bf   : > { %7535 = vmatpush3.bf16.msra.mxu1 %v8434_v57 }
 0x1c0   : > { %7536 = vmatprep.subr.bf16.mxu1 %v10374_v19 }
 0x1c3   : > { %7473 = vmatmul.mubr.bf16.vlgmr.msra.gmra.mrb[0].mxu0 %v2783_v1  ;;  %v3065_v1 = vor.u32 %v3064_v54, %v3061_v56  ;;  %7537 = vmatpush3.bf16.msra.mxu1 %v8435_v24 }
 0x1c4   : > { %7493 = vmatpush3.bf16.msra.mxu0 %v8402_v53  ;;  %7476 = vmatprep.mubr.msk.bf16.mxu0 %vm8635_vm0, %v10374_v19  ;;  %v8421_v53 = vld [vmem:[%s10324_s9 + $0x18] sm:$0xff]  }
 0x1c5   : > { %7494 = vmatprep.subr.bf16.mxu0 %v10374_v19  ;;  %7538 = vmatprep.subr.bf16.mxu1 %v10374_v19 }
 0x1c7   : > { %7539 = vmatpush3.bf16.msra.mxu1 %v8436_v18 }
 0x1c8   : > { %7495 = vmatpush3.bf16.msra.mxu0 %v8403_v15  ;;  %v3066_v15 = vsel %vm2013_vm3, %v3056_v45, %v3065_v1  ;;  %7540 = vmatprep.subr.bf16.mxu1 %v10374_v19 }
 0x1c9   : > { %7496 = vmatprep.subr.bf16.mxu0 %v10374_v19 }
 0x1cb   : > { %7477 = vmatmul.mubr.bf16.gmra.mrb[4].mxu0 %v2792_v3  ;;  %v3074_v3 = vor.u32 %v3073_v34, %v3070_v41  ;;  %7541 = vmatpush3.bf16.msra.mxu1 %v8437_v38 }
 0x1cc   : > { %7497 = vmatpush3.bf16.msra.mxu0 %v8405_v21  ;;  %7480 = vmatprep.mubr.msk.bf16.mxu0 %vm8635_vm0, %v10374_v19  ;;  %v8424_v21 = vld [vmem:[%s10324_s9 + $0x28] sm:$0xff]  }
 0x1cd   : > { %7498 = vmatprep.subr.bf16.mxu0 %v10374_v19  ;;  %v3084_v4 = vsel %vm2013_vm3, %v3074_v3, %v3083_v27  ;;  %7542 = vmatprep.subr.bf16.mxu1 %v10374_v19 }
 0x1cf   : > { %7543 = vmatpush3.bf16.msra.mxu1 %v8438_v29 }
 0x1d0   : > { %7499 = vmatpush3.bf16.msra.mxu0 %v8406_v49  ;;  %v3075_v49 = vsel %vm2013_vm3, %v3065_v1, %v3074_v3  ;;  %7564 = vmatprep.subr.bf16.mxu1 %v10374_v19 }
 0x1d1   : > { %7500 = vmatprep.subr.bf16.mxu0 %v10374_v19 }
 0x1d3   : > { %7481 = vmatmul.mubr.bf16.gmra.mrb[8].mxu0 %v2801_v14  ;;  %v8428_v14 = vld [vmem:[#allocation2 + $0x4] sm:$0xfe]  }
 0x1d4   : > { %7501 = vmatpush3.bf16.msra.mxu0 %v8408_v6  ;;  %7484 = vmatprep.mubr.msk.bf16.mxu0 %vm8635_vm0, %v10374_v19  ;;  %v8427_v6 = vld [vmem:[%s10324_s9 + $0x38] sm:$0xff]   ;;  %v5696_v42 = vshll.u32 %v8428_v14, 16 }
 0x1d5   : > { %7502 = vmatprep.subr.bf16.mxu0 %v10374_v19 }
 0x1d6   : > { %v5698_v28 = vrot.slane %v5696_v42, 2  ;;  %v3521_v42 = vld [vmem:[#allocation3 + $0x4] sm:$0xe] }
 0x1d8   : > { %7503 = vmatpush3.bf16.msra.mxu0 %v8410_v32  ;;  %v5693_v32 = vshrl.u32 %v8428_v14, 16 }
 0x1d9   : > { %7504 = vmatprep.subr.bf16.mxu0 %v10374_v19 }
 0x1da   : > { %v5695_v22 = vrot.slane %v5693_v32, 1 }
 0x1db   : > { %7485 = vmatmul.mubr.bf16.gmra.mrb[12].mxu0 %v2810_v47  ;;  %v8430_v47 = vld [vmem:[#allocation2 + $0x14] sm:$0xff]  }
 0x1dc   : > { %7505 = vmatpush3.bf16.msra.mxu0 %v8411_v43  ;;  %7488 = vmatprep.mubr.msk.bf16.mxu0 %vm8635_vm0, %v10374_v19  ;;  %v5706_v43 = vrot.slane %v5704_v2, 2  ;;  %v5713_v0 = vshll.u32 %v8430_v47, 16  ;;  %v5699_v44 = vor.u32 %v5698_v28, %v5695_v22 }
 0x1dd   : > { %7506 = vmatprep.subr.bf16.mxu0 %v10374_v19 }
 0x1de   : > { %v5707_v62 = vor.u32 %v5706_v43, %v5703_v10  ;;  %v5715_v8 = vrot.slane %v5713_v0, 2 }
 0x1e0   : > { %7507 = vmatpush3.bf16.msra.mxu0 %v8413_v16  ;;  %v5710_v16 = vshrl.u32 %v8430_v47, 16  ;;  %v5708_v50 = vsel %vm2013_vm3, %v5699_v44, %v5707_v62 }
 0x1e1   : > { %7852 = vmatprep.subr.bf16.mxu0 %v10374_v19 }
 0x1e2   : > { %v5712_v63 = vrot.slane %v5710_v16, 1 }
 0x1e3   : > { %7489 = vmatmul.mubr.bf16.gmra.mrb[16].mxu0 %v2819_v36 }
 0x1e4   : > { %7508 = vmatprep.mubr.msk.bf16.mxu0 %vm8635_vm0, %v10374_v19  ;;  %v9706_v52 = vor.u32 %v5715_v8, %v5712_v63 }
 0x1e6   : > { %v5717_v36 = vsel %vm2013_vm3, %v5707_v62, %v9706_v52 }
 0x1eb   : > { %7509 = vmatmul.mubr.bf16.vlgmr.msra.gmra.mrb[0].mxu0 %v3048_v17  ;;  %v3375_v17 = vld [vmem:[#allocation3 + $0x2c] sm:$0xe] }
 0x1ec   : > { %7512 = vmatprep.mubr.msk.bf16.mxu0 %vm8635_vm0, %v10374_v19  ;;  %7853 = vmatpush3.bf16.msra.mxu0 %v8417_v26  ;;  %v3376_v31 = vsel %vm9749_vm9, 0, %v3375_v17 }
 0x1ed   : > { %7854 = vmatprep.subr.bf16.mxu0 %v10374_v19  ;;  %3377 = vst [vmem:[#allocation3 + $0x2c] sm:$0xe] %v3376_v31 }
 0x1f0   : > { %7855 = vmatpush3.bf16.msra.mxu0 %v8418_v30  ;;  %v9758_v30 = vld [vmem:[%s10321_s6] ss:$0 sm:$0xff] }
 0x1f1   : > { %7856 = vmatprep.subr.bf16.mxu0 %v10374_v19 }
 0x1f3   : > { %7513 = vmatmul.mubr.bf16.gmra.mrb[4].mxu0 %v3057_v39 }
 0x1f4   : > { %7516 = vmatprep.mubr.msk.bf16.mxu0 %vm8635_vm0, %v10374_v19  ;;  %7857 = vmatpush3.bf16.msra.mxu0 %v8420_v25 }
 0x1f5   : > { %7858 = vmatprep.subr.bf16.mxu0 %v10374_v19 }
 0x1f8   : > { %7859 = vmatpush3.bf16.msra.mxu0 %v8421_v53 }
 0x1f9   : > { %7860 = vmatprep.subr.bf16.mxu0 %v10374_v19 }
 0x1fb   : > { %7517 = vmatmul.mubr.bf16.gmra.mrb[8].mxu0 %v3066_v15  ;;  %v3313_v15 = vpop.permute.xlu0 %3312 }
 0x1fc   : > { %7520 = vmatprep.mubr.msk.bf16.mxu0 %vm8635_vm0, %v10374_v19  ;;  %7861 = vmatpush3.bf16.msra.mxu0 %v8423_v35 }
 0x1fd   : > { %7862 = vmatprep.subr.bf16.mxu0 %v10374_v19 }
 0x1ff   : > { %v3323_v0 = vpop.permute.xlu0 %3322 }
 0x200   : > { %7863 = vmatpush3.bf16.msra.mxu0 %v8424_v21 }
 0x201   : > { %7864 = vmatprep.subr.bf16.mxu0 %v10374_v19 }
 0x203   : > { %7521 = vmatmul.mubr.bf16.gmra.mrb[12].mxu0 %v3075_v49 }
 0x204   : > { %7524 = vmatprep.mubr.msk.bf16.mxu0 %vm8635_vm0, %v10374_v19  ;;  %7865 = vmatpush3.bf16.msra.mxu0 %v8426_v13 }
 0x205   : > { %7866 = vmatprep.subr.bf16.mxu0 %v10374_v19 }
 0x208   : > { %7867 = vmatpush3.bf16.msra.mxu0 %v8427_v6 }
 0x20b   : > { %7525 = vmatmul.mubr.bf16.gmra.mrb[16].mxu0 %v3084_v4  ;;  %v3318_v4 = vpop.permute.xlu1 %3317 }
 0x20c   : > { %7868 = vmatprep.mubr.msk.bf16.mxu0 %vm8635_vm0, %v10374_v19 }
 0x20f   : > { %v3328_v31 = vpop.permute.xlu1 %3327 }
 0x213   : > { %7869 = vmatmul.mubr.bf16.vlgmr.msra.gmra.mrb[20].mxu0 %v5708_v50 }
 0x214   : > { %7872 = vmatprep.mubr.msk.bf16.mxu0 %vm8635_vm0, %v10374_v19 }
 0x21b   : > { %7873 = vmatmul.mubr.bf16.gmra.mrb[24].mxu0 %v5717_v36 }
 0x2be   : > { %v3172_v45 = vpop.f32.mrb[0].mxu0 }
 0x2bf   : > { %v3258_v58 = vmul.f32 %v9758_v30, %v3172_v45  ;;  %v7510_v25 = vpop.f32.mrb[1].mxu0 }
 0x2c0   : > { %v3175_v39 = vpop.f32.mrb[2].mxu0 }
 0x2c1   : > { %v3275_v56 = vadd.f32 %v9763_v61, %v3258_v58  ;;  %v3259_v54 = vmul.f32 %v9758_v30, %v3175_v39  ;;  %v7511_v37 = vpop.f32.mrb[3].mxu0 }
 0x2c2   : > { %v3333_v37 = vpop.permute.xlu0 %3332 }
 0x2c3   : > { %v3285_v53 = vmax.f32 %v3275_v56, 0.0  ;;  %v3276_v1 = vadd.f32 %v9763_v61, %v3259_v54 }
 0x2c5   : > { %v3355_v33 = vmul.f32 %v3308_v59, %v3285_v53  ;;  %v3286_v35 = vmax.f32 %v3276_v1, 0.0 }
 0x2c6   : > { %v3180_v41 = vpop.f32.mrb[4].mxu0 }
 0x2c7   : > { %v6685_v34 = vpack.c.bf16 %v3355_v33, %v3355_v33  ;;  %v3356_v40 = vmul.f32 %v3313_v15, %v3286_v35  ;;  %v3260_v21 = vmul.f32 %v9758_v30, %v3180_v41  ;;  %v7514_v3 = vpop.f32.mrb[5].mxu0  ;;  %v8440_v33 = vld [vmem:[%s10323_s8 + $0x40] sm:$0xff]  }
 0x2c8   : > { %v3183_v20 = vpop.f32.mrb[6].mxu0 }
 0x2c9   : > { %v3412_v23 = vshrl.u32 %v6685_v34, 16  ;;  %v3415_v13 = vshll.u32 %v6685_v34, 16  ;;  %v6686_v49 = vpack.c.bf16 %v3356_v40, %v3356_v40  ;;  %v3277_v60 = vadd.f32 %v9763_v61, %v3260_v21  ;;  %v7515_v11 = vpop.f32.mrb[7].mxu0 }
 0x2ca   : > { %v3261_v48 = vmul.f32 %v9758_v30, %v3183_v20 }
 0x2cb   : > { %v3414_v6 = vrot.slane %v3412_v23, 6  ;;  %v3417_v14 = vrot.slane %v3415_v13, 7  ;;  %v3421_v27 = vshrl.u32 %v6686_v49, 16  ;;  %v3424_v46 = vshll.u32 %v6686_v49, 16 }
 0x2cc   : > { %v3287_v2 = vmax.f32 %v3277_v60, 0.0  ;;  %v3278_v32 = vadd.f32 %v9763_v61, %v3261_v48 }
 0x2cd   : > { %v3418_v10 = vor.u32 %v3417_v14, %v3414_v6  ;;  %v3423_v43 = vrot.slane %v3421_v27, 6  ;;  %v3426_v47 = vrot.slane %v3424_v46, 7  ;;  %v8441_v46 = vld [vmem:[%s10323_s8 + $0x48] sm:$0xff]  }
 0x2ce   : > { %v3357_v22 = vmul.f32 %v3318_v4, %v3287_v2  ;;  %v3288_v28 = vmax.f32 %v3278_v32, 0.0  ;;  %v3188_v62 = vpop.f32.mrb[8].mxu0 }
 0x2cf   : > { %v3262_v44 = vmul.f32 %v9758_v30, %v3188_v62  ;;  %v7518_v50 = vpop.f32.mrb[9].mxu0  ;;  %v3522_v63 = vsel %vm9749_vm9, %v3418_v10, %v3521_v42  ;;  %v3419_v8 = vrot.slane %v3418_v10, 4  ;;  %v3427_v36 = vor.u32 %v3426_v47, %v3423_v43 }
 0x2d0   : > { %v6687_v55 = vpack.c.bf16 %v3357_v22, %v3357_v22  ;;  %v3358_v7 = vmul.f32 %v3323_v0, %v3288_v28  ;;  %v3191_v12 = vpop.f32.mrb[10].mxu0  ;;  %3523 = vst [vmem:[#allocation3 + $0x4] sm:$0xe] %v3522_v63  ;;  %v3338_v22 = vpop.permute.xlu1 %3337 }
 0x2d1   : > { %v3279_v57 = vadd.f32 %v9763_v61, %v3262_v44  ;;  %v3263_v24 = vmul.f32 %v9758_v30, %v3191_v12  ;;  %v7519_v18 = vpop.f32.mrb[11].mxu0  ;;  %v3428_v38 = vsel %vm9775_vm11, %v3419_v8, %v3427_v36  ;;  %v3429_v35 = vrot.slane %v3427_v36, 4  ;;  %v3343_v36 = vpop.permute.xlu0 %3342  ;;  %v8443_v12 = vld [vmem:[%s10323_s8 + $0x50] sm:$0xff]  }
 0x2d2   : > { %v3431_v29 = vshrl.u32 %v6687_v55, 16  ;;  %v3434_v51 = vshll.u32 %v6687_v55, 16  ;;  %v6688_v17 = vpack.c.bf16 %v3358_v7, %v3358_v7  ;;  %3524 = vst [vmem:[#allocation3 + $0x8] sm:$0xf] %v3428_v38 }
 0x2d3   : > { %v3289_v9 = vmax.f32 %v3279_v57, 0.0  ;;  %v3280_v5 = vadd.f32 %v9763_v61, %v3263_v24 }
 0x2d4   : > { %v3433_v45 = vrot.slane %v3431_v29, 6  ;;  %v3436_v58 = vrot.slane %v3434_v51, 7  ;;  %v3441_v25 = vshrl.u32 %v6688_v17, 16  ;;  %v3444_v39 = vshll.u32 %v6688_v17, 16 }
 0x2d5   : > { %v3359_v56 = vmul.f32 %v3328_v31, %v3289_v9  ;;  %v3290_v54 = vmax.f32 %v3280_v5, 0.0 }
 0x2d6   : > { %v3443_v53 = vrot.slane %v3441_v25, 6  ;;  %v3446_v1 = vrot.slane %v3444_v39, 7  ;;  %v3196_v59 = vpop.f32.mrb[12].mxu0  ;;  %v3437_v15 = vor.u32 %v3436_v58, %v3433_v45 }
 0x2d7   : > { %v6689_v41 = vpack.c.bf16 %v3359_v56, %v3359_v56  ;;  %v3360_v34 = vmul.f32 %v3333_v37, %v3290_v54  ;;  %v3264_v40 = vmul.f32 %v9758_v30, %v3196_v59  ;;  %v7522_v21 = vpop.f32.mrb[13].mxu0  ;;  %v8439_v3 = vld [vmem:[#allocation3] sm:$0xff]   ;;  %v3348_v37 = vpop.permute.xlu1 %3347 }
 0x2d8   : > { %v3199_v20 = vpop.f32.mrb[14].mxu0  ;;  %v3438_v23 = vsel %vm9775_vm11, %v3429_v35, %v3437_v15  ;;  %v3439_v13 = vrot.slane %v3437_v15, 4  ;;  %v3447_v49 = vor.u32 %v3446_v1, %v3443_v53  ;;  %7545 = vmatmul.mubr.bf16.vlgmr.msra.gmra.mrb[0].mxu1 %v8439_v3 }
 0x2d9   : > { %v3451_v60 = vshrl.u32 %v6689_v41, 16  ;;  %v3454_v11 = vshll.u32 %v6689_v41, 16  ;;  %v6690_v48 = vpack.c.bf16 %v3360_v34, %v3360_v34  ;;  %v3281_v6 = vadd.f32 %v9763_v61, %v3264_v40  ;;  %v7523_v14 = vpop.f32.mrb[15].mxu0  ;;  %3525 = vst [vmem:[#allocation3 + $0xc] sm:$0xf] %v3438_v23  ;;  %7565 = vmatpush3.bf16.msra.mxu1 %v8440_v33  ;;  %7548 = vmatprep.mubr.msk.bf16.mxu1 %vm8635_vm0, %v10374_v19  ;;  %v3353_v41 = vpop.permute.xlu0 %3352 }
 0x2da   : > { %v3265_v27 = vmul.f32 %v9758_v30, %v3199_v20  ;;  %v3448_v2 = vsel %vm9775_vm11, %v3439_v13, %v3447_v49  ;;  %7566 = vmatprep.subr.bf16.mxu1 %v10374_v19  ;;  %v3449_v0 = vrot.slane %v3447_v49, 4 }
 0x2db   : > { %v3453_v32 = vrot.slane %v3451_v60, 6  ;;  %v3456_v42 = vrot.slane %v3454_v11, 7  ;;  %v3461_v4 = vshrl.u32 %v6690_v48, 16  ;;  %v3464_v10 = vshll.u32 %v6690_v48, 16  ;;  %3526 = vst [vmem:[#allocation3 + $0x10] sm:$0xf] %v3448_v2 }
 0x2dc   : > { %v3291_v43 = vmax.f32 %v3281_v6, 0.0  ;;  %v3282_v47 = vadd.f32 %v9763_v61, %v3265_v27 }
 0x2dd   : > { %v3463_v28 = vrot.slane %v3461_v4, 6  ;;  %v3466_v62 = vrot.slane %v3464_v10, 7  ;;  %v3457_v44 = vor.u32 %v3456_v42, %v3453_v32  ;;  %7567 = vmatpush3.bf16.msra.mxu1 %v8441_v46  ;;  %v8448_v42 = vld [vmem:[%s10323_s8 + $0x68] sm:$0xff]  }
 0x2de   : > { %v3361_v50 = vmul.f32 %v3338_v22, %v3291_v43  ;;  %v3292_v63 = vmax.f32 %v3282_v47, 0.0  ;;  %v3204_v8 = vpop.f32.mrb[16].mxu0  ;;  %7568 = vmatprep.subr.bf16.mxu1 %v10374_v19 }
 0x2df   : > { %v3266_v55 = vmul.f32 %v9758_v30, %v3204_v8  ;;  %v7526_v7 = vpop.f32.mrb[17].mxu0  ;;  %v3458_v57 = vsel %vm9775_vm11, %v3449_v0, %v3457_v44  ;;  %v3459_v24 = vrot.slane %v3457_v44, 4  ;;  %v3467_v18 = vor.u32 %v3466_v62, %v3463_v28 }
 0x2e0   : > { %v6691_v38 = vpack.c.bf16 %v3361_v50, %v3361_v50  ;;  %v3362_v29 = vmul.f32 %v3343_v36, %v3292_v63  ;;  %v3207_v51 = vpop.f32.mrb[18].mxu0  ;;  %v8442_v17 = vld [vmem:[#allocation3 + $0x8] sm:$0xff]   ;;  %3527 = vst [vmem:[#allocation3 + $0x14] sm:$0xf] %v3458_v57  ;;  %v8449_v63 = vld [vmem:[%s10323_s8 + $0x70] sm:$0xff]  }
 0x2e1   : > { %v3283_v9 = vadd.f32 %v9763_v61, %v3266_v55  ;;  %v3267_v5 = vmul.f32 %v9758_v30, %v3207_v51  ;;  %v7527_v31 = vpop.f32.mrb[19].mxu0  ;;  %v3468_v45 = vsel %vm9775_vm11, %v3459_v24, %v3467_v18  ;;  %7549 = vmatmul.mubr.bf16.gmra.mrb[4].mxu1 %v8442_v17  ;;  %v8444_v30 = vld [vmem:[%s10323_s8 + $0x58] sm:$0xff]   ;;  %v3469_v3 = vrot.slane %v3467_v18, 4 }
 0x2e2   : > { %v3471_v58 = vshrl.u32 %v6691_v38, 16  ;;  %v3474_v25 = vshll.u32 %v6691_v38, 16  ;;  %v6692_v39 = vpack.c.bf16 %v3362_v29, %v3362_v29  ;;  %3528 = vst [vmem:[#allocation3 + $0x18] sm:$0xf] %v3468_v45  ;;  %7569 = vmatpush3.bf16.msra.mxu1 %v8443_v12  ;;  %7552 = vmatprep.mubr.msk.bf16.mxu1 %vm8635_vm0, %v10374_v19  ;;  %v3533_v36 = vld [vmem:[#allocation3 + $0x2c] sm:$0x3] }
 0x2e3   : > { %v3293_v56 = vmax.f32 %v3283_v9, 0.0  ;;  %v3284_v54 = vadd.f32 %v9763_v61, %v3267_v5  ;;  %7570 = vmatprep.subr.bf16.mxu1 %v10374_v19  ;;  %v8446_v61 = vld [vmem:[%s10323_s8 + $0x60] sm:$0xff]   ;;  %v8451_v17 = vld [vmem:[%s10323_s8 + $0x78] sm:$0xff]   ;;  %v8452_v9 = vld [vmem:[#allocation3] sm:$0xff]  }
 0x2e4   : > { %v3473_v53 = vrot.slane %v3471_v58, 6  ;;  %v3476_v1 = vrot.slane %v3474_v25, 7  ;;  %v3481_v59 = vshrl.u32 %v6692_v39, 16  ;;  %v3484_v33 = vshll.u32 %v6692_v39, 16  ;;  %v8453_v5 = vld [vmem:[#allocation3 + $0x8] sm:$0xff]  }
 0x2e5   : > { %v3363_v35 = vmul.f32 %v3348_v37, %v3293_v56  ;;  %v3294_v15 = vmax.f32 %v3284_v54, 0.0  ;;  %v3782_v31 = vshll.u32 %v8452_v9, 16  ;;  %v3787_v26 = vshll.u32 %v8453_v5, 16  ;;  %v8454_v54 = vld [vmem:[%s10323_s8 + $0x80] sm:$0xff]  }
 0x2e6   : > { %v3483_v34 = vrot.slane %v3481_v59, 6  ;;  %v3486_v40 = vrot.slane %v3484_v33, 7  ;;  %v9825_v21 = vpop.f32.mrb[20].mxu0  ;;  %v3477_v20 = vor.u32 %v3476_v1, %v3473_v53  ;;  %7571 = vmatpush3.bf16.msra.mxu1 %v8444_v30  ;;  %v3780_v58 = vshrl.u32 %v8452_v9, 16  ;;  %v8455_v53 = vld [vmem:[%s10323_s8 + $0x88] sm:$0xff]  }
 0x2e7   : > { %v6693_v23 = vpack.c.bf16 %v3363_v35, %v3363_v35  ;;  %v3364_v13 = vmul.f32 %v3353_v41, %v3294_v15  ;;  %v7870_v49 = vpop.f32.mrb[21].mxu0  ;;  %v8445_v60 = vld [vmem:[#allocation3 + $0x10] sm:$0xff]   ;;  %7572 = vmatprep.subr.bf16.mxu1 %v10374_v19  ;;  %v3784_v45 = vrot.slane %v3782_v31, 1  ;;  %v3789_v25 = vrot.slane %v3787_v26, 1  ;;  %v8457_v15 = vld [vmem:[%s10323_s8 + $0x90] sm:$0xff]  }
 0x2e8   : > { %v9827_v11 = vpop.f32.mrb[22].mxu0  ;;  %v3478_v48 = vsel %vm9775_vm11, %v3469_v3, %v3477_v20  ;;  %v3479_v6 = vrot.slane %v3477_v20, 4  ;;  %v3487_v14 = vor.u32 %v3486_v40, %v3483_v34  ;;  %v8456_v39 = vld [vmem:[#allocation3 + $0x10] sm:$0xff]   ;;  %v3791_v1 = vshrl.u32 %v8453_v5, 16  ;;  %v8458_v34 = vld [vmem:[%s10323_s8 + $0x98] sm:$0xff]   ;;  %v8476_v5 = vld [vmem:[%s10323_s8 + $0xe8] sm:$0xff]  }
 0x2e9   : > { %v3491_v27 = vshrl.u32 %v6693_v23, 16  ;;  %v3494_v46 = vshll.u32 %v6693_v23, 16  ;;  %v6694_v2 = vpack.c.bf16 %v3364_v13, %v3364_v13  ;;  %v7871_v32 = vpop.f32.mrb[23].mxu0  ;;  %3529 = vst [vmem:[#allocation3 + $0x1c] sm:$0xf] %v3478_v48  ;;  %7553 = vmatmul.mubr.bf16.gmra.mrb[8].mxu1 %v8445_v60  ;;  %v3785_v56 = vor.u32 %v3784_v45, %v3780_v58  ;;  %v8460_v13 = vld [vmem:[%s10323_s8 + $0xa0] sm:$0xff]  }
 0x2ea   : > { %v3488_v4 = vsel %vm9775_vm11, %v3479_v6, %v3487_v14  ;;  %7573 = vmatpush3.bf16.msra.mxu1 %v8446_v61  ;;  %7556 = vmatprep.mubr.msk.bf16.mxu1 %vm8635_vm0, %v10374_v19  ;;  %v3489_v0 = vrot.slane %v3487_v14, 4  ;;  %v3795_v37 = vshll.u32 %v8456_v39, 16  ;;  %v3793_v35 = vor.u32 %v3791_v1, %v3789_v25  ;;  %v8462_v6 = vld [vmem:[%s10323_s8 + $0xa8] sm:$0xff]   ;;  %v8477_v31 = vld [vmem:[%s10323_s8 + $0xf0] sm:$0xff]   ;;  %v8479_v58 = vld [vmem:[%s10323_s8 + $0xf8] sm:$0xff]  }
 0x2eb   : > { %v3493_v10 = vrot.slane %v3491_v27, 6  ;;  %v3496_v43 = vrot.slane %v3494_v46, 7  ;;  %v3501_v47 = vshrl.u32 %v6694_v2, 16  ;;  %v3504_v22 = vshll.u32 %v6694_v2, 16  ;;  %3530 = vst [vmem:[#allocation3 + $0x20] sm:$0xf] %v3488_v4  ;;  %7574 = vmatprep.subr.bf16.mxu1 %v10374_v19 }
 0x2ec   : > { %v3790_v30 = vsel %vm1276_vm1, %v3785_v56, %v3789_v25  ;;  %v3797_v59 = vrot.slane %v3795_v37, 1  ;;  %v3799_v40 = vshrl.u32 %v8456_v39, 16  ;;  %v8463_v2 = vld [vmem:[%s10323_s8 + $0xb0] sm:$0xff]   ;;  %v8481_v56 = vld [vmem:[#allocation3 + $0xc] sm:$0xff]  }
 0x2ed   : > { %v3503_v28 = vrot.slane %v3501_v47, 6  ;;  %v3506_v62 = vrot.slane %v3504_v22, 7  ;;  %v3497_v44 = vor.u32 %v3496_v43, %v3493_v10  ;;  %v8465_v10 = vld [vmem:[%s10323_s8 + $0xb8] sm:$0xff]  }
 0x2ee   : > { %v9840_v50 = vpop.f32.mrb[24].mxu0  ;;  %7575 = vmatpush3.bf16.msra.mxu1 %v8448_v42  ;;  %v3798_v61 = vsel %vm1276_vm1, %v3793_v35, %v3797_v59  ;;  %v3801_v23 = vor.u32 %v3799_v40, %v3797_v59  ;;  %v8484_v59 = vld [vmem:[#allocation3 + $0x14] sm:$0xff]  }
 0x2ef   : > { %v3507_v8 = vor.u32 %v3506_v62, %v3503_v28  ;;  %v7874_v55 = vpop.f32.mrb[25].mxu0  ;;  %v3498_v7 = vsel %vm9775_vm11, %v3489_v0, %v3497_v44  ;;  %v3499_v12 = vrot.slane %v3497_v44, 4  ;;  %7576 = vmatprep.subr.bf16.mxu1 %v10374_v19  ;;  %v8467_v28 = vld [vmem:[#allocation3 + $0x8] sm:$0xff]   ;;  %v8466_v62 = vld [vmem:[#allocation3] sm:$0xfe]   ;;  %v4261_v35 = vrot.slane %v8484_v59, 1 }
 0x2f0   : > { %v9847_v57 = vpop.f32.mrb[26].mxu0  ;;  %v8447_v24 = vld [vmem:[#allocation3 + $0x18] sm:$0xff]   ;;  %3531 = vst [vmem:[#allocation3 + $0x24] sm:$0xf] %v3498_v7  ;;  %v4036_v0 = vrot.slane %v8467_v28, 1  ;;  %v4035_v44 = vrot.slane %v8466_v62, 1 }
 0x2f1   : > { %v3509_v18 = vrot.slane %v3507_v8, 4  ;;  %v7875_v38 = vpop.f32.mrb[27].mxu0  ;;  %v3508_v29 = vsel %vm9775_vm11, %v3499_v12, %v3507_v8  ;;  %7557 = vmatmul.mubr.bf16.gmra.mrb[12].mxu1 %v8447_v24  ;;  %v8459_v33 = vld [vmem:[#allocation3 + $0x18] sm:$0xff]   ;;  %v8471_v12 = vld [vmem:[%s10323_s8 + $0xd0] sm:$0xff]  }
 0x2f2   : > { %3532 = vst [vmem:[#allocation3 + $0x28] sm:$0xf] %v3508_v29  ;;  %7577 = vmatpush3.bf16.msra.mxu1 %v8449_v63  ;;  %7560 = vmatprep.mubr.msk.bf16.mxu1 %vm8635_vm0, %v10374_v19  ;;  %v3803_v41 = vshll.u32 %v8459_v33, 16  ;;  %v3807_v48 = vshrl.u32 %v8459_v33, 16  ;;  %v8468_v63 = vld [vmem:[%s10323_s8 + $0xc0] sm:$0xff]   ;;  %v4037_v8 = vsel %vm1789_vm2, %v4035_v44, %v4036_v0  ;;  %v8469_v55 = vld [vmem:[%s10323_s8 + $0xc8] sm:$0xff]  }
 0x2f3   : > { %v3534_v51 = vsel %vm9743_vm7, %v3509_v18, %v3533_v36  ;;  %7578 = vmatprep.subr.bf16.mxu1 %v10374_v19  ;;  %v8470_v36 = vld [vmem:[#allocation3 + $0x10] sm:$0xff]   ;;  %v8473_v18 = vld [vmem:[#allocation3 + $0x18] sm:$0xff]   ;;  %v8472_v38 = vld [vmem:[%s10323_s8 + $0xd8] sm:$0xff]  }
 0x2f4   : > { %3535 = vst [vmem:[#allocation3 + $0x2c] sm:$0x3] %v3534_v51  ;;  %v3805_v3 = vrot.slane %v3803_v41, 1  ;;  %v4038_v7 = vrot.slane %v8470_v36, 1  ;;  %v4040_v29 = vrot.slane %v8473_v18, 1  ;;  %v8474_v51 = vld [vmem:[%s10323_s8 + $0xe0] sm:$0xff]  }
 0x2f5   : > { %v8483_v33 = vld [vmem:[%s10323_s8 + $0x108] sm:$0xff]  }
 0x2f6   : > { %7579 = vmatpush3.bf16.msra.mxu1 %v8451_v17  ;;  %v3806_v49 = vsel %vm1276_vm1, %v3801_v23, %v3805_v3  ;;  %v3809_v46 = vor.u32 %v3807_v48, %v3805_v3  ;;  %v4039_v24 = vsel %vm1789_vm2, %v4036_v0, %v4038_v7  ;;  %v4041_v17 = vsel %vm1789_vm2, %v4038_v7, %v4040_v29  ;;  %v8487_v41 = vld [vmem:[#allocation3 + $0x1c] sm:$0xff]   ;;  %v8488_v3 = vld [vmem:[%s10323_s8 + $0x120] sm:$0xff]  }
 0x2f7   : > { %v8450_v16 = vld [vmem:[#allocation3 + $0x20] sm:$0xff]   ;;  %7600 = vmatprep.subr.bf16.mxu1 %v10374_v19  ;;  %v4263_v40 = vrot.slane %v8487_v41, 1  ;;  %v8498_v28 = vld [vmem:[#allocation3 + $0x14] sm:$0xff]  }
 0x2f8   : > { %v8461_v20 = vld [vmem:[#allocation3 + $0x20] sm:$0xff]  }
 0x2f9   : > { %7561 = vmatmul.mubr.bf16.gmra.mrb[16].mxu1 %v8450_v16  ;;  %v3811_v60 = vshll.u32 %v8461_v20, 16  ;;  %v8464_v27 = vld [vmem:[#allocation3 + $0x28] ss:$0 sps:$4 sm:$0x11]   ;;  %v3815_v4 = vshrl.u32 %v8461_v20, 16  ;;  %v8475_v9 = vld [vmem:[#allocation3 + $0x20] sm:$0xff]   ;;  %v4264_v20 = vsel %vm1789_vm2, %v4261_v35, %v4263_v40 }
 0x2fa   : > { %7580 = vmatprep.mubr.msk.bf16.mxu1 %vm8635_vm0, %v10374_v19  ;;  %v3819_v42 = vshll.u32 %v8464_v27, 16  ;;  %v4042_v16 = vrot.slane %v8475_v9, 1  ;;  %v8478_v45 = vld [vmem:[#allocation3 + $0x28] ss:$0 sps:$4 sm:$0x11]   ;;  %v8501_v18 = vld [vmem:[#allocation3 + $0x1c] sm:$0xff]  }
 0x2fb   : > { %v3813_v14 = vrot.slane %v3811_v60, 1  ;;  %v4044_v25 = vrot.slane %v8478_v45, 1  ;;  %v8489_v23 = vld [vmem:[#allocation3 + $0x24] sm:$0xff]  }
 0x2fc   : > { %v3821_v47 = vrot.slane %v3819_v42, 1  ;;  %v4043_v26 = vsel %vm1789_vm2, %v4040_v29, %v4042_v16  ;;  %v8491_v60 = vld [vmem:[%s10323_s8 + $0x130] sm:$0xff]   ;;  %v8493_v27 = vld [vmem:[%s10323_s8 + $0x138] sm:$0xff]  }
 0x2fd   : > { %v3814_v32 = vsel %vm1276_vm1, %v3809_v46, %v3813_v14  ;;  %v3817_v43 = vor.u32 %v3815_v4, %v3813_v14  ;;  %v4045_v39 = vsel %vm1789_vm2, %v4042_v16, %v4044_v25  ;;  %v8495_v14 = vld [vmem:[#allocation3 + $0xc] sm:$0xff]   ;;  %v8494_v46 = vld [vmem:[#allocation3 + $0x4] sm:$0xfe]  }
 0x2fe   : > { %v4493_v42 = vshll.u32 %v8495_v14, 16  ;;  %v4482_v4 = vshrl.u32 %v8494_v46, 16  ;;  %v8499_v9 = vld [vmem:[%s10323_s8 + $0x150] sm:$0xff]   ;;  %v8500_v45 = vld [vmem:[%s10323_s8 + $0x158] sm:$0xff]  }
 0x2ff   : > { %v3822_v22 = vsel %vm1276_vm1, %v3817_v43, %v3821_v47 }
 0x300   : > { %v4484_v62 = vrot.slane %v4482_v4, 1  ;;  %v8514_v4 = vld [vmem:[%s10323_s8 + $0x198] sm:$0xff]  }
 0x301   : > { %7581 = vmatmul.mubr.bf16.vlgmr.msra.gmra.mrb[0].mxu1 %v3790_v30  ;;  %v4259_v30 = vrot.slane %v8481_v56, 1  ;;  %v8502_v56 = vld [vmem:[%s10323_s8 + $0x160] sm:$0xff]  }
 0x302   : > { %7601 = vmatpush3.bf16.msra.mxu1 %v8454_v54  ;;  %7584 = vmatprep.mubr.msk.bf16.mxu1 %vm8635_vm0, %v10374_v19  ;;  %v8480_v54 = vld [vmem:[#allocation3 + $0x4] sm:$0xfe]  }
 0x303   : > { %7602 = vmatprep.subr.bf16.mxu1 %v10374_v19  ;;  %v4258_v37 = vrot.slane %v8480_v54, 1 }
 0x305   : > { %v4260_v1 = vsel %vm1789_vm2, %v4258_v37, %v4259_v30 }
 0x306   : > { %7603 = vmatpush3.bf16.msra.mxu1 %v8455_v53  ;;  %v8482_v53 = vld [vmem:[%s10323_s8 + $0x100] sm:$0xff]  }
 0x307   : > { %7604 = vmatprep.subr.bf16.mxu1 %v10374_v19 }
 0x309   : > { %7585 = vmatmul.mubr.bf16.gmra.mrb[4].mxu1 %v3798_v61  ;;  %v4262_v61 = vsel %vm1789_vm2, %v4259_v30, %v4261_v35 }
 0x30a   : > { %7605 = vmatpush3.bf16.msra.mxu1 %v8457_v15  ;;  %7588 = vmatprep.mubr.msk.bf16.mxu1 %vm8635_vm0, %v10374_v19  ;;  %v8485_v15 = vld [vmem:[%s10323_s8 + $0x110] sm:$0xff]  }
 0x30b   : > { %7606 = vmatprep.subr.bf16.mxu1 %v10374_v19 }
 0x30e   : > { %7607 = vmatpush3.bf16.msra.mxu1 %v8458_v34  ;;  %v8486_v34 = vld [vmem:[%s10323_s8 + $0x118] sm:$0xff]  }
 0x30f   : > { %7608 = vmatprep.subr.bf16.mxu1 %v10374_v19 }
 0x311   : > { %7589 = vmatmul.mubr.bf16.gmra.mrb[8].mxu1 %v3806_v49  ;;  %v4265_v49 = vrot.slane %v8489_v23, 1  ;;  %v8509_v23 = vld [vmem:[#allocation3 + $0xc] sm:$0xff]  }
 0x312   : > { %7609 = vmatpush3.bf16.msra.mxu1 %v8460_v13  ;;  %7592 = vmatprep.mubr.msk.bf16.mxu1 %vm8635_vm0, %v10374_v19  ;;  %v8490_v13 = vld [vmem:[%s10323_s8 + $0x128] sm:$0xff]  }
 0x313   : > { %7610 = vmatprep.subr.bf16.mxu1 %v10374_v19  ;;  %v4266_v48 = vsel %vm1789_vm2, %v4263_v40, %v4265_v49  ;;  %v8507_v40 = vld [vmem:[%s10323_s8 + $0x178] sm:$0xff]  }
 0x316   : > { %7611 = vmatpush3.bf16.msra.mxu1 %v8462_v6  ;;  %v8492_v6 = vld [vmem:[#allocation3 + $0x2c] ss:$0 sps:$4 sm:$0x11]  }
 0x317   : > { %7612 = vmatprep.subr.bf16.mxu1 %v10374_v19 }
 0x319   : > { %7593 = vmatmul.mubr.bf16.gmra.mrb[12].mxu1 %v3814_v32  ;;  %v4490_v32 = vshrl.u32 %v8495_v14, 16  ;;  %v8512_v14 = vld [vmem:[#allocation3 + $0x14] sm:$0xff]  }
 0x31a   : > { %7613 = vmatpush3.bf16.msra.mxu1 %v8463_v2  ;;  %7596 = vmatprep.mubr.msk.bf16.mxu1 %vm8635_vm0, %v10374_v19  ;;  %v4267_v2 = vrot.slane %v8492_v6, 1 }
 0x31b   : > { %7614 = vmatprep.subr.bf16.mxu1 %v10374_v19  ;;  %v4492_v47 = vrot.slane %v4490_v32, 1 }
 0x31c   : > { %v4268_v43 = vsel %vm1789_vm2, %v4265_v49, %v4267_v2  ;;  %v4748_v49 = vrot.slane %v8509_v23, 2  ;;  %v8513_v2 = vld [vmem:[%s10323_s8 + $0x190] sm:$0xff]   ;;  %v8540_v23 = vld [vmem:[#allocation3 + $0x18] sm:$0xff]  }
 0x31e   : > { %7615 = vmatpush3.bf16.msra.mxu1 %v8465_v10  ;;  %v4485_v10 = vshll.u32 %v8494_v46, 16  ;;  %v4750_v46 = vrot.slane %v8512_v14, 2 }
 0x31f   : > { %7636 = vmatprep.subr.bf16.mxu1 %v10374_v19 }
 0x320   : > { %v4487_v0 = vrot.slane %v4485_v10, 2  ;;  %v4751_v32 = vsel %vm4746_vm12, %v4748_v49, %v4750_v46 }
 0x321   : > { %7597 = vmatmul.mubr.bf16.gmra.mrb[16].mxu1 %v3822_v22  ;;  %v4495_v22 = vrot.slane %v4493_v42, 2  ;;  %v8515_v42 = vld [vmem:[#allocation3 + $0x1c] sm:$0xff]  }
 0x322   : > { %7616 = vmatprep.mubr.msk.bf16.mxu1 %vm8635_vm0, %v10374_v19  ;;  %v4488_v36 = vor.u32 %v4487_v0, %v4484_v62  ;;  %v4752_v10 = vrot.slane %v8515_v42, 2  ;;  %v8519_v0 = vld [vmem:[%s10323_s8 + $0x1b0] sm:$0xff]  }
 0x323   : > { %v4496_v44 = vor.u32 %v4495_v22, %v4492_v47  ;;  %v8517_v22 = vld [vmem:[#allocation3 + $0x24] sm:$0xff]  }
 0x324   : > { %v4753_v47 = vsel %vm4746_vm12, %v4750_v46, %v4752_v10  ;;  %v4754_v62 = vrot.slane %v8517_v22, 2  ;;  %v8543_v42 = vld [vmem:[#allocation3 + $0x20] sm:$0xff]  }
 0x325   : > { %v4497_v7 = vsel %vm2013_vm3, %v4488_v36, %v4496_v44  ;;  %v8541_v22 = vld [vmem:[%s10323_s8 + $0x210] sm:$0xff]  }
 0x329   : > { %7617 = vmatmul.mubr.bf16.vlgmr.msra.gmra.mrb[0].mxu1 %v4037_v8  ;;  %v4502_v8 = vshll.u32 %v8498_v28, 16 }
 0x32a   : > { %7637 = vmatpush3.bf16.msra.mxu1 %v8468_v63  ;;  %7620 = vmatprep.mubr.msk.bf16.mxu1 %vm8635_vm0, %v10374_v19  ;;  %v4499_v63 = vshrl.u32 %v8498_v28, 16  ;;  %v8518_v28 = vld [vmem:[%s10323_s8 + $0x1a8] sm:$0xff]  }
 0x32b   : > { %7638 = vmatprep.subr.bf16.mxu1 %v10374_v19 }
 0x32e   : > { %7639 = vmatpush3.bf16.msra.mxu1 %v8469_v55  ;;  %v8496_v55 = vld [vmem:[%s10323_s8 + $0x140] sm:$0xff]  }
 0x32f   : > { %7640 = vmatprep.subr.bf16.mxu1 %v10374_v19 }
 0x331   : > { %7621 = vmatmul.mubr.bf16.gmra.mrb[4].mxu1 %v4039_v24  ;;  %v4504_v24 = vrot.slane %v4502_v8, 2  ;;  %v8521_v8 = vld [vmem:[%s10323_s8 + $0x1b8] sm:$0xff]  }
 0x332   : > { %7641 = vmatpush3.bf16.msra.mxu1 %v8471_v12  ;;  %7624 = vmatprep.mubr.msk.bf16.mxu1 %vm8635_vm0, %v10374_v19  ;;  %v4501_v12 = vrot.slane %v4499_v63, 1  ;;  %v8520_v63 = vld [vmem:[#allocation3 + $0x2c] ss:$0 sps:$4 sm:$0x33]  }
 0x333   : > { %7642 = vmatprep.subr.bf16.mxu1 %v10374_v19  ;;  %v4756_v36 = vrot.slane %v8520_v63, 2  ;;  %v8542_v63 = vld [vmem:[%s10323_s8 + $0x218] sm:$0xff]  }
 0x334   : > { %v4505_v29 = vor.u32 %v4504_v24, %v4501_v12  ;;  %v8522_v12 = vld [vmem:[#allocation3 + $0x8] sm:$0xfc]  }
 0x336   : > { %7643 = vmatpush3.bf16.msra.mxu1 %v8472_v38  ;;  %v8497_v38 = vld [vmem:[%s10323_s8 + $0x148] sm:$0xff]  }
 0x337   : > { %7644 = vmatprep.subr.bf16.mxu1 %v10374_v19 }
 0x339   : > { %7625 = vmatmul.mubr.bf16.gmra.mrb[8].mxu1 %v4041_v17  ;;  %v4511_v17 = vshll.u32 %v8501_v18, 16 }
 0x33a   : > { %7645 = vmatpush3.bf16.msra.mxu1 %v8474_v51  ;;  %7628 = vmatprep.mubr.msk.bf16.mxu1 %vm8635_vm0, %v10374_v19  ;;  %v4508_v51 = vshrl.u32 %v8501_v18, 16  ;;  %v4970_v18 = vrot.slane %v8522_v12, 2 }
 0x33b   : > { %7646 = vmatprep.subr.bf16.mxu1 %v10374_v19 }
 0x33c   : > { %v4510_v16 = vrot.slane %v4508_v51, 1  ;;  %v8526_v51 = vld [vmem:[#allocation3 + $0x18] sm:$0xff]  }
 0x33e   : > { %7647 = vmatpush3.bf16.msra.mxu1 %v8476_v5  ;;  %v4506_v5 = vsel %vm2013_vm3, %v4496_v44, %v4505_v29  ;;  %v4755_v44 = vsel %vm4746_vm12, %v4752_v10, %v4754_v62 }
 0x33f   : > { %7648 = vmatprep.subr.bf16.mxu1 %v10374_v19 }
 0x341   : > { %7629 = vmatmul.mubr.bf16.gmra.mrb[12].mxu1 %v4043_v26  ;;  %v8503_v26 = vld [vmem:[#allocation3 + $0x24] sm:$0xff]  }
 0x342   : > { %7649 = vmatpush3.bf16.msra.mxu1 %v8477_v31  ;;  %7632 = vmatprep.mubr.msk.bf16.mxu1 %vm8635_vm0, %v10374_v19  ;;  %v4513_v31 = vrot.slane %v4511_v17, 2  ;;  %v4517_v25 = vshrl.u32 %v8503_v26, 16  ;;  %v8525_v17 = vld [vmem:[%s10323_s8 + $0x1c8] sm:$0xff]  }
 0x343   : > { %7650 = vmatprep.subr.bf16.mxu1 %v10374_v19 }
 0x344   : > { %v4519_v30 = vrot.slane %v4517_v25, 1 }
 0x346   : > { %7651 = vmatpush3.bf16.msra.mxu1 %v8479_v58  ;;  %v4514_v58 = vor.u32 %v4513_v31, %v4510_v16  ;;  %v8529_v31 = vld [vmem:[#allocation3 + $0x20] sm:$0xff]  }
 0x347   : > { %7672 = vmatprep.subr.bf16.mxu1 %v10374_v19 }
 0x348   : > { %v4515_v54 = vsel %vm2013_vm3, %v4505_v29, %v4514_v58 }
 0x349   : > { %7633 = vmatmul.mubr.bf16.gmra.mrb[16].mxu1 %v4045_v39  ;;  %v4520_v39 = vshll.u32 %v8503_v26, 16  ;;  %v8528_v26 = vld [vmem:[%s10323_s8 + $0x1d8] sm:$0xff]  }
 0x34a   : > { %7652 = vmatprep.mubr.msk.bf16.mxu1 %vm8635_vm0, %v10374_v19 }
 0x34b   : > { %v4522_v37 = vrot.slane %v4520_v39, 2  ;;  %v8531_v39 = vld [vmem:[#allocation3 + $0x28] sm:$0xff]  }
 0x34d   : > { %v4523_v59 = vor.u32 %v4522_v37, %v4519_v30  ;;  %v8533_v30 = vld [vmem:[%s10323_s8 + $0x1f0] sm:$0xff]  }
 0x351   : > { %7653 = vmatmul.mubr.bf16.vlgmr.msra.gmra.mrb[0].mxu1 %v4260_v1  ;;  %v8504_v1 = vld [vmem:[%s10323_s8 + $0x168] sm:$0xff]  }
 0x352   : > { %7673 = vmatpush3.bf16.msra.mxu1 %v8482_v53  ;;  %7656 = vmatprep.mubr.msk.bf16.mxu1 %vm8635_vm0, %v10374_v19  ;;  %v8506_v53 = vld [vmem:[#allocation3 + $0x2c] ss:$0 sps:$4 sm:$0x33]  }
 0x353   : > { %7674 = vmatprep.subr.bf16.mxu1 %v10374_v19  ;;  %v4529_v35 = vshll.u32 %v8506_v53, 16 }
 0x356   : > { %7675 = vmatpush3.bf16.msra.mxu1 %v8483_v33  ;;  %v4526_v33 = vshrl.u32 %v8506_v53, 16  ;;  %v8534_v53 = vld [vmem:[#allocation3 + $0x30] ss:$0 sps:$4 sm:$0x33]  }
 0x357   : > { %7676 = vmatprep.subr.bf16.mxu1 %v10374_v19 }
 0x358   : > { %v4528_v41 = vrot.slane %v4526_v33, 1  ;;  %v8536_v33 = vld [vmem:[#allocation3 + $0x8] sm:$0xfc]  }
 0x359   : > { %7657 = vmatmul.mubr.bf16.gmra.mrb[4].mxu1 %v4262_v61  ;;  %v4524_v61 = vsel %vm2013_vm3, %v4514_v58, %v4523_v59  ;;  %v8530_v58 = vld [vmem:[%s10323_s8 + $0x1e0] sm:$0xff]  }
 0x35a   : > { %7677 = vmatpush3.bf16.msra.mxu1 %v8485_v15  ;;  %7660 = vmatprep.mubr.msk.bf16.mxu1 %vm8635_vm0, %v10374_v19  ;;  %v8505_v15 = vld [vmem:[%s10323_s8 + $0x170] sm:$0xff]  }
 0x35b   : > { %7678 = vmatprep.subr.bf16.mxu1 %v10374_v19 }
 0x35e   : > { %7679 = vmatpush3.bf16.msra.mxu1 %v8486_v34  ;;  %v4531_v34 = vrot.slane %v4529_v35, 2  ;;  %v4979_v35 = vrot.slane %v8534_v53, 2  ;;  %v8552_v53 = vld [vmem:[#allocation3 + $0x18] sm:$0xff]  }
 0x35f   : > { %7680 = vmatprep.subr.bf16.mxu1 %v10374_v19 }
 0x361   : > { %7661 = vmatmul.mubr.bf16.gmra.mrb[8].mxu1 %v4264_v20 }
 0x362   : > { %7681 = vmatpush3.bf16.msra.mxu1 %v8488_v3  ;;  %7664 = vmatprep.mubr.msk.bf16.mxu1 %vm8635_vm0, %v10374_v19  ;;  %v4532_v3 = vor.u32 %v4531_v34, %v4528_v41  ;;  %v5195_v41 = vshrl.u32 %v8536_v33, 16  ;;  %v5198_v34 = vshll.u32 %v8536_v33, 16  ;;  %v8562_v33 = vld [vmem:[%s10324_s9 + $0x8] sm:$0xff]  }
 0x363   : > { %7682 = vmatprep.subr.bf16.mxu1 %v10374_v19 }
 0x364   : > { %v4533_v20 = vsel %vm2013_vm3, %v4523_v59, %v4532_v3  ;;  %v8535_v59 = vld [vmem:[%s10323_s8 + $0x1f8] sm:$0xff]  }
 0x366   : > { %7683 = vmatpush3.bf16.msra.mxu1 %v8490_v13  ;;  %v8508_v13 = vld [vmem:[#allocation3 + $0x4] sm:$0xfc]  }
 0x367   : > { %7684 = vmatprep.subr.bf16.mxu1 %v10374_v19 }
 0x369   : > { %7665 = vmatmul.mubr.bf16.gmra.mrb[12].mxu1 %v4266_v48  ;;  %v8510_v48 = vld [vmem:[%s10323_s8 + $0x180] sm:$0xff]  }
 0x36a   : > { %7685 = vmatpush3.bf16.msra.mxu1 %v8491_v60  ;;  %7668 = vmatprep.mubr.msk.bf16.mxu1 %vm8635_vm0, %v10374_v19  ;;  %v4747_v60 = vrot.slane %v8508_v13, 2  ;;  %v5197_v13 = vrot.slane %v5195_v41, 2 }
 0x36b   : > { %7686 = vmatprep.subr.bf16.mxu1 %v10374_v19 }
 0x36c   : > { %v4749_v6 = vsel %vm4746_vm12, %v4747_v60, %v4748_v49  ;;  %v5200_v49 = vrot.slane %v5198_v34, 3  ;;  %v8564_v34 = vld [vmem:[%s10324_s9 + $0x18] sm:$0xff]  }
 0x36e   : > { %7687 = vmatpush3.bf16.msra.mxu1 %v8493_v27  ;;  %v8511_v27 = vld [vmem:[%s10323_s8 + $0x188] sm:$0xff]   ;;  %v5201_v14 = vor.u32 %v5200_v49, %v5197_v13 }
 0x36f   : > { %7708 = vmatprep.subr.bf16.mxu1 %v10374_v19  ;;  %v8566_v13 = vld [vmem:[%s10324_s9 + $0x28] sm:$0xff]  }
 0x371   : > { %7669 = vmatmul.mubr.bf16.gmra.mrb[16].mxu1 %v4268_v43  ;;  %v8516_v43 = vld [vmem:[%s10323_s8 + $0x1a0] sm:$0xff]  }
 0x372   : > { %7688 = vmatprep.mubr.msk.bf16.mxu1 %vm8635_vm0, %v10374_v19 }
 0x379   : > { %7689 = vmatmul.mubr.bf16.vlgmr.msra.gmra.mrb[0].mxu1 %v4497_v7  ;;  %v8523_v7 = vld [vmem:[#allocation3 + $0x10] sm:$0xff]  }
 0x37a   : > { %7709 = vmatpush3.bf16.msra.mxu1 %v8496_v55  ;;  %7692 = vmatprep.mubr.msk.bf16.mxu1 %vm8635_vm0, %v10374_v19  ;;  %v4757_v55 = vsel %vm4746_vm12, %v4754_v62, %v4756_v36  ;;  %v4971_v24 = vrot.slane %v8523_v7, 2  ;;  %v8544_v7 = vld [vmem:[%s10323_s8 + $0x220] sm:$0xff]  }
 0x37b   : > { %7710 = vmatprep.subr.bf16.mxu1 %v10374_v19 }
 0x37c   : > { %v4972_v29 = vsel %vm4746_vm12, %v4970_v18, %v4971_v24 }
 0x37e   : > { %7711 = vmatpush3.bf16.msra.mxu1 %v8497_v38  ;;  %v8524_v38 = vld [vmem:[%s10323_s8 + $0x1c0] sm:$0xff]  }
 0x37f   : > { %7712 = vmatprep.subr.bf16.mxu1 %v10374_v19 }
 0x381   : > { %7693 = vmatmul.mubr.bf16.gmra.mrb[4].mxu1 %v4506_v5  ;;  %v8527_v5 = vld [vmem:[%s10323_s8 + $0x1d0] sm:$0xff]  }
 0x382   : > { %7713 = vmatpush3.bf16.msra.mxu1 %v8499_v9  ;;  %7696 = vmatprep.mubr.msk.bf16.mxu1 %vm8635_vm0, %v10374_v19  ;;  %v4973_v9 = vrot.slane %v8526_v51, 2 }
 0x383   : > { %7714 = vmatprep.subr.bf16.mxu1 %v10374_v19 }
 0x384   : > { %v4974_v16 = vsel %vm4746_vm12, %v4971_v24, %v4973_v9 }
 0x386   : > { %7715 = vmatpush3.bf16.msra.mxu1 %v8500_v45  ;;  %v4975_v45 = vrot.slane %v8529_v31, 2 }
 0x387   : > { %7716 = vmatprep.subr.bf16.mxu1 %v10374_v19 }
 0x388   : > { %v4976_v25 = vsel %vm4746_vm12, %v4973_v9, %v4975_v45 }
 0x389   : > { %7697 = vmatmul.mubr.bf16.gmra.mrb[8].mxu1 %v4515_v54  ;;  %v4977_v54 = vrot.slane %v8531_v39, 2  ;;  %v8551_v39 = vld [vmem:[#allocation3 + $0x10] sm:$0xff]  }
 0x38a   : > { %7717 = vmatpush3.bf16.msra.mxu1 %v8502_v56  ;;  %7700 = vmatprep.mubr.msk.bf16.mxu1 %vm8635_vm0, %v10374_v19  ;;  %v8532_v56 = vld [vmem:[%s10323_s8 + $0x1e8] sm:$0xff]  }
 0x38b   : > { %7718 = vmatprep.subr.bf16.mxu1 %v10374_v19  ;;  %v4978_v37 = vsel %vm4746_vm12, %v4975_v45, %v4977_v54  ;;  %v8549_v45 = vld [vmem:[%s10323_s8 + $0x238] sm:$0xff]  }
 0x38e   : > { %7719 = vmatpush3.bf16.msra.mxu1 %v8504_v1  ;;  %v8537_v1 = vld [vmem:[#allocation3 + $0x10] sm:$0xff]  }
 0x38f   : > { %7720 = vmatprep.subr.bf16.mxu1 %v10374_v19 }
 0x391   : > { %7701 = vmatmul.mubr.bf16.gmra.mrb[12].mxu1 %v4524_v61  ;;  %v5206_v61 = vshll.u32 %v8537_v1, 16 }
 0x392   : > { %7721 = vmatpush3.bf16.msra.mxu1 %v8505_v15  ;;  %7704 = vmatprep.mubr.msk.bf16.mxu1 %vm8635_vm0, %v10374_v19  ;;  %v5203_v15 = vshrl.u32 %v8537_v1, 16  ;;  %v8561_v1 = vld [vmem:[%s10324_s9] sm:$0xff]  }
 0x393   : > { %7722 = vmatprep.subr.bf16.mxu1 %v10374_v19 }
 0x394   : > { %v5205_v3 = vrot.slane %v5203_v15, 2  ;;  %v8553_v15 = vld [vmem:[#allocation3 + $0x20] sm:$0xff]  }
 0x395   : > { %v5465_v41 = vrot.slane %v8553_v15, 3 }
 0x396   : > { %7723 = vmatpush3.bf16.msra.mxu1 %v8507_v40  ;;  %v4980_v40 = vsel %vm4746_vm12, %v4977_v54, %v4979_v35  ;;  %v5461_v54 = vrot.slane %v8551_v39, 3 }
 0x397   : > { %7744 = vmatprep.subr.bf16.mxu1 %v10374_v19 }
 0x399   : > { %7705 = vmatmul.mubr.bf16.gmra.mrb[16].mxu1 %v4533_v20  ;;  %v5208_v20 = vrot.slane %v5206_v61, 3  ;;  %v8563_v61 = vld [vmem:[%s10324_s9 + $0x10] sm:$0xff]  }
 0x39a   : > { %7724 = vmatprep.mubr.msk.bf16.mxu1 %vm8635_vm0, %v10374_v19 }
 0x39b   : > { %v5209_v60 = vor.u32 %v5208_v20, %v5205_v3  ;;  %v8554_v3 = vld [vmem:[#allocation3 + $0x28] sm:$0xff]   ;;  %v8565_v20 = vld [vmem:[%s10324_s9 + $0x20] sm:$0xff]  }
 0x39d   : > { %v5210_v46 = vsel %vm5193_vm13, %v5201_v14, %v5209_v60 }
 0x3a1   : > { %7725 = vmatmul.mubr.bf16.vlgmr.msra.gmra.mrb[0].mxu1 %v4749_v6  ;;  %v5215_v6 = vshll.u32 %v8540_v23, 16 }
 0x3a2   : > { %7745 = vmatpush3.bf16.msra.mxu1 %v8510_v48  ;;  %7728 = vmatprep.mubr.msk.bf16.mxu1 %vm8635_vm0, %v10374_v19  ;;  %v5212_v48 = vshrl.u32 %v8540_v23, 16  ;;  %v5467_v23 = vrot.slane %v8554_v3, 3 }
 0x3a3   : > { %7746 = vmatprep.subr.bf16.mxu1 %v10374_v19 }
 0x3a4   : > { %v5468_v49 = vsel %vm5459_vm14, %v5465_v41, %v5467_v23 }
 0x3a6   : > { %7747 = vmatpush3.bf16.msra.mxu1 %v8511_v27  ;;  %v8538_v27 = vld [vmem:[%s10323_s8 + $0x200] sm:$0xff]  }
 0x3a7   : > { %7748 = vmatprep.subr.bf16.mxu1 %v10374_v19 }
 0x3a9   : > { %7729 = vmatmul.mubr.bf16.gmra.mrb[4].mxu1 %v4751_v32  ;;  %v5217_v32 = vrot.slane %v5215_v6, 3  ;;  %v8567_v6 = vld [vmem:[%s10324_s9 + $0x30] sm:$0xff]  }
 0x3aa   : > { %7749 = vmatpush3.bf16.msra.mxu1 %v8513_v2  ;;  %7732 = vmatprep.mubr.msk.bf16.mxu1 %vm8635_vm0, %v10374_v19  ;;  %v5214_v2 = vrot.slane %v5212_v48, 2  ;;  %v8556_v48 = vld [vmem:[#allocation2 + $0x1c] sm:$0xff]  }
 0x3ab   : > { %7750 = vmatprep.subr.bf16.mxu1 %v10374_v19 }
 0x3ac   : > { %v5218_v10 = vor.u32 %v5217_v32, %v5214_v2  ;;  %v8568_v2 = vld [vmem:[%s10324_s9 + $0x38] sm:$0xff]  }
 0x3ae   : > { %7751 = vmatpush3.bf16.msra.mxu1 %v8514_v4  ;;  %v8539_v4 = vld [vmem:[%s10323_s8 + $0x208] sm:$0xff]  }
 0x3af   : > { %7752 = vmatprep.subr.bf16.mxu1 %v10374_v19 }
 0x3b1   : > { %7733 = vmatmul.mubr.bf16.gmra.mrb[8].mxu1 %v4753_v47  ;;  %v5224_v47 = vshll.u32 %v8543_v42, 16 }
 0x3b2   : > { %7753 = vmatpush3.bf16.msra.mxu1 %v8516_v43  ;;  %7736 = vmatprep.mubr.msk.bf16.mxu1 %vm8635_vm0, %v10374_v19  ;;  %v5221_v43 = vshrl.u32 %v8543_v42, 16 }
 0x3b3   : > { %7754 = vmatprep.subr.bf16.mxu1 %v10374_v19 }
 0x3b4   : > { %v5223_v62 = vrot.slane %v5221_v43, 2 }
 0x3b6   : > { %7755 = vmatpush3.bf16.msra.mxu1 %v8518_v28  ;;  %v5219_v28 = vsel %vm5193_vm13, %v5209_v60, %v5218_v10  ;;  %v8555_v60 = vld [vmem:[#allocation3 + $0x30] ss:$0 sps:$4 sm:$0x77]  }
 0x3b7   : > { %7756 = vmatprep.subr.bf16.mxu1 %v10374_v19  ;;  %v5469_v14 = vrot.slane %v8555_v60, 3 }
 0x3b9   : > { %7737 = vmatmul.mubr.bf16.gmra.mrb[12].mxu1 %v4755_v44  ;;  %v8545_v44 = vld [vmem:[#allocation3 + $0x28] sm:$0xff]   ;;  %v5470_v32 = vsel %vm5459_vm14, %v5467_v23, %v5469_v14 }
 0x3ba   : > { %7757 = vmatpush3.bf16.msra.mxu1 %v8519_v0  ;;  %7740 = vmatprep.mubr.msk.bf16.mxu1 %vm8635_vm0, %v10374_v19  ;;  %v5226_v0 = vrot.slane %v5224_v47, 3  ;;  %v5230_v36 = vshrl.u32 %v8545_v44, 16 }
 0x3bb   : > { %7758 = vmatprep.subr.bf16.mxu1 %v10374_v19 }
 0x3bc   : > { %v5232_v24 = vrot.slane %v5230_v36, 2 }
 0x3be   : > { %7759 = vmatpush3.bf16.msra.mxu1 %v8521_v8  ;;  %v5227_v8 = vor.u32 %v5226_v0, %v5223_v62 }
 0x3bf   : > { %7780 = vmatprep.subr.bf16.mxu1 %v10374_v19 }
 0x3c0   : > { %v5228_v12 = vsel %vm5193_vm13, %v5218_v10, %v5227_v8  ;;  %v8557_v10 = vld [vmem:[#allocation2 + $0x24] sm:$0xff]  }
 0x3c1   : > { %7741 = vmatmul.mubr.bf16.gmra.mrb[16].mxu1 %v4757_v55  ;;  %v5233_v55 = vshll.u32 %v8545_v44, 16  ;;  %v5728_v47 = vshrl.u32 %v8557_v10, 16  ;;  %v8558_v44 = vld [vmem:[#allocation2 + $0x2c] ss:$0 sps:$4 sm:$0x33]  }
 0x3c2   : > { %7760 = vmatprep.mubr.msk.bf16.mxu1 %vm8635_vm0, %v10374_v19  ;;  %v5740_v36 = vshll.u32 %v8558_v44, 16 }
 0x3c3   : > { %v5235_v18 = vrot.slane %v5233_v55, 3  ;;  %v5730_v62 = vrot.slane %v5728_v47, 1 }
 0x3c5   : > { %v5236_v51 = vor.u32 %v5235_v18, %v5232_v24 }
 0x3c9   : > { %7761 = vmatmul.mubr.bf16.vlgmr.msra.gmra.mrb[0].mxu1 %v4972_v29  ;;  %v8546_v29 = vld [vmem:[%s10323_s8 + $0x228] sm:$0xff]  }
 0x3ca   : > { %7781 = vmatpush3.bf16.msra.mxu1 %v8524_v38  ;;  %7764 = vmatprep.mubr.msk.bf16.mxu1 %vm8635_vm0, %v10374_v19  ;;  %v8548_v38 = vld [vmem:[#allocation3 + $0x30] ss:$0 sps:$4 sm:$0x77]  }
 0x3cb   : > { %7782 = vmatprep.subr.bf16.mxu1 %v10374_v19  ;;  %v5242_v9 = vshll.u32 %v8548_v38, 16 }
 0x3ce   : > { %7783 = vmatpush3.bf16.msra.mxu1 %v8525_v17  ;;  %v5239_v17 = vshrl.u32 %v8548_v38, 16 }
 0x3cf   : > { %7784 = vmatprep.subr.bf16.mxu1 %v10374_v19 }
 0x3d0   : > { %v5241_v31 = vrot.slane %v5239_v17, 2 }
 0x3d1   : > { %7765 = vmatmul.mubr.bf16.gmra.mrb[4].mxu1 %v4974_v16  ;;  %v5237_v16 = vsel %vm5193_vm13, %v5227_v8, %v5236_v51  ;;  %v5737_v8 = vshrl.u32 %v8558_v44, 16 }
 0x3d2   : > { %7785 = vmatpush3.bf16.msra.mxu1 %v8527_v5  ;;  %7768 = vmatprep.mubr.msk.bf16.mxu1 %vm8635_vm0, %v10374_v19  ;;  %v8547_v5 = vld [vmem:[%s10323_s8 + $0x230] sm:$0xff]  }
 0x3d3   : > { %7786 = vmatprep.subr.bf16.mxu1 %v10374_v19 }
 0x3d6   : > { %7787 = vmatpush3.bf16.msra.mxu1 %v8528_v26  ;;  %v5244_v26 = vrot.slane %v5242_v9, 3 }
 0x3d7   : > { %7788 = vmatprep.subr.bf16.mxu1 %v10374_v19 }
 0x3d9   : > { %7769 = vmatmul.mubr.bf16.gmra.mrb[8].mxu1 %v4976_v25 }
 0x3da   : > { %7789 = vmatpush3.bf16.msra.mxu1 %v8530_v58  ;;  %7772 = vmatprep.mubr.msk.bf16.mxu1 %vm8635_vm0, %v10374_v19  ;;  %v5245_v58 = vor.u32 %v5244_v26, %v5241_v31 }
 0x3db   : > { %7790 = vmatprep.subr.bf16.mxu1 %v10374_v19 }
 0x3dc   : > { %v5246_v25 = vsel %vm5193_vm13, %v5236_v51, %v5245_v58 }
 0x3de   : > { %7791 = vmatpush3.bf16.msra.mxu1 %v8532_v56  ;;  %v8550_v56 = vld [vmem:[#allocation3 + $0x8] sm:$0xf8]  }
 0x3df   : > { %7792 = vmatprep.subr.bf16.mxu1 %v10374_v19 }
 0x3e1   : > { %7773 = vmatmul.mubr.bf16.gmra.mrb[12].mxu1 %v4978_v37 }
 0x3e2   : > { %7793 = vmatpush3.bf16.msra.mxu1 %v8533_v30  ;;  %7776 = vmatprep.mubr.msk.bf16.mxu1 %vm8635_vm0, %v10374_v19  ;;  %v5460_v30 = vrot.slane %v8550_v56, 3 }
 0x3e3   : > { %7794 = vmatprep.subr.bf16.mxu1 %v10374_v19 }
 0x3e4   : > { %v5462_v37 = vsel %vm5459_vm14, %v5460_v30, %v5461_v54 }
 0x3e6   : > { %7795 = vmatpush3.bf16.msra.mxu1 %v8535_v59  ;;  %v5463_v59 = vrot.slane %v8552_v53, 3 }
 0x3e7   : > { %7816 = vmatprep.subr.bf16.mxu1 %v10374_v19 }
 0x3e8   : > { %v5464_v35 = vsel %vm5459_vm14, %v5461_v54, %v5463_v59 }
 0x3e9   : > { %7777 = vmatmul.mubr.bf16.gmra.mrb[16].mxu1 %v4980_v40  ;;  %v5466_v40 = vsel %vm5459_vm14, %v5463_v59, %v5465_v41 }
 0x3ea   : > { %7796 = vmatprep.mubr.msk.bf16.mxu1 %vm8635_vm0, %v10374_v19 }
 0x3f1   : > { %7797 = vmatmul.mubr.bf16.vlgmr.msra.gmra.mrb[0].mxu1 %v5210_v46  ;;  %v5722_v46 = vshll.u32 %v8556_v48, 16 }
 0x3f2   : > { %7817 = vmatpush3.bf16.msra.mxu1 %v8538_v27  ;;  %7800 = vmatprep.mubr.msk.bf16.mxu1 %vm8635_vm0, %v10374_v19  ;;  %v5719_v27 = vshrl.u32 %v8556_v48, 16 }
 0x3f3   : > { %7818 = vmatprep.subr.bf16.mxu1 %v10374_v19 }
 0x3f4   : > { %v5721_v42 = vrot.slane %v5719_v27, 1 }
 0x3f6   : > { %7819 = vmatpush3.bf16.msra.mxu1 %v8539_v4  ;;  %v5724_v4 = vrot.slane %v5722_v46, 2 }
 0x3f7   : > { %7820 = vmatprep.subr.bf16.mxu1 %v10374_v19 }
 0x3f8   : > { %v5725_v43 = vor.u32 %v5724_v4, %v5721_v42 }
 0x3f9   : > { %7801 = vmatmul.mubr.bf16.gmra.mrb[4].mxu1 %v5219_v28 }
 0x3fa   : > { %7821 = vmatpush3.bf16.msra.mxu1 %v8541_v22  ;;  %7804 = vmatprep.mubr.msk.bf16.mxu1 %vm8635_vm0, %v10374_v19  ;;  %v5731_v22 = vshll.u32 %v8557_v10, 16  ;;  %v5726_v28 = vsel %vm2013_vm3, %v9706_v52, %v5725_v43 }
 0x3fb   : > { %7822 = vmatprep.subr.bf16.mxu1 %v10374_v19 }
 0x3fc   : > { %v5733_v0 = vrot.slane %v5731_v22, 2 }
 0x3fe   : > { %7823 = vmatpush3.bf16.msra.mxu1 %v8542_v63  ;;  %v5734_v63 = vor.u32 %v5733_v0, %v5730_v62 }
 0x3ff   : > { %7824 = vmatprep.subr.bf16.mxu1 %v10374_v19 }
 0x400   : > { %v5735_v55 = vsel %vm2013_vm3, %v5725_v43, %v5734_v63 }
 0x401   : > { %7805 = vmatmul.mubr.bf16.gmra.mrb[8].mxu1 %v5228_v12  ;;  %v5742_v12 = vrot.slane %v5740_v36, 2 }
 0x402   : > { %7825 = vmatpush3.bf16.msra.mxu1 %v8544_v7  ;;  %7808 = vmatprep.mubr.msk.bf16.mxu1 %vm8635_vm0, %v10374_v19  ;;  %v5739_v7 = vrot.slane %v5737_v8, 1 }
 0x403   : > { %7826 = vmatprep.subr.bf16.mxu1 %v10374_v19 }
 0x404   : > { %v5743_v52 = vor.u32 %v5742_v12, %v5739_v7 }
 0x406   : > { %7827 = vmatpush3.bf16.msra.mxu1 %v8546_v29  ;;  %v5744_v24 = vsel %vm2013_vm3, %v5734_v63, %v5743_v52 }
 0x407   : > { %7828 = vmatprep.subr.bf16.mxu1 %v10374_v19 }
 0x409   : > { %7809 = vmatmul.mubr.bf16.gmra.mrb[12].mxu1 %v5237_v16 }
 0x40a   : > { %7829 = vmatpush3.bf16.msra.mxu1 %v8547_v5  ;;  %7812 = vmatprep.mubr.msk.bf16.mxu1 %vm8635_vm0, %v10374_v19 }
 0x40b   : > { %7830 = vmatprep.subr.bf16.mxu1 %v10374_v19 }
 0x40e   : > { %7831 = vmatpush3.bf16.msra.mxu1 %v8549_v45 }
 0x40f   : > { %7888 = vmatprep.subr.bf16.mxu1 %v10374_v19 }
 0x411   : > { %7813 = vmatmul.mubr.bf16.gmra.mrb[16].mxu1 %v5246_v25 }
 0x412   : > { %7832 = vmatprep.mubr.msk.bf16.mxu1 %vm8635_vm0, %v10374_v19 }
 0x419   : > { %7833 = vmatmul.mubr.bf16.vlgmr.msra.gmra.mrb[0].mxu1 %v5462_v37 }
 0x41a   : > { %7896 = vmatpush3.bf16.msra.mxu1 %v8561_v1  ;;  %7836 = vmatprep.mubr.msk.bf16.mxu1 %vm8635_vm0, %v10374_v19 }
 0x41b   : > { %7889 = vmatprep.subr.bf16.mxu1 %v10374_v19 }
 0x41e   : > { %7897 = vmatpush3.bf16.msra.mxu1 %v8562_v33 }
 0x41f   : > { %7890 = vmatprep.subr.bf16.mxu1 %v10374_v19 }
 0x421   : > { %7837 = vmatmul.mubr.bf16.gmra.mrb[4].mxu1 %v5464_v35 }
 0x422   : > { %7898 = vmatpush3.bf16.msra.mxu1 %v8563_v61  ;;  %7840 = vmatprep.mubr.msk.bf16.mxu1 %vm8635_vm0, %v10374_v19 }
 0x423   : > { %7891 = vmatprep.subr.bf16.mxu1 %v10374_v19 }
 0x426   : > { %7899 = vmatpush3.bf16.msra.mxu1 %v8564_v34 }
 0x427   : > { %7892 = vmatprep.subr.bf16.mxu1 %v10374_v19 }
 0x429   : > { %7841 = vmatmul.mubr.bf16.gmra.mrb[8].mxu1 %v5466_v40 }
 0x42a   : > { %7900 = vmatpush3.bf16.msra.mxu1 %v8565_v20  ;;  %7844 = vmatprep.mubr.msk.bf16.mxu1 %vm8635_vm0, %v10374_v19 }
 0x42b   : > { %7893 = vmatprep.subr.bf16.mxu1 %v10374_v19 }
 0x42e   : > { %7901 = vmatpush3.bf16.msra.mxu1 %v8566_v13 }
 0x42f   : > { %7894 = vmatprep.subr.bf16.mxu1 %v10374_v19 }
 0x431   : > { %7845 = vmatmul.mubr.bf16.gmra.mrb[12].mxu1 %v5468_v49 }
 0x432   : > { %7902 = vmatpush3.bf16.msra.mxu1 %v8567_v6  ;;  %7848 = vmatprep.mubr.msk.bf16.mxu1 %vm8635_vm0, %v10374_v19 }
 0x433   : > { %7895 = vmatprep.subr.bf16.mxu1 %v10374_v19 }
 0x436   : > { %7903 = vmatpush3.bf16.msra.mxu1 %v8568_v2 }
 0x439   : > { %7849 = vmatmul.mubr.bf16.gmra.mrb[16].mxu1 %v5470_v32 }
 0x43a   : > { %7876 = vmatprep.mubr.msk.bf16.mxu1 %vm8635_vm0, %v10374_v19 }
 0x441   : > { %7877 = vmatmul.mubr.bf16.vlgmr.msra.gmra.mrb[8].mxu1 %v5726_v28 }
 0x442   : > { %7880 = vmatprep.mubr.msk.bf16.mxu1 %vm8635_vm0, %v10374_v19 }
 0x449   : > { %7881 = vmatmul.mubr.bf16.gmra.mrb[12].mxu1 %v5735_v55 }
 0x44a   : > { %7884 = vmatprep.mubr.msk.bf16.mxu1 %vm8635_vm0, %v10374_v19 }
 0x451   : > { %7885 = vmatmul.mubr.bf16.gmra.mrb[16].mxu1 %v5744_v24 }
 0x4ec   : > { %v5558_v18 = vpop.f32.mrb[0].mxu1 }
 0x4ed   : > { %v7906_v38 = vadd.f32 %v9825_v21, %v5558_v18  ;;  %v7834_v29 = vpop.f32.mrb[1].mxu1 }
 0x4ee   : > { %v5561_v51 = vpop.f32.mrb[2].mxu1 }
 0x4ef   : > { %5892 = vst [vmem:[%s10250_s27] sm:$0xff] %v7906_v38  ;;  %v7909_v19 = vadd.f32 %v9827_v11, %v5561_v51  ;;  %v7835_v17 = vpop.f32.mrb[3].mxu1 }
 0x4f1   : > { %5882 = vst [vmem:[#allocation4 + $0x8] sm:$0xff] %v7909_v19 }
 0x4f4   : > { %v5566_v9 = vpop.f32.mrb[4].mxu1 }
 0x4f5   : > { %v7912_v5 = vadd.f32 %v9840_v50, %v5566_v9  ;;  %v7838_v16 = vpop.f32.mrb[5].mxu1 }
 0x4f6   : > { %v5569_v31 = vpop.f32.mrb[6].mxu1 }
 0x4f7   : > { %5883 = vst [vmem:[#allocation4 + $0x10] sm:$0xff] %v7912_v5  ;;  %v7915_v21 = vadd.f32 %v9847_v57, %v5569_v31  ;;  %v7839_v26 = vpop.f32.mrb[7].mxu1 }
 0x4f9   : > { %5884 = vst [vmem:[#allocation4 + $0x18] sm:$0xff] %v7915_v21 }
 0x4fe   : > { %v5893_v45 = vld [vmem:[#allocation4 + $0xa] sm:$0xff] }
 0x4ff   : > { %6621 = vst [vmem:[%s10250_s27 + $0x8] sm:$0xff] %v5893_v45 }
 0x500   : > { %v5896_v58 = vld [vmem:[#allocation4 + $0x14] sm:$0xff] }
 0x501   : > { %6622 = vst [vmem:[%s10250_s27 + $0x10] sm:$0xff] %v5896_v58 }
 0x514   : > { %v5848_v25 = vpop.f32.mrb[8].mxu1 }
 0x515   : > { %5885 = vst [vmem:[#allocation4 + $0x20] sm:$0xff] %v5848_v25  ;;  %v7878_v11 = vpop.f32.mrb[9].mxu1 }
 0x516   : > { %v5851_v39 = vpop.f32.mrb[10].mxu1 }
 0x517   : > { %6624 = vst [vmem:[%s10250_s27 + $0x20] sm:$0xff] %v5851_v39  ;;  %v7879_v56 = vpop.f32.mrb[11].mxu1 }
 0x51c   : > { %v5899_v50 = vld [vmem:[#allocation4 + $0x1e] sm:$0xff]  ;;  %v5856_v54 = vpop.f32.mrb[12].mxu1 }
 0x51d   : > { %6623 = vst [vmem:[%s10250_s27 + $0x18] sm:$0xff] %v5899_v50  ;;  %5887 = vst [vmem:[#allocation4 + $0x30] sm:$0xff] %v5856_v54  ;;  %v7882_v57 = vpop.f32.mrb[13].mxu1 }
 0x51e   : > { %v5859_v30 = vpop.f32.mrb[14].mxu1 }
 0x51f   : > { %5888 = vst [vmem:[#allocation4 + $0x38] sm:$0xff] %v5859_v30  ;;  %v7883_v37 = vpop.f32.mrb[15].mxu1 }
 0x524   : > { %v5864_v53 = vpop.f32.mrb[16].mxu1 }
 0x525   : > { %5889 = vst [vmem:[#allocation4 + $0x40] sm:$0xff] %v5864_v53  ;;  %v7886_v1 = vpop.f32.mrb[17].mxu1 }
 0x526   : > { %v5905_v59 = vld [vmem:[#allocation4 + $0x32] sm:$0xff]  ;;  %v5867_v33 = vpop.f32.mrb[18].mxu1 }
 0x527   : > { %6625 = vst [vmem:[%s10250_s27 + $0x28] sm:$0xff] %v5905_v59  ;;  %5890 = vst [vmem:[#allocation4 + $0x48] sm:$0xff] %v5867_v33  ;;  %v7887_v35 = vpop.f32.mrb[19].mxu1 }
 0x52c   : > { %v5908_v15 = vld [vmem:[#allocation4 + $0x3c] sm:$0xff] }
 0x52d   : > { %6626 = vst [vmem:[%s10250_s27 + $0x30] sm:$0xff] %v5908_v15 }
 0x52e   : > { %v5911_v61 = vld [vmem:[#allocation4 + $0x46] sm:$0xff] }
 0x52f   : > { %6627 = vst [vmem:[%s10250_s27 + $0x38] sm:$0xff] %v5911_v61 }
 0x530   : > { %8582 = shalt.err (!%p8579_p3)
}
 0x531   : > { %s8583_s25 = scalar_lea.hbm %s10266_s21, 1024  ;;  %s8587_s11 = scalar_lea.hbm %s10325_s10, 2048 }
 0x532   : > { %p8584_p4 = scmp.ne.s32.totalorder %s10266_s21, %s8583_s25  ;;  %p8588_p9 = scmp.lt.u32.totalorder %s10266_s21, %s10325_s10 }
 0x533   : > { %p8589_p10 = scmp.lt.u32.totalorder %s8587_s11, %s8583_s25  ;;  %p8591_p12 = scmp.lt.u32.totalorder %s8583_s25, %s10266_s21 }
 0x534   : > { %p8585_p7 = pnand %p8584_p4, %p8732_p5 }
 0x535   : > { %p8590_p11 = por %p8589_p10, %p8588_p9 }
 0x536   : > { %p8586_p8 = pneg %p8585_p7 }
 0x537   : > { %p8592_p13 = por %p8591_p12, %p8590_p11 }
 0x539   : > { %p8593_p0 = pnand %p8592_p13, %p8586_p8 }
 0x53b   : > { %8596 = shalt.err (!%p8593_p0)
}
 0x53c   : > { %s8637_s29 = smov 128   ;;  %s8638_s20 = smov 8  }
 0x53d   : > { %8249 = dma.vmem_to_hbm [thread:$0]  (%p8732_p5), %s10268_s30, 1024, %s10266_s21, %s10274_s18, %s8637_s29, %s8637_s29, %s8638_s20  }
 0x53e PF: > { %p8255_p1 = scmp.ge.s32.totalorder %s8631_s16, 2  ;;  %s5943_s26 = sand.u32 1, %s8619_s13  }
 0x53f   : > { %s5944_s25 = scalar_lea.sflag [#allocation6], %s5943_s26 }
 0x540   : > { %p8252_p2 = pnand %p8255_p1, %p8736_p6 }
 0x542   : > { %8614 = dma.done.wait (!%p8252_p2), %s5944_s25, 1024  }
 0x543   : > { %8616 = vsyncadd (!%p8252_p2), %s5944_s25, 4294966272  ;;  %p20_p3 = scmp.ge.s32.totalorder %s8719_s19, 4   ;;  %s10389_s13 = smov %s8623_s14 }
 0x544   : > { %s10390_s14 = smov %s8627_s15  ;;  %s10391_s15 = smov %s8730_s22 }
 0x545   : > { %s10392_s16 = smov %s8719_s19  ;;  %22 = sbr.rel (!%p20_p3) target bundleno = 3 (0x3), region = 124 }
 0x54c   :  { %5949 = vsyncpa [#allocation6], 1 }
 0x54d   :  { %5951 = vsyncpa [#allocation6 + $0x1], 1 }

</bundles_post_ra>
